<compile_context>
chip_gen: v7x
topology: tpu7x:2x2x1
jax: 0.10.0
libtpu: 0.0.40
codegen_flags: <defaults>
</compile_context>

<pallas_src>
import functools

import jax
import jax.numpy as jnp
import numpy as np
from jax import lax
from jax.experimental import pallas as pl
from jax.experimental.pallas import tpu as pltpu


def _fused_seq_kernel(x_ref, w1b_ref, b1_ref, w2b_ref, b2_ref, o_ref,
                      x_stage, h1_ref, h1_stage,
                      *, bsz, kh1, kh2, ho1, ho2):
    """Fused Conv2d(1,20,5)+ReLU -> Conv2d(20,64,5)+ReLU for `bsz` images.

    x_ref:    (bsz, H, W*Cin)                raw input rows (no im2col)
    w1b_ref:  (kh1, W*Cin, wo1*C1p)          layer-1 banded weights
    b1_ref:   (1, wo1*C1p)                   layer-1 bias row (padded)
    w2b_ref:  (kh2, wo1*C1p, wo2*c2)         layer-2 banded weights
    b2_ref:   (1, wo2*c2)                    layer-2 bias row
    o_ref:    (bsz*ho2, wo2*c2)              lane-dense output block (512 lanes)
    x_stage:  VMEM (kh1, bsz*ho1, W*Cin)     input rows staged per vertical tap
    h1_ref:   VMEM (bsz*ho1, wo1*C1p)        resident layer-1 activation
    h1_stage: VMEM (kh2, bsz*ho2, wo1*C1p)   h1 rows staged per vertical tap
    """
    # ---- stage input rows per vertical tap (cheap VMEM copies, static offsets)
    for dh in range(kh1):
        for b in range(bsz):
            x_stage[dh, b * ho1:(b + 1) * ho1, :] = x_ref[b, dh:dh + ho1, :]

    # ---- layer 1: kh1 banded matmuls over the whole per-step batch ----------
    n1 = w1b_ref.shape[-1]
    acc1 = jnp.zeros((bsz * ho1, n1), jnp.float32)
    for dh in range(kh1):
        acc1 = acc1 + jnp.dot(x_stage[dh], w1b_ref[dh],
                              preferred_element_type=jnp.float32)
    # bias + ReLU fused; intermediate stays resident in VMEM (no HBM round trip)
    h1_ref[...] = jnp.maximum(acc1 + b1_ref[...], 0.0)

    # ---- re-stage the resident intermediate per layer-2 vertical tap --------
    for dh in range(kh2):
        for b in range(bsz):
            r0 = b * ho1 + dh
            h1_stage[dh, b * ho2:(b + 1) * ho2, :] = h1_ref[r0:r0 + ho2, :]

    # ---- layer 2: kh2 banded matmuls; lane-dense (bsz*ho2, wo2*c2) store ----
    n2 = w2b_ref.shape[-1]
    acc2 = jnp.zeros((bsz * ho2, n2), jnp.float32)
    for dh in range(kh2):
        acc2 = acc2 + jnp.dot(h1_stage[dh], w2b_ref[dh],
                              preferred_element_type=jnp.float32)
    o_ref[...] = jnp.maximum(acc2 + b2_ref[...], 0.0).astype(o_ref.dtype)


def prepare_params(params, image_hw, c1_pad=32):
    """Once-per-(model, image-size) host-side weight relayout.

    Each conv becomes kh banded matrices: band[dh][win*Cin+ci, j*Cout+o] =
    w[o, ci, dh, win-j] for 0 <= win-j < kw, else 0.  Layer-1 output channels
    are zero-padded 20 -> C1p=32 so all lane extents are 32/128-aligned.
    """
    (w1, b1), (w2, b2) = params
    w1 = np.asarray(w1, np.float32)
    b1 = np.asarray(b1, np.float32)
    w2 = np.asarray(w2, np.float32)
    b2 = np.asarray(b2, np.float32)

    c1, cin, kh1, kw1 = w1.shape           # (20, 1, 5, 5)
    c2, c1_in, kh2, kw2 = w2.shape         # (64, 20, 5, 5)
    assert c1_in == c1
    H, W = image_hw
    ho1, wo1 = H - kh1 + 1, W - kw1 + 1
    ho2, wo2 = ho1 - kh2 + 1, wo1 - kw2 + 1
    C1p = max(c1_pad, c1)                  # lane-aligned layer-1 channel width

    # Layer-1 banded weights: (kh1, W*Cin, wo1*C1p)
    w1b = np.zeros((kh1, W * cin, wo1 * C1p), np.float32)
    for dh in range(kh1):
        for j in range(wo1):
            for dw in range(kw1):
                r0 = (j + dw) * cin
                w1b[dh, r0:r0 + cin, j * C1p:j * C1p + c1] = w1[:, :, dh, dw].T
    b1row = np.zeros((1, wo1 * C1p), np.float32)
    for j in range(wo1):
        b1row[0, j * C1p:j * C1p + c1] = b1

    # Layer-2 banded weights: (kh2, wo1*C1p, wo2*c2)
    w2b = np.zeros((kh2, wo1 * C1p, wo2 * c2), np.float32)
    for dh in range(kh2):
        for j in range(wo2):
            for dw in range(kw2):
                r0 = (j + dw) * C1p
                w2b[dh, r0:r0 + c1, j * c2:(j + 1) * c2] = w2[:, :, dh, dw].T
    b2row = np.tile(b2, wo2)[None, :]      # (1, wo2*c2), channel innermost

    return dict(
        w1b=jnp.asarray(w1b), b1row=jnp.asarray(b1row),
        w2b=jnp.asarray(w2b), b2row=jnp.asarray(b2row),
        dims=dict(cin=cin, c1=c1, c2=c2, C1p=C1p,
                  kh1=kh1, kw1=kw1, kh2=kh2, kw2=kw2,
                  H=H, W=W, ho1=ho1, wo1=wo1, ho2=ho2, wo2=wo2))


def sequential_forward(x_nchw, prep, *, batch_block=4):
    """Equivalent of Sequential.forward for
    Conv2d(1,20,5) -> ReLU -> Conv2d(20,64,5) -> ReLU, fused in one pallas_call."""
    d = prep["dims"]
    n, cin, H, W = x_nchw.shape
    assert (cin, H, W) == (d["cin"], d["H"], d["W"])
    ho1, wo1, ho2, wo2 = d["ho1"], d["wo1"], d["ho2"], d["wo2"]
    c2, C1p = d["c2"], d["C1p"]
    kh1, kh2 = d["kh1"], d["kh2"]

    # B images per grid step; pad N up to a multiple of B.  Pick B so the
    # grid stays >=2 when possible (keeps both v7x TensorCores busy).
    B = max(1, min(batch_block, n))
    g = -(-n // B)
    n_pad = g * B

    # Raw image rows (channel innermost per column); NO wrapper-side im2col.
    x_in = jnp.transpose(x_nchw, (0, 2, 3, 1)).reshape(n, H, W * cin)
    if n_pad != n:
        x_in = jnp.pad(x_in, ((0, n_pad - n), (0, 0), (0, 0)))

    kernel = functools.partial(_fused_seq_kernel, bsz=B, kh1=kh1, kh2=kh2,
                               ho1=ho1, ho2=ho2)

    out_flat = pl.pallas_call(
        kernel,
        out_shape=jax.ShapeDtypeStruct((n_pad * ho2, wo2 * c2), x_nchw.dtype),
        grid=(g,),
        in_specs=[
            pl.BlockSpec((B, H, W * cin), lambda i: (i, 0, 0)),
            pl.BlockSpec(prep["w1b"].shape, lambda i: (0, 0, 0)),
            pl.BlockSpec(prep["b1row"].shape, lambda i: (0, 0)),
            pl.BlockSpec(prep["w2b"].shape, lambda i: (0, 0, 0)),
            pl.BlockSpec(prep["b2row"].shape, lambda i: (0, 0)),
        ],
        out_specs=pl.BlockSpec((B * ho2, wo2 * c2), lambda i: (i, 0)),
        scratch_shapes=[
            pltpu.VMEM((kh1, B * ho1, W * cin), jnp.float32),   # x row staging
            pltpu.VMEM((B * ho1, wo1 * C1p), jnp.float32),      # resident h1
            pltpu.VMEM((kh2, B * ho2, wo1 * C1p), jnp.float32), # h1 row staging
        ],
        compiler_params=pltpu.CompilerParams(
            dimension_semantics=("parallel",)),   # images split across TCs (v7x)
    )(x_in, prep["w1b"], prep["b1row"], prep["w2b"], prep["b2row"])

    # Lane-dense kernel output -> NCHW; XLA fuses the reshape + transpose.
    out = out_flat.reshape(n_pad, ho2, wo2, c2)[:n]
    return jnp.transpose(out, (0, 3, 1, 2))


def reference_forward(x_nchw, params):
    """Plain-JAX reference (lax.conv, full precision) for correctness checking."""
    (w1, b1), (w2, b2) = params
    dn = ("NCHW", "OIHW", "NCHW")
    y = lax.conv_general_dilated(x_nchw, w1, (1, 1), "VALID",
                                 dimension_numbers=dn,
                                 precision=lax.Precision.HIGHEST)
    y = jnp.maximum(y + b1[None, :, None, None], 0.0)
    y = lax.conv_general_dilated(y, w2, (1, 1), "VALID",
                                 dimension_numbers=dn,
                                 precision=lax.Precision.HIGHEST)
    y = jnp.maximum(y + b2[None, :, None, None], 0.0)
    return y


if __name__ == "__main__":
    key = jax.random.PRNGKey(0)
    k_x, k_w1, k_b1, k_w2, k_b2 = jax.random.split(key, 5)

    # 8 images of 1x16x16 -> with B=4 per step the grid is 2 (even, v7x-friendly).
    N, Cin, H, W = 8, 1, 16, 16
    x = jax.random.normal(k_x, (N, Cin, H, W), jnp.float32)

    # Deterministic synthetic parameters (PyTorch Conv2d shapes: OIHW / (O,)).
    w1 = jax.random.normal(k_w1, (20, 1, 5, 5), jnp.float32) * 0.1
    b1 = jax.random.normal(k_b1, (20,), jnp.float32) * 0.1
    w2 = jax.random.normal(k_w2, (64, 20, 5, 5), jnp.float32) * 0.05
    b2 = jax.random.normal(k_b2, (64,), jnp.float32) * 0.1
    params = ((w1, b1), (w2, b2))

    prep = prepare_params(params, image_hw=(H, W))     # hoisted, done once
    fwd = jax.jit(functools.partial(sequential_forward, prep=prep))

    out = jax.block_until_ready(fwd(x))
    ref = jax.block_until_ready(reference_forward(x, params))

    assert out.shape == (N, 64, 8, 8), out.shape
    # Default-precision f32 MXU matmuls use bf16 passes, so compare at ~1e-2.
    max_err = float(jnp.max(jnp.abs(out - ref)))
    assert jnp.allclose(out, ref, atol=3e-2, rtol=3e-2), f"max|diff|={max_err}"
    print("KERNEL_OK")
</pallas_src>

<mosaic_0001>
module attributes {stable_mosaic.version = 11 : i64} {
  func.func @_fused_seq_kernel(%arg0: i32, %arg1: memref<4x16x16xf32, #tpu.memory_space<vmem>>, %arg2: memref<5x16x384xf32, #tpu.memory_space<vmem>>, %arg3: memref<1x384xf32, #tpu.memory_space<vmem>>, %arg4: memref<5x384x512xf32, #tpu.memory_space<vmem>>, %arg5: memref<1x512xf32, #tpu.memory_space<vmem>>, %arg6: memref<32x512xf32, #tpu.memory_space<vmem>>, %arg7: memref<5x48x16xf32, #tpu.memory_space<vmem>>, %arg8: memref<48x384xf32, #tpu.memory_space<vmem>>, %arg9: memref<5x32x384xf32, #tpu.memory_space<vmem>>) attributes {dimension_semantics = [#tpu.dimension_semantics<parallel>], iteration_bounds = array<i64: 2>, scalar_prefetch = 0 : i64, scratch_operands = 3 : i64, tpu.core_type = #tpu.core_type<tc>, window_params = [{transform_indices = @transform_0, window_bounds = array<i64: 4, 16, 16>}, {pipeline_mode = #tpu.pipeline_mode<synchronous>, transform_indices = @transform_1, window_bounds = array<i64: 5, 16, 384>}, {pipeline_mode = #tpu.pipeline_mode<synchronous>, transform_indices = @transform_2, window_bounds = array<i64: 1, 384>}, {pipeline_mode = #tpu.pipeline_mode<synchronous>, transform_indices = @transform_3, window_bounds = array<i64: 5, 384, 512>}, {pipeline_mode = #tpu.pipeline_mode<synchronous>, transform_indices = @transform_4, window_bounds = array<i64: 1, 512>}, {transform_indices = @transform_5, window_bounds = array<i64: 32, 512>}]} {
    %c0 = arith.constant 0 : index
    %c0_0 = arith.constant 0 : index
    %c0_1 = arith.constant 0 : index
    %0 = vector.load %arg1[%c0, %c0_0, %c0_1] : memref<4x16x16xf32, #tpu.memory_space<vmem>>, vector<1x12x16xf32>
    %1 = vector.shape_cast %0 : vector<1x12x16xf32> to vector<12x16xf32>
    %c0_2 = arith.constant 0 : index
    %c0_3 = arith.constant 0 : index
    %c0_4 = arith.constant 0 : index
    %2 = vector.load %arg7[%c0_2, %c0_3, %c0_4] : memref<5x48x16xf32, #tpu.memory_space<vmem>>, vector<1x12x16xf32>
    %3 = vector.shape_cast %2 : vector<1x12x16xf32> to vector<12x16xf32>
    %4 = vector.shape_cast %1 : vector<12x16xf32> to vector<1x12x16xf32>
    tpu.vector_store %arg7[%c0_2, %c0_3, %c0_4], %4 {strides = array<i32>} : memref<5x48x16xf32, #tpu.memory_space<vmem>>, vector<1x12x16xf32>,
    %c1 = arith.constant 1 : index
    %c0_5 = arith.constant 0 : index
    %c0_6 = arith.constant 0 : index
    %5 = vector.load %arg1[%c1, %c0_5, %c0_6] : memref<4x16x16xf32, #tpu.memory_space<vmem>>, vector<1x12x16xf32>
    %6 = vector.shape_cast %5 : vector<1x12x16xf32> to vector<12x16xf32>
    %c0_7 = arith.constant 0 : index
    %c12 = arith.constant 12 : index
    %c0_8 = arith.constant 0 : index
    %7 = vector.load %arg7[%c0_7, %c12, %c0_8] : memref<5x48x16xf32, #tpu.memory_space<vmem>>, vector<1x12x16xf32>
    %8 = vector.shape_cast %7 : vector<1x12x16xf32> to vector<12x16xf32>
    %9 = vector.shape_cast %6 : vector<12x16xf32> to vector<1x12x16xf32>
    tpu.vector_store %arg7[%c0_7, %c12, %c0_8], %9 {strides = array<i32>} : memref<5x48x16xf32, #tpu.memory_space<vmem>>, vector<1x12x16xf32>,
    %c2 = arith.constant 2 : index
    %c0_9 = arith.constant 0 : index
    %c0_10 = arith.constant 0 : index
    %10 = vector.load %arg1[%c2, %c0_9, %c0_10] : memref<4x16x16xf32, #tpu.memory_space<vmem>>, vector<1x12x16xf32>
    %11 = vector.shape_cast %10 : vector<1x12x16xf32> to vector<12x16xf32>
    %c0_11 = arith.constant 0 : index
    %c24 = arith.constant 24 : index
    %c0_12 = arith.constant 0 : index
    %12 = vector.load %arg7[%c0_11, %c24, %c0_12] : memref<5x48x16xf32, #tpu.memory_space<vmem>>, vector<1x12x16xf32>
    %13 = vector.shape_cast %12 : vector<1x12x16xf32> to vector<12x16xf32>
    %14 = vector.shape_cast %11 : vector<12x16xf32> to vector<1x12x16xf32>
    tpu.vector_store %arg7[%c0_11, %c24, %c0_12], %14 {strides = array<i32>} : memref<5x48x16xf32, #tpu.memory_space<vmem>>, vector<1x12x16xf32>,
    %c3 = arith.constant 3 : index
    %c0_13 = arith.constant 0 : index
    %c0_14 = arith.constant 0 : index
    %15 = vector.load %arg1[%c3, %c0_13, %c0_14] : memref<4x16x16xf32, #tpu.memory_space<vmem>>, vector<1x12x16xf32>
    %16 = vector.shape_cast %15 : vector<1x12x16xf32> to vector<12x16xf32>
    %c0_15 = arith.constant 0 : index
    %c36 = arith.constant 36 : index
    %c0_16 = arith.constant 0 : index
    %17 = vector.load %arg7[%c0_15, %c36, %c0_16] : memref<5x48x16xf32, #tpu.memory_space<vmem>>, vector<1x12x16xf32>
    %18 = vector.shape_cast %17 : vector<1x12x16xf32> to vector<12x16xf32>
    %19 = vector.shape_cast %16 : vector<12x16xf32> to vector<1x12x16xf32>
    tpu.vector_store %arg7[%c0_15, %c36, %c0_16], %19 {strides = array<i32>} : memref<5x48x16xf32, #tpu.memory_space<vmem>>, vector<1x12x16xf32>,
    %c0_17 = arith.constant 0 : index
    %c1_18 = arith.constant 1 : index
    %c0_19 = arith.constant 0 : index
    %20 = vector.load %arg1[%c0_17, %c1_18, %c0_19] : memref<4x16x16xf32, #tpu.memory_space<vmem>>, vector<1x12x16xf32>
    %21 = vector.shape_cast %20 : vector<1x12x16xf32> to vector<12x16xf32>
    %c1_20 = arith.constant 1 : index
    %c0_21 = arith.constant 0 : index
    %c0_22 = arith.constant 0 : index
    %22 = vector.load %arg7[%c1_20, %c0_21, %c0_22] : memref<5x48x16xf32, #tpu.memory_space<vmem>>, vector<1x12x16xf32>
    %23 = vector.shape_cast %22 : vector<1x12x16xf32> to vector<12x16xf32>
    %24 = vector.shape_cast %21 : vector<12x16xf32> to vector<1x12x16xf32>
    tpu.vector_store %arg7[%c1_20, %c0_21, %c0_22], %24 {strides = array<i32>} : memref<5x48x16xf32, #tpu.memory_space<vmem>>, vector<1x12x16xf32>,
    %c1_23 = arith.constant 1 : index
    %c1_24 = arith.constant 1 : index
    %c0_25 = arith.constant 0 : index
    %25 = vector.load %arg1[%c1_23, %c1_24, %c0_25] : memref<4x16x16xf32, #tpu.memory_space<vmem>>, vector<1x12x16xf32>
    %26 = vector.shape_cast %25 : vector<1x12x16xf32> to vector<12x16xf32>
    %c1_26 = arith.constant 1 : index
    %c12_27 = arith.constant 12 : index
    %c0_28 = arith.constant 0 : index
    %27 = vector.load %arg7[%c1_26, %c12_27, %c0_28] : memref<5x48x16xf32, #tpu.memory_space<vmem>>, vector<1x12x16xf32>
    %28 = vector.shape_cast %27 : vector<1x12x16xf32> to vector<12x16xf32>
    %29 = vector.shape_cast %26 : vector<12x16xf32> to vector<1x12x16xf32>
    tpu.vector_store %arg7[%c1_26, %c12_27, %c0_28], %29 {strides = array<i32>} : memref<5x48x16xf32, #tpu.memory_space<vmem>>, vector<1x12x16xf32>,
    %c2_29 = arith.constant 2 : index
    %c1_30 = arith.constant 1 : index
    %c0_31 = arith.constant 0 : index
    %30 = vector.load %arg1[%c2_29, %c1_30, %c0_31] : memref<4x16x16xf32, #tpu.memory_space<vmem>>, vector<1x12x16xf32>
    %31 = vector.shape_cast %30 : vector<1x12x16xf32> to vector<12x16xf32>
    %c1_32 = arith.constant 1 : index
    %c24_33 = arith.constant 24 : index
    %c0_34 = arith.constant 0 : index
    %32 = vector.load %arg7[%c1_32, %c24_33, %c0_34] : memref<5x48x16xf32, #tpu.memory_space<vmem>>, vector<1x12x16xf32>
    %33 = vector.shape_cast %32 : vector<1x12x16xf32> to vector<12x16xf32>
    %34 = vector.shape_cast %31 : vector<12x16xf32> to vector<1x12x16xf32>
    tpu.vector_store %arg7[%c1_32, %c24_33, %c0_34], %34 {strides = array<i32>} : memref<5x48x16xf32, #tpu.memory_space<vmem>>, vector<1x12x16xf32>,
    %c3_35 = arith.constant 3 : index
    %c1_36 = arith.constant 1 : index
    %c0_37 = arith.constant 0 : index
    %35 = vector.load %arg1[%c3_35, %c1_36, %c0_37] : memref<4x16x16xf32, #tpu.memory_space<vmem>>, vector<1x12x16xf32>
    %36 = vector.shape_cast %35 : vector<1x12x16xf32> to vector<12x16xf32>
    %c1_38 = arith.constant 1 : index
    %c36_39 = arith.constant 36 : index
    %c0_40 = arith.constant 0 : index
    %37 = vector.load %arg7[%c1_38, %c36_39, %c0_40] : memref<5x48x16xf32, #tpu.memory_space<vmem>>, vector<1x12x16xf32>
    %38 = vector.shape_cast %37 : vector<1x12x16xf32> to vector<12x16xf32>
    %39 = vector.shape_cast %36 : vector<12x16xf32> to vector<1x12x16xf32>
    tpu.vector_store %arg7[%c1_38, %c36_39, %c0_40], %39 {strides = array<i32>} : memref<5x48x16xf32, #tpu.memory_space<vmem>>, vector<1x12x16xf32>,
    %c0_41 = arith.constant 0 : index
    %c2_42 = arith.constant 2 : index
    %c0_43 = arith.constant 0 : index
    %40 = vector.load %arg1[%c0_41, %c2_42, %c0_43] : memref<4x16x16xf32, #tpu.memory_space<vmem>>, vector<1x12x16xf32>
    %41 = vector.shape_cast %40 : vector<1x12x16xf32> to vector<12x16xf32>
    %c2_44 = arith.constant 2 : index
    %c0_45 = arith.constant 0 : index
    %c0_46 = arith.constant 0 : index
    %42 = vector.load %arg7[%c2_44, %c0_45, %c0_46] : memref<5x48x16xf32, #tpu.memory_space<vmem>>, vector<1x12x16xf32>
    %43 = vector.shape_cast %42 : vector<1x12x16xf32> to vector<12x16xf32>
    %44 = vector.shape_cast %41 : vector<12x16xf32> to vector<1x12x16xf32>
    tpu.vector_store %arg7[%c2_44, %c0_45, %c0_46], %44 {strides = array<i32>} : memref<5x48x16xf32, #tpu.memory_space<vmem>>, vector<1x12x16xf32>,
    %c1_47 = arith.constant 1 : index
    %c2_48 = arith.constant 2 : index
    %c0_49 = arith.constant 0 : index
    %45 = vector.load %arg1[%c1_47, %c2_48, %c0_49] : memref<4x16x16xf32, #tpu.memory_space<vmem>>, vector<1x12x16xf32>
    %46 = vector.shape_cast %45 : vector<1x12x16xf32> to vector<12x16xf32>
    %c2_50 = arith.constant 2 : index
    %c12_51 = arith.constant 12 : index
    %c0_52 = arith.constant 0 : index
    %47 = vector.load %arg7[%c2_50, %c12_51, %c0_52] : memref<5x48x16xf32, #tpu.memory_space<vmem>>, vector<1x12x16xf32>
    %48 = vector.shape_cast %47 : vector<1x12x16xf32> to vector<12x16xf32>
    %49 = vector.shape_cast %46 : vector<12x16xf32> to vector<1x12x16xf32>
    tpu.vector_store %arg7[%c2_50, %c12_51, %c0_52], %49 {strides = array<i32>} : memref<5x48x16xf32, #tpu.memory_space<vmem>>, vector<1x12x16xf32>,
    %c2_53 = arith.constant 2 : index
    %c2_54 = arith.constant 2 : index
    %c0_55 = arith.constant 0 : index
    %50 = vector.load %arg1[%c2_53, %c2_54, %c0_55] : memref<4x16x16xf32, #tpu.memory_space<vmem>>, vector<1x12x16xf32>
    %51 = vector.shape_cast %50 : vector<1x12x16xf32> to vector<12x16xf32>
    %c2_56 = arith.constant 2 : index
    %c24_57 = arith.constant 24 : index
    %c0_58 = arith.constant 0 : index
    %52 = vector.load %arg7[%c2_56, %c24_57, %c0_58] : memref<5x48x16xf32, #tpu.memory_space<vmem>>, vector<1x12x16xf32>
    %53 = vector.shape_cast %52 : vector<1x12x16xf32> to vector<12x16xf32>
    %54 = vector.shape_cast %51 : vector<12x16xf32> to vector<1x12x16xf32>
    tpu.vector_store %arg7[%c2_56, %c24_57, %c0_58], %54 {strides = array<i32>} : memref<5x48x16xf32, #tpu.memory_space<vmem>>, vector<1x12x16xf32>,
    %c3_59 = arith.constant 3 : index
    %c2_60 = arith.constant 2 : index
    %c0_61 = arith.constant 0 : index
    %55 = vector.load %arg1[%c3_59, %c2_60, %c0_61] : memref<4x16x16xf32, #tpu.memory_space<vmem>>, vector<1x12x16xf32>
    %56 = vector.shape_cast %55 : vector<1x12x16xf32> to vector<12x16xf32>
    %c2_62 = arith.constant 2 : index
    %c36_63 = arith.constant 36 : index
    %c0_64 = arith.constant 0 : index
    %57 = vector.load %arg7[%c2_62, %c36_63, %c0_64] : memref<5x48x16xf32, #tpu.memory_space<vmem>>, vector<1x12x16xf32>
    %58 = vector.shape_cast %57 : vector<1x12x16xf32> to vector<12x16xf32>
    %59 = vector.shape_cast %56 : vector<12x16xf32> to vector<1x12x16xf32>
    tpu.vector_store %arg7[%c2_62, %c36_63, %c0_64], %59 {strides = array<i32>} : memref<5x48x16xf32, #tpu.memory_space<vmem>>, vector<1x12x16xf32>,
    %c0_65 = arith.constant 0 : index
    %c3_66 = arith.constant 3 : index
    %c0_67 = arith.constant 0 : index
    %60 = vector.load %arg1[%c0_65, %c3_66, %c0_67] : memref<4x16x16xf32, #tpu.memory_space<vmem>>, vector<1x12x16xf32>
    %61 = vector.shape_cast %60 : vector<1x12x16xf32> to vector<12x16xf32>
    %c3_68 = arith.constant 3 : index
    %c0_69 = arith.constant 0 : index
    %c0_70 = arith.constant 0 : index
    %62 = vector.load %arg7[%c3_68, %c0_69, %c0_70] : memref<5x48x16xf32, #tpu.memory_space<vmem>>, vector<1x12x16xf32>
    %63 = vector.shape_cast %62 : vector<1x12x16xf32> to vector<12x16xf32>
    %64 = vector.shape_cast %61 : vector<12x16xf32> to vector<1x12x16xf32>
    tpu.vector_store %arg7[%c3_68, %c0_69, %c0_70], %64 {strides = array<i32>} : memref<5x48x16xf32, #tpu.memory_space<vmem>>, vector<1x12x16xf32>,
    %c1_71 = arith.constant 1 : index
    %c3_72 = arith.constant 3 : index
    %c0_73 = arith.constant 0 : index
    %65 = vector.load %arg1[%c1_71, %c3_72, %c0_73] : memref<4x16x16xf32, #tpu.memory_space<vmem>>, vector<1x12x16xf32>
    %66 = vector.shape_cast %65 : vector<1x12x16xf32> to vector<12x16xf32>
    %c3_74 = arith.constant 3 : index
    %c12_75 = arith.constant 12 : index
    %c0_76 = arith.constant 0 : index
    %67 = vector.load %arg7[%c3_74, %c12_75, %c0_76] : memref<5x48x16xf32, #tpu.memory_space<vmem>>, vector<1x12x16xf32>
    %68 = vector.shape_cast %67 : vector<1x12x16xf32> to vector<12x16xf32>
    %69 = vector.shape_cast %66 : vector<12x16xf32> to vector<1x12x16xf32>
    tpu.vector_store %arg7[%c3_74, %c12_75, %c0_76], %69 {strides = array<i32>} : memref<5x48x16xf32, #tpu.memory_space<vmem>>, vector<1x12x16xf32>,
    %c2_77 = arith.constant 2 : index
    %c3_78 = arith.constant 3 : index
    %c0_79 = arith.constant 0 : index
    %70 = vector.load %arg1[%c2_77, %c3_78, %c0_79] : memref<4x16x16xf32, #tpu.memory_space<vmem>>, vector<1x12x16xf32>
    %71 = vector.shape_cast %70 : vector<1x12x16xf32> to vector<12x16xf32>
    %c3_80 = arith.constant 3 : index
    %c24_81 = arith.constant 24 : index
    %c0_82 = arith.constant 0 : index
    %72 = vector.load %arg7[%c3_80, %c24_81, %c0_82] : memref<5x48x16xf32, #tpu.memory_space<vmem>>, vector<1x12x16xf32>
    %73 = vector.shape_cast %72 : vector<1x12x16xf32> to vector<12x16xf32>
    %74 = vector.shape_cast %71 : vector<12x16xf32> to vector<1x12x16xf32>
    tpu.vector_store %arg7[%c3_80, %c24_81, %c0_82], %74 {strides = array<i32>} : memref<5x48x16xf32, #tpu.memory_space<vmem>>, vector<1x12x16xf32>,
    %c3_83 = arith.constant 3 : index
    %c3_84 = arith.constant 3 : index
    %c0_85 = arith.constant 0 : index
    %75 = vector.load %arg1[%c3_83, %c3_84, %c0_85] : memref<4x16x16xf32, #tpu.memory_space<vmem>>, vector<1x12x16xf32>
    %76 = vector.shape_cast %75 : vector<1x12x16xf32> to vector<12x16xf32>
    %c3_86 = arith.constant 3 : index
    %c36_87 = arith.constant 36 : index
    %c0_88 = arith.constant 0 : index
    %77 = vector.load %arg7[%c3_86, %c36_87, %c0_88] : memref<5x48x16xf32, #tpu.memory_space<vmem>>, vector<1x12x16xf32>
    %78 = vector.shape_cast %77 : vector<1x12x16xf32> to vector<12x16xf32>
    %79 = vector.shape_cast %76 : vector<12x16xf32> to vector<1x12x16xf32>
    tpu.vector_store %arg7[%c3_86, %c36_87, %c0_88], %79 {strides = array<i32>} : memref<5x48x16xf32, #tpu.memory_space<vmem>>, vector<1x12x16xf32>,
    %c0_89 = arith.constant 0 : index
    %c4 = arith.constant 4 : index
    %c0_90 = arith.constant 0 : index
    %80 = vector.load %arg1[%c0_89, %c4, %c0_90] : memref<4x16x16xf32, #tpu.memory_space<vmem>>, vector<1x12x16xf32>
    %81 = vector.shape_cast %80 : vector<1x12x16xf32> to vector<12x16xf32>
    %c4_91 = arith.constant 4 : index
    %c0_92 = arith.constant 0 : index
    %c0_93 = arith.constant 0 : index
    %82 = vector.load %arg7[%c4_91, %c0_92, %c0_93] : memref<5x48x16xf32, #tpu.memory_space<vmem>>, vector<1x12x16xf32>
    %83 = vector.shape_cast %82 : vector<1x12x16xf32> to vector<12x16xf32>
    %84 = vector.shape_cast %81 : vector<12x16xf32> to vector<1x12x16xf32>
    tpu.vector_store %arg7[%c4_91, %c0_92, %c0_93], %84 {strides = array<i32>} : memref<5x48x16xf32, #tpu.memory_space<vmem>>, vector<1x12x16xf32>,
    %c1_94 = arith.constant 1 : index
    %c4_95 = arith.constant 4 : index
    %c0_96 = arith.constant 0 : index
    %85 = vector.load %arg1[%c1_94, %c4_95, %c0_96] : memref<4x16x16xf32, #tpu.memory_space<vmem>>, vector<1x12x16xf32>
    %86 = vector.shape_cast %85 : vector<1x12x16xf32> to vector<12x16xf32>
    %c4_97 = arith.constant 4 : index
    %c12_98 = arith.constant 12 : index
    %c0_99 = arith.constant 0 : index
    %87 = vector.load %arg7[%c4_97, %c12_98, %c0_99] : memref<5x48x16xf32, #tpu.memory_space<vmem>>, vector<1x12x16xf32>
    %88 = vector.shape_cast %87 : vector<1x12x16xf32> to vector<12x16xf32>
    %89 = vector.shape_cast %86 : vector<12x16xf32> to vector<1x12x16xf32>
    tpu.vector_store %arg7[%c4_97, %c12_98, %c0_99], %89 {strides = array<i32>} : memref<5x48x16xf32, #tpu.memory_space<vmem>>, vector<1x12x16xf32>,
    %c2_100 = arith.constant 2 : index
    %c4_101 = arith.constant 4 : index
    %c0_102 = arith.constant 0 : index
    %90 = vector.load %arg1[%c2_100, %c4_101, %c0_102] : memref<4x16x16xf32, #tpu.memory_space<vmem>>, vector<1x12x16xf32>
    %91 = vector.shape_cast %90 : vector<1x12x16xf32> to vector<12x16xf32>
    %c4_103 = arith.constant 4 : index
    %c24_104 = arith.constant 24 : index
    %c0_105 = arith.constant 0 : index
    %92 = vector.load %arg7[%c4_103, %c24_104, %c0_105] : memref<5x48x16xf32, #tpu.memory_space<vmem>>, vector<1x12x16xf32>
    %93 = vector.shape_cast %92 : vector<1x12x16xf32> to vector<12x16xf32>
    %94 = vector.shape_cast %91 : vector<12x16xf32> to vector<1x12x16xf32>
    tpu.vector_store %arg7[%c4_103, %c24_104, %c0_105], %94 {strides = array<i32>} : memref<5x48x16xf32, #tpu.memory_space<vmem>>, vector<1x12x16xf32>,
    %c3_106 = arith.constant 3 : index
    %c4_107 = arith.constant 4 : index
    %c0_108 = arith.constant 0 : index
    %95 = vector.load %arg1[%c3_106, %c4_107, %c0_108] : memref<4x16x16xf32, #tpu.memory_space<vmem>>, vector<1x12x16xf32>
    %96 = vector.shape_cast %95 : vector<1x12x16xf32> to vector<12x16xf32>
    %c4_109 = arith.constant 4 : index
    %c36_110 = arith.constant 36 : index
    %c0_111 = arith.constant 0 : index
    %97 = vector.load %arg7[%c4_109, %c36_110, %c0_111] : memref<5x48x16xf32, #tpu.memory_space<vmem>>, vector<1x12x16xf32>
    %98 = vector.shape_cast %97 : vector<1x12x16xf32> to vector<12x16xf32>
    %99 = vector.shape_cast %96 : vector<12x16xf32> to vector<1x12x16xf32>
    tpu.vector_store %arg7[%c4_109, %c36_110, %c0_111], %99 {strides = array<i32>} : memref<5x48x16xf32, #tpu.memory_space<vmem>>, vector<1x12x16xf32>,
    %cst = arith.constant 0.000000e+00 : f32
    %100 = vector.broadcast %cst : f32 to vector<48x384xf32>
    %c0_112 = arith.constant 0 : index
    %c0_113 = arith.constant 0 : index
    %c0_114 = arith.constant 0 : index
    %101 = vector.load %arg7[%c0_112, %c0_113, %c0_114] : memref<5x48x16xf32, #tpu.memory_space<vmem>>, vector<1x48x16xf32>
    %102 = vector.shape_cast %101 : vector<1x48x16xf32> to vector<48x16xf32>
    %c0_115 = arith.constant 0 : index
    %c0_116 = arith.constant 0 : index
    %c0_117 = arith.constant 0 : index
    %103 = vector.load %arg2[%c0_115, %c0_116, %c0_117] : memref<5x16x384xf32, #tpu.memory_space<vmem>>, vector<1x16x384xf32>
    %104 = vector.shape_cast %103 : vector<1x16x384xf32> to vector<16x384xf32>
    %cst_118 = arith.constant dense<0.000000e+00> : vector<48x384xf32>
    %105 = tpu.matmul %102, %104, %cst_118 {dimension_numbers = #tpu.dot_dimension_numbers<[1], [0], [0], [1], [0, 0, 1, 1], [], []>} : vector<48x16xf32>, vector<16x384xf32>, vector<48x384xf32> -> vector<48x384xf32>
    %106 = arith.addf %100, %105 : vector<48x384xf32>
    %c1_119 = arith.constant 1 : index
    %c0_120 = arith.constant 0 : index
    %c0_121 = arith.constant 0 : index
    %107 = vector.load %arg7[%c1_119, %c0_120, %c0_121] : memref<5x48x16xf32, #tpu.memory_space<vmem>>, vector<1x48x16xf32>
    %108 = vector.shape_cast %107 : vector<1x48x16xf32> to vector<48x16xf32>
    %c1_122 = arith.constant 1 : index
    %c0_123 = arith.constant 0 : index
    %c0_124 = arith.constant 0 : index
    %109 = vector.load %arg2[%c1_122, %c0_123, %c0_124] : memref<5x16x384xf32, #tpu.memory_space<vmem>>, vector<1x16x384xf32>
    %110 = vector.shape_cast %109 : vector<1x16x384xf32> to vector<16x384xf32>
    %cst_125 = arith.constant dense<0.000000e+00> : vector<48x384xf32>
    %111 = tpu.matmul %108, %110, %cst_125 {dimension_numbers = #tpu.dot_dimension_numbers<[1], [0], [0], [1], [0, 0, 1, 1], [], []>} : vector<48x16xf32>, vector<16x384xf32>, vector<48x384xf32> -> vector<48x384xf32>
    %112 = arith.addf %106, %111 : vector<48x384xf32>
    %c2_126 = arith.constant 2 : index
    %c0_127 = arith.constant 0 : index
    %c0_128 = arith.constant 0 : index
    %113 = vector.load %arg7[%c2_126, %c0_127, %c0_128] : memref<5x48x16xf32, #tpu.memory_space<vmem>>, vector<1x48x16xf32>
    %114 = vector.shape_cast %113 : vector<1x48x16xf32> to vector<48x16xf32>
    %c2_129 = arith.constant 2 : index
    %c0_130 = arith.constant 0 : index
    %c0_131 = arith.constant 0 : index
    %115 = vector.load %arg2[%c2_129, %c0_130, %c0_131] : memref<5x16x384xf32, #tpu.memory_space<vmem>>, vector<1x16x384xf32>
    %116 = vector.shape_cast %115 : vector<1x16x384xf32> to vector<16x384xf32>
    %cst_132 = arith.constant dense<0.000000e+00> : vector<48x384xf32>
    %117 = tpu.matmul %114, %116, %cst_132 {dimension_numbers = #tpu.dot_dimension_numbers<[1], [0], [0], [1], [0, 0, 1, 1], [], []>} : vector<48x16xf32>, vector<16x384xf32>, vector<48x384xf32> -> vector<48x384xf32>
    %118 = arith.addf %112, %117 : vector<48x384xf32>
    %c3_133 = arith.constant 3 : index
    %c0_134 = arith.constant 0 : index
    %c0_135 = arith.constant 0 : index
    %119 = vector.load %arg7[%c3_133, %c0_134, %c0_135] : memref<5x48x16xf32, #tpu.memory_space<vmem>>, vector<1x48x16xf32>
    %120 = vector.shape_cast %119 : vector<1x48x16xf32> to vector<48x16xf32>
    %c3_136 = arith.constant 3 : index
    %c0_137 = arith.constant 0 : index
    %c0_138 = arith.constant 0 : index
    %121 = vector.load %arg2[%c3_136, %c0_137, %c0_138] : memref<5x16x384xf32, #tpu.memory_space<vmem>>, vector<1x16x384xf32>
    %122 = vector.shape_cast %121 : vector<1x16x384xf32> to vector<16x384xf32>
    %cst_139 = arith.constant dense<0.000000e+00> : vector<48x384xf32>
    %123 = tpu.matmul %120, %122, %cst_139 {dimension_numbers = #tpu.dot_dimension_numbers<[1], [0], [0], [1], [0, 0, 1, 1], [], []>} : vector<48x16xf32>, vector<16x384xf32>, vector<48x384xf32> -> vector<48x384xf32>
    %124 = arith.addf %118, %123 : vector<48x384xf32>
    %c4_140 = arith.constant 4 : index
    %c0_141 = arith.constant 0 : index
    %c0_142 = arith.constant 0 : index
    %125 = vector.load %arg7[%c4_140, %c0_141, %c0_142] : memref<5x48x16xf32, #tpu.memory_space<vmem>>, vector<1x48x16xf32>
    %126 = vector.shape_cast %125 : vector<1x48x16xf32> to vector<48x16xf32>
    %c4_143 = arith.constant 4 : index
    %c0_144 = arith.constant 0 : index
    %c0_145 = arith.constant 0 : index
    %127 = vector.load %arg2[%c4_143, %c0_144, %c0_145] : memref<5x16x384xf32, #tpu.memory_space<vmem>>, vector<1x16x384xf32>
    %128 = vector.shape_cast %127 : vector<1x16x384xf32> to vector<16x384xf32>
    %cst_146 = arith.constant dense<0.000000e+00> : vector<48x384xf32>
    %129 = tpu.matmul %126, %128, %cst_146 {dimension_numbers = #tpu.dot_dimension_numbers<[1], [0], [0], [1], [0, 0, 1, 1], [], []>} : vector<48x16xf32>, vector<16x384xf32>, vector<48x384xf32> -> vector<48x384xf32>
    %130 = arith.addf %124, %129 : vector<48x384xf32>
    %c0_147 = arith.constant 0 : index
    %c0_148 = arith.constant 0 : index
    %131 = vector.load %arg3[%c0_147, %c0_148] : memref<1x384xf32, #tpu.memory_space<vmem>>, vector<1x384xf32>
    %132 = vector.broadcast %131 : vector<1x384xf32> to vector<48x384xf32>
    %133 = arith.addf %130, %132 : vector<48x384xf32>
    %cst_149 = arith.constant 0.000000e+00 : f32
    %134 = vector.broadcast %cst_149 : f32 to vector<48x384xf32>
    %135 = arith.maximumf %133, %134 : vector<48x384xf32>
    %c0_150 = arith.constant 0 : index
    %c0_151 = arith.constant 0 : index
    %136 = vector.load %arg8[%c0_150, %c0_151] : memref<48x384xf32, #tpu.memory_space<vmem>>, vector<48x384xf32>
    tpu.vector_store %arg8[%c0_150, %c0_151], %135 {strides = array<i32>} : memref<48x384xf32, #tpu.memory_space<vmem>>, vector<48x384xf32>,
    %c0_152 = arith.constant 0 : index
    %c0_153 = arith.constant 0 : index
    %137 = vector.load %arg8[%c0_152, %c0_153] : memref<48x384xf32, #tpu.memory_space<vmem>>, vector<8x384xf32>
    %c0_154 = arith.constant 0 : index
    %c0_155 = arith.constant 0 : index
    %c0_156 = arith.constant 0 : index
    %138 = vector.load %arg9[%c0_154, %c0_155, %c0_156] : memref<5x32x384xf32, #tpu.memory_space<vmem>>, vector<1x8x384xf32>
    %139 = vector.shape_cast %138 : vector<1x8x384xf32> to vector<8x384xf32>
    %140 = vector.shape_cast %137 : vector<8x384xf32> to vector<1x8x384xf32>
    tpu.vector_store %arg9[%c0_154, %c0_155, %c0_156], %140 {strides = array<i32>} : memref<5x32x384xf32, #tpu.memory_space<vmem>>, vector<1x8x384xf32>,
    %c12_157 = arith.constant 12 : index
    %c0_158 = arith.constant 0 : index
    %141 = vector.load %arg8[%c12_157, %c0_158] : memref<48x384xf32, #tpu.memory_space<vmem>>, vector<8x384xf32>
    %c0_159 = arith.constant 0 : index
    %c8 = arith.constant 8 : index
    %c0_160 = arith.constant 0 : index
    %142 = vector.load %arg9[%c0_159, %c8, %c0_160] : memref<5x32x384xf32, #tpu.memory_space<vmem>>, vector<1x8x384xf32>
    %143 = vector.shape_cast %142 : vector<1x8x384xf32> to vector<8x384xf32>
    %144 = vector.shape_cast %141 : vector<8x384xf32> to vector<1x8x384xf32>
    tpu.vector_store %arg9[%c0_159, %c8, %c0_160], %144 {strides = array<i32>} : memref<5x32x384xf32, #tpu.memory_space<vmem>>, vector<1x8x384xf32>,
    %c24_161 = arith.constant 24 : index
    %c0_162 = arith.constant 0 : index
    %145 = vector.load %arg8[%c24_161, %c0_162] : memref<48x384xf32, #tpu.memory_space<vmem>>, vector<8x384xf32>
    %c0_163 = arith.constant 0 : index
    %c16 = arith.constant 16 : index
    %c0_164 = arith.constant 0 : index
    %146 = vector.load %arg9[%c0_163, %c16, %c0_164] : memref<5x32x384xf32, #tpu.memory_space<vmem>>, vector<1x8x384xf32>
    %147 = vector.shape_cast %146 : vector<1x8x384xf32> to vector<8x384xf32>
    %148 = vector.shape_cast %145 : vector<8x384xf32> to vector<1x8x384xf32>
    tpu.vector_store %arg9[%c0_163, %c16, %c0_164], %148 {strides = array<i32>} : memref<5x32x384xf32, #tpu.memory_space<vmem>>, vector<1x8x384xf32>,
    %c36_165 = arith.constant 36 : index
    %c0_166 = arith.constant 0 : index
    %149 = vector.load %arg8[%c36_165, %c0_166] : memref<48x384xf32, #tpu.memory_space<vmem>>, vector<8x384xf32>
    %c0_167 = arith.constant 0 : index
    %c24_168 = arith.constant 24 : index
    %c0_169 = arith.constant 0 : index
    %150 = vector.load %arg9[%c0_167, %c24_168, %c0_169] : memref<5x32x384xf32, #tpu.memory_space<vmem>>, vector<1x8x384xf32>
    %151 = vector.shape_cast %150 : vector<1x8x384xf32> to vector<8x384xf32>
    %152 = vector.shape_cast %149 : vector<8x384xf32> to vector<1x8x384xf32>
    tpu.vector_store %arg9[%c0_167, %c24_168, %c0_169], %152 {strides = array<i32>} : memref<5x32x384xf32, #tpu.memory_space<vmem>>, vector<1x8x384xf32>,
    %c1_170 = arith.constant 1 : index
    %c0_171 = arith.constant 0 : index
    %153 = vector.load %arg8[%c1_170, %c0_171] : memref<48x384xf32, #tpu.memory_space<vmem>>, vector<8x384xf32>
    %c1_172 = arith.constant 1 : index
    %c0_173 = arith.constant 0 : index
    %c0_174 = arith.constant 0 : index
    %154 = vector.load %arg9[%c1_172, %c0_173, %c0_174] : memref<5x32x384xf32, #tpu.memory_space<vmem>>, vector<1x8x384xf32>
    %155 = vector.shape_cast %154 : vector<1x8x384xf32> to vector<8x384xf32>
    %156 = vector.shape_cast %153 : vector<8x384xf32> to vector<1x8x384xf32>
    tpu.vector_store %arg9[%c1_172, %c0_173, %c0_174], %156 {strides = array<i32>} : memref<5x32x384xf32, #tpu.memory_space<vmem>>, vector<1x8x384xf32>,
    %c13 = arith.constant 13 : index
    %c0_175 = arith.constant 0 : index
    %157 = vector.load %arg8[%c13, %c0_175] : memref<48x384xf32, #tpu.memory_space<vmem>>, vector<8x384xf32>
    %c1_176 = arith.constant 1 : index
    %c8_177 = arith.constant 8 : index
    %c0_178 = arith.constant 0 : index
    %158 = vector.load %arg9[%c1_176, %c8_177, %c0_178] : memref<5x32x384xf32, #tpu.memory_space<vmem>>, vector<1x8x384xf32>
    %159 = vector.shape_cast %158 : vector<1x8x384xf32> to vector<8x384xf32>
    %160 = vector.shape_cast %157 : vector<8x384xf32> to vector<1x8x384xf32>
    tpu.vector_store %arg9[%c1_176, %c8_177, %c0_178], %160 {strides = array<i32>} : memref<5x32x384xf32, #tpu.memory_space<vmem>>, vector<1x8x384xf32>,
    %c25 = arith.constant 25 : index
    %c0_179 = arith.constant 0 : index
    %161 = vector.load %arg8[%c25, %c0_179] : memref<48x384xf32, #tpu.memory_space<vmem>>, vector<8x384xf32>
    %c1_180 = arith.constant 1 : index
    %c16_181 = arith.constant 16 : index
    %c0_182 = arith.constant 0 : index
    %162 = vector.load %arg9[%c1_180, %c16_181, %c0_182] : memref<5x32x384xf32, #tpu.memory_space<vmem>>, vector<1x8x384xf32>
    %163 = vector.shape_cast %162 : vector<1x8x384xf32> to vector<8x384xf32>
    %164 = vector.shape_cast %161 : vector<8x384xf32> to vector<1x8x384xf32>
    tpu.vector_store %arg9[%c1_180, %c16_181, %c0_182], %164 {strides = array<i32>} : memref<5x32x384xf32, #tpu.memory_space<vmem>>, vector<1x8x384xf32>,
    %c37 = arith.constant 37 : index
    %c0_183 = arith.constant 0 : index
    %165 = vector.load %arg8[%c37, %c0_183] : memref<48x384xf32, #tpu.memory_space<vmem>>, vector<8x384xf32>
    %c1_184 = arith.constant 1 : index
    %c24_185 = arith.constant 24 : index
    %c0_186 = arith.constant 0 : index
    %166 = vector.load %arg9[%c1_184, %c24_185, %c0_186] : memref<5x32x384xf32, #tpu.memory_space<vmem>>, vector<1x8x384xf32>
    %167 = vector.shape_cast %166 : vector<1x8x384xf32> to vector<8x384xf32>
    %168 = vector.shape_cast %165 : vector<8x384xf32> to vector<1x8x384xf32>
    tpu.vector_store %arg9[%c1_184, %c24_185, %c0_186], %168 {strides = array<i32>} : memref<5x32x384xf32, #tpu.memory_space<vmem>>, vector<1x8x384xf32>,
    %c2_187 = arith.constant 2 : index
    %c0_188 = arith.constant 0 : index
    %169 = vector.load %arg8[%c2_187, %c0_188] : memref<48x384xf32, #tpu.memory_space<vmem>>, vector<8x384xf32>
    %c2_189 = arith.constant 2 : index
    %c0_190 = arith.constant 0 : index
    %c0_191 = arith.constant 0 : index
    %170 = vector.load %arg9[%c2_189, %c0_190, %c0_191] : memref<5x32x384xf32, #tpu.memory_space<vmem>>, vector<1x8x384xf32>
    %171 = vector.shape_cast %170 : vector<1x8x384xf32> to vector<8x384xf32>
    %172 = vector.shape_cast %169 : vector<8x384xf32> to vector<1x8x384xf32>
    tpu.vector_store %arg9[%c2_189, %c0_190, %c0_191], %172 {strides = array<i32>} : memref<5x32x384xf32, #tpu.memory_space<vmem>>, vector<1x8x384xf32>,
    %c14 = arith.constant 14 : index
    %c0_192 = arith.constant 0 : index
    %173 = vector.load %arg8[%c14, %c0_192] : memref<48x384xf32, #tpu.memory_space<vmem>>, vector<8x384xf32>
    %c2_193 = arith.constant 2 : index
    %c8_194 = arith.constant 8 : index
    %c0_195 = arith.constant 0 : index
    %174 = vector.load %arg9[%c2_193, %c8_194, %c0_195] : memref<5x32x384xf32, #tpu.memory_space<vmem>>, vector<1x8x384xf32>
    %175 = vector.shape_cast %174 : vector<1x8x384xf32> to vector<8x384xf32>
    %176 = vector.shape_cast %173 : vector<8x384xf32> to vector<1x8x384xf32>
    tpu.vector_store %arg9[%c2_193, %c8_194, %c0_195], %176 {strides = array<i32>} : memref<5x32x384xf32, #tpu.memory_space<vmem>>, vector<1x8x384xf32>,
    %c26 = arith.constant 26 : index
    %c0_196 = arith.constant 0 : index
    %177 = vector.load %arg8[%c26, %c0_196] : memref<48x384xf32, #tpu.memory_space<vmem>>, vector<8x384xf32>
    %c2_197 = arith.constant 2 : index
    %c16_198 = arith.constant 16 : index
    %c0_199 = arith.constant 0 : index
    %178 = vector.load %arg9[%c2_197, %c16_198, %c0_199] : memref<5x32x384xf32, #tpu.memory_space<vmem>>, vector<1x8x384xf32>
    %179 = vector.shape_cast %178 : vector<1x8x384xf32> to vector<8x384xf32>
    %180 = vector.shape_cast %177 : vector<8x384xf32> to vector<1x8x384xf32>
    tpu.vector_store %arg9[%c2_197, %c16_198, %c0_199], %180 {strides = array<i32>} : memref<5x32x384xf32, #tpu.memory_space<vmem>>, vector<1x8x384xf32>,
    %c38 = arith.constant 38 : index
    %c0_200 = arith.constant 0 : index
    %181 = vector.load %arg8[%c38, %c0_200] : memref<48x384xf32, #tpu.memory_space<vmem>>, vector<8x384xf32>
    %c2_201 = arith.constant 2 : index
    %c24_202 = arith.constant 24 : index
    %c0_203 = arith.constant 0 : index
    %182 = vector.load %arg9[%c2_201, %c24_202, %c0_203] : memref<5x32x384xf32, #tpu.memory_space<vmem>>, vector<1x8x384xf32>
    %183 = vector.shape_cast %182 : vector<1x8x384xf32> to vector<8x384xf32>
    %184 = vector.shape_cast %181 : vector<8x384xf32> to vector<1x8x384xf32>
    tpu.vector_store %arg9[%c2_201, %c24_202, %c0_203], %184 {strides = array<i32>} : memref<5x32x384xf32, #tpu.memory_space<vmem>>, vector<1x8x384xf32>,
    %c3_204 = arith.constant 3 : index
    %c0_205 = arith.constant 0 : index
    %185 = vector.load %arg8[%c3_204, %c0_205] : memref<48x384xf32, #tpu.memory_space<vmem>>, vector<8x384xf32>
    %c3_206 = arith.constant 3 : index
    %c0_207 = arith.constant 0 : index
    %c0_208 = arith.constant 0 : index
    %186 = vector.load %arg9[%c3_206, %c0_207, %c0_208] : memref<5x32x384xf32, #tpu.memory_space<vmem>>, vector<1x8x384xf32>
    %187 = vector.shape_cast %186 : vector<1x8x384xf32> to vector<8x384xf32>
    %188 = vector.shape_cast %185 : vector<8x384xf32> to vector<1x8x384xf32>
    tpu.vector_store %arg9[%c3_206, %c0_207, %c0_208], %188 {strides = array<i32>} : memref<5x32x384xf32, #tpu.memory_space<vmem>>, vector<1x8x384xf32>,
    %c15 = arith.constant 15 : index
    %c0_209 = arith.constant 0 : index
    %189 = vector.load %arg8[%c15, %c0_209] : memref<48x384xf32, #tpu.memory_space<vmem>>, vector<8x384xf32>
    %c3_210 = arith.constant 3 : index
    %c8_211 = arith.constant 8 : index
    %c0_212 = arith.constant 0 : index
    %190 = vector.load %arg9[%c3_210, %c8_211, %c0_212] : memref<5x32x384xf32, #tpu.memory_space<vmem>>, vector<1x8x384xf32>
    %191 = vector.shape_cast %190 : vector<1x8x384xf32> to vector<8x384xf32>
    %192 = vector.shape_cast %189 : vector<8x384xf32> to vector<1x8x384xf32>
    tpu.vector_store %arg9[%c3_210, %c8_211, %c0_212], %192 {strides = array<i32>} : memref<5x32x384xf32, #tpu.memory_space<vmem>>, vector<1x8x384xf32>,
    %c27 = arith.constant 27 : index
    %c0_213 = arith.constant 0 : index
    %193 = vector.load %arg8[%c27, %c0_213] : memref<48x384xf32, #tpu.memory_space<vmem>>, vector<8x384xf32>
    %c3_214 = arith.constant 3 : index
    %c16_215 = arith.constant 16 : index
    %c0_216 = arith.constant 0 : index
    %194 = vector.load %arg9[%c3_214, %c16_215, %c0_216] : memref<5x32x384xf32, #tpu.memory_space<vmem>>, vector<1x8x384xf32>
    %195 = vector.shape_cast %194 : vector<1x8x384xf32> to vector<8x384xf32>
    %196 = vector.shape_cast %193 : vector<8x384xf32> to vector<1x8x384xf32>
    tpu.vector_store %arg9[%c3_214, %c16_215, %c0_216], %196 {strides = array<i32>} : memref<5x32x384xf32, #tpu.memory_space<vmem>>, vector<1x8x384xf32>,
    %c39 = arith.constant 39 : index
    %c0_217 = arith.constant 0 : index
    %197 = vector.load %arg8[%c39, %c0_217] : memref<48x384xf32, #tpu.memory_space<vmem>>, vector<8x384xf32>
    %c3_218 = arith.constant 3 : index
    %c24_219 = arith.constant 24 : index
    %c0_220 = arith.constant 0 : index
    %198 = vector.load %arg9[%c3_218, %c24_219, %c0_220] : memref<5x32x384xf32, #tpu.memory_space<vmem>>, vector<1x8x384xf32>
    %199 = vector.shape_cast %198 : vector<1x8x384xf32> to vector<8x384xf32>
    %200 = vector.shape_cast %197 : vector<8x384xf32> to vector<1x8x384xf32>
    tpu.vector_store %arg9[%c3_218, %c24_219, %c0_220], %200 {strides = array<i32>} : memref<5x32x384xf32, #tpu.memory_space<vmem>>, vector<1x8x384xf32>,
    %c4_221 = arith.constant 4 : index
    %c0_222 = arith.constant 0 : index
    %201 = vector.load %arg8[%c4_221, %c0_222] : memref<48x384xf32, #tpu.memory_space<vmem>>, vector<8x384xf32>
    %c4_223 = arith.constant 4 : index
    %c0_224 = arith.constant 0 : index
    %c0_225 = arith.constant 0 : index
    %202 = vector.load %arg9[%c4_223, %c0_224, %c0_225] : memref<5x32x384xf32, #tpu.memory_space<vmem>>, vector<1x8x384xf32>
    %203 = vector.shape_cast %202 : vector<1x8x384xf32> to vector<8x384xf32>
    %204 = vector.shape_cast %201 : vector<8x384xf32> to vector<1x8x384xf32>
    tpu.vector_store %arg9[%c4_223, %c0_224, %c0_225], %204 {strides = array<i32>} : memref<5x32x384xf32, #tpu.memory_space<vmem>>, vector<1x8x384xf32>,
    %c16_226 = arith.constant 16 : index
    %c0_227 = arith.constant 0 : index
    %205 = vector.load %arg8[%c16_226, %c0_227] : memref<48x384xf32, #tpu.memory_space<vmem>>, vector<8x384xf32>
    %c4_228 = arith.constant 4 : index
    %c8_229 = arith.constant 8 : index
    %c0_230 = arith.constant 0 : index
    %206 = vector.load %arg9[%c4_228, %c8_229, %c0_230] : memref<5x32x384xf32, #tpu.memory_space<vmem>>, vector<1x8x384xf32>
    %207 = vector.shape_cast %206 : vector<1x8x384xf32> to vector<8x384xf32>
    %208 = vector.shape_cast %205 : vector<8x384xf32> to vector<1x8x384xf32>
    tpu.vector_store %arg9[%c4_228, %c8_229, %c0_230], %208 {strides = array<i32>} : memref<5x32x384xf32, #tpu.memory_space<vmem>>, vector<1x8x384xf32>,
    %c28 = arith.constant 28 : index
    %c0_231 = arith.constant 0 : index
    %209 = vector.load %arg8[%c28, %c0_231] : memref<48x384xf32, #tpu.memory_space<vmem>>, vector<8x384xf32>
    %c4_232 = arith.constant 4 : index
    %c16_233 = arith.constant 16 : index
    %c0_234 = arith.constant 0 : index
    %210 = vector.load %arg9[%c4_232, %c16_233, %c0_234] : memref<5x32x384xf32, #tpu.memory_space<vmem>>, vector<1x8x384xf32>
    %211 = vector.shape_cast %210 : vector<1x8x384xf32> to vector<8x384xf32>
    %212 = vector.shape_cast %209 : vector<8x384xf32> to vector<1x8x384xf32>
    tpu.vector_store %arg9[%c4_232, %c16_233, %c0_234], %212 {strides = array<i32>} : memref<5x32x384xf32, #tpu.memory_space<vmem>>, vector<1x8x384xf32>,
    %c40 = arith.constant 40 : index
    %c0_235 = arith.constant 0 : index
    %213 = vector.load %arg8[%c40, %c0_235] : memref<48x384xf32, #tpu.memory_space<vmem>>, vector<8x384xf32>
    %c4_236 = arith.constant 4 : index
    %c24_237 = arith.constant 24 : index
    %c0_238 = arith.constant 0 : index
    %214 = vector.load %arg9[%c4_236, %c24_237, %c0_238] : memref<5x32x384xf32, #tpu.memory_space<vmem>>, vector<1x8x384xf32>
    %215 = vector.shape_cast %214 : vector<1x8x384xf32> to vector<8x384xf32>
    %216 = vector.shape_cast %213 : vector<8x384xf32> to vector<1x8x384xf32>
    tpu.vector_store %arg9[%c4_236, %c24_237, %c0_238], %216 {strides = array<i32>} : memref<5x32x384xf32, #tpu.memory_space<vmem>>, vector<1x8x384xf32>,
    %cst_239 = arith.constant 0.000000e+00 : f32
    %217 = vector.broadcast %cst_239 : f32 to vector<32x512xf32>
    %c0_240 = arith.constant 0 : index
    %c0_241 = arith.constant 0 : index
    %c0_242 = arith.constant 0 : index
    %218 = vector.load %arg9[%c0_240, %c0_241, %c0_242] : memref<5x32x384xf32, #tpu.memory_space<vmem>>, vector<1x32x384xf32>
    %219 = vector.shape_cast %218 : vector<1x32x384xf32> to vector<32x384xf32>
    %c0_243 = arith.constant 0 : index
    %c0_244 = arith.constant 0 : index
    %c0_245 = arith.constant 0 : index
    %220 = vector.load %arg4[%c0_243, %c0_244, %c0_245] : memref<5x384x512xf32, #tpu.memory_space<vmem>>, vector<1x384x512xf32>
    %221 = vector.shape_cast %220 : vector<1x384x512xf32> to vector<384x512xf32>
    %cst_246 = arith.constant dense<0.000000e+00> : vector<32x512xf32>
    %222 = tpu.matmul %219, %221, %cst_246 {dimension_numbers = #tpu.dot_dimension_numbers<[1], [0], [0], [1], [0, 0, 1, 1], [], []>} : vector<32x384xf32>, vector<384x512xf32>, vector<32x512xf32> -> vector<32x512xf32>
    %223 = arith.addf %217, %222 : vector<32x512xf32>
    %c1_247 = arith.constant 1 : index
    %c0_248 = arith.constant 0 : index
    %c0_249 = arith.constant 0 : index
    %224 = vector.load %arg9[%c1_247, %c0_248, %c0_249] : memref<5x32x384xf32, #tpu.memory_space<vmem>>, vector<1x32x384xf32>
    %225 = vector.shape_cast %224 : vector<1x32x384xf32> to vector<32x384xf32>
    %c1_250 = arith.constant 1 : index
    %c0_251 = arith.constant 0 : index
    %c0_252 = arith.constant 0 : index
    %226 = vector.load %arg4[%c1_250, %c0_251, %c0_252] : memref<5x384x512xf32, #tpu.memory_space<vmem>>, vector<1x384x512xf32>
    %227 = vector.shape_cast %226 : vector<1x384x512xf32> to vector<384x512xf32>
    %cst_253 = arith.constant dense<0.000000e+00> : vector<32x512xf32>
    %228 = tpu.matmul %225, %227, %cst_253 {dimension_numbers = #tpu.dot_dimension_numbers<[1], [0], [0], [1], [0, 0, 1, 1], [], []>} : vector<32x384xf32>, vector<384x512xf32>, vector<32x512xf32> -> vector<32x512xf32>
    %229 = arith.addf %223, %228 : vector<32x512xf32>
    %c2_254 = arith.constant 2 : index
    %c0_255 = arith.constant 0 : index
    %c0_256 = arith.constant 0 : index
    %230 = vector.load %arg9[%c2_254, %c0_255, %c0_256] : memref<5x32x384xf32, #tpu.memory_space<vmem>>, vector<1x32x384xf32>
    %231 = vector.shape_cast %230 : vector<1x32x384xf32> to vector<32x384xf32>
    %c2_257 = arith.constant 2 : index
    %c0_258 = arith.constant 0 : index
    %c0_259 = arith.constant 0 : index
    %232 = vector.load %arg4[%c2_257, %c0_258, %c0_259] : memref<5x384x512xf32, #tpu.memory_space<vmem>>, vector<1x384x512xf32>
    %233 = vector.shape_cast %232 : vector<1x384x512xf32> to vector<384x512xf32>
    %cst_260 = arith.constant dense<0.000000e+00> : vector<32x512xf32>
    %234 = tpu.matmul %231, %233, %cst_260 {dimension_numbers = #tpu.dot_dimension_numbers<[1], [0], [0], [1], [0, 0, 1, 1], [], []>} : vector<32x384xf32>, vector<384x512xf32>, vector<32x512xf32> -> vector<32x512xf32>
    %235 = arith.addf %229, %234 : vector<32x512xf32>
    %c3_261 = arith.constant 3 : index
    %c0_262 = arith.constant 0 : index
    %c0_263 = arith.constant 0 : index
    %236 = vector.load %arg9[%c3_261, %c0_262, %c0_263] : memref<5x32x384xf32, #tpu.memory_space<vmem>>, vector<1x32x384xf32>
    %237 = vector.shape_cast %236 : vector<1x32x384xf32> to vector<32x384xf32>
    %c3_264 = arith.constant 3 : index
    %c0_265 = arith.constant 0 : index
    %c0_266 = arith.constant 0 : index
    %238 = vector.load %arg4[%c3_264, %c0_265, %c0_266] : memref<5x384x512xf32, #tpu.memory_space<vmem>>, vector<1x384x512xf32>
    %239 = vector.shape_cast %238 : vector<1x384x512xf32> to vector<384x512xf32>
    %cst_267 = arith.constant dense<0.000000e+00> : vector<32x512xf32>
    %240 = tpu.matmul %237, %239, %cst_267 {dimension_numbers = #tpu.dot_dimension_numbers<[1], [0], [0], [1], [0, 0, 1, 1], [], []>} : vector<32x384xf32>, vector<384x512xf32>, vector<32x512xf32> -> vector<32x512xf32>
    %241 = arith.addf %235, %240 : vector<32x512xf32>
    %c4_268 = arith.constant 4 : index
    %c0_269 = arith.constant 0 : index
    %c0_270 = arith.constant 0 : index
    %242 = vector.load %arg9[%c4_268, %c0_269, %c0_270] : memref<5x32x384xf32, #tpu.memory_space<vmem>>, vector<1x32x384xf32>
    %243 = vector.shape_cast %242 : vector<1x32x384xf32> to vector<32x384xf32>
    %c4_271 = arith.constant 4 : index
    %c0_272 = arith.constant 0 : index
    %c0_273 = arith.constant 0 : index
    %244 = vector.load %arg4[%c4_271, %c0_272, %c0_273] : memref<5x384x512xf32, #tpu.memory_space<vmem>>, vector<1x384x512xf32>
    %245 = vector.shape_cast %244 : vector<1x384x512xf32> to vector<384x512xf32>
    %cst_274 = arith.constant dense<0.000000e+00> : vector<32x512xf32>
    %246 = tpu.matmul %243, %245, %cst_274 {dimension_numbers = #tpu.dot_dimension_numbers<[1], [0], [0], [1], [0, 0, 1, 1], [], []>} : vector<32x384xf32>, vector<384x512xf32>, vector<32x512xf32> -> vector<32x512xf32>
    %247 = arith.addf %241, %246 : vector<32x512xf32>
    %c0_275 = arith.constant 0 : index
    %c0_276 = arith.constant 0 : index
    %248 = vector.load %arg5[%c0_275, %c0_276] : memref<1x512xf32, #tpu.memory_space<vmem>>, vector<1x512xf32>
    %249 = vector.broadcast %248 : vector<1x512xf32> to vector<32x512xf32>
    %250 = arith.addf %247, %249 : vector<32x512xf32>
    %cst_277 = arith.constant 0.000000e+00 : f32
    %251 = vector.broadcast %cst_277 : f32 to vector<32x512xf32>
    %252 = arith.maximumf %250, %251 : vector<32x512xf32>
    %c0_278 = arith.constant 0 : index
    %c0_279 = arith.constant 0 : index
    %253 = vector.load %arg6[%c0_278, %c0_279] : memref<32x512xf32, #tpu.memory_space<vmem>>, vector<32x512xf32>
    tpu.vector_store %arg6[%c0_278, %c0_279], %252 {strides = array<i32>} : memref<32x512xf32, #tpu.memory_space<vmem>>, vector<32x512xf32>,
    return
  }
  func.func @transform_0(%arg0: i32) -> (i32, i32, i32) {
    %c0_i32 = arith.constant 0 : i32
    %c0_i32_0 = arith.constant 0 : i32
    %c0_i32_1 = arith.constant 0 : i32
    return %arg0, %c0_i32, %c0_i32_0 : i32, i32, i32
  }
  func.func @transform_1(%arg0: i32) -> (i32, i32, i32) {
    %c0_i32 = arith.constant 0 : i32
    %c0_i32_0 = arith.constant 0 : i32
    %c0_i32_1 = arith.constant 0 : i32
    %c0_i32_2 = arith.constant 0 : i32
    return %c0_i32, %c0_i32_0, %c0_i32_1 : i32, i32, i32
  }
  func.func @transform_2(%arg0: i32) -> (i32, i32) {
    %c0_i32 = arith.constant 0 : i32
    %c0_i32_0 = arith.constant 0 : i32
    %c0_i32_1 = arith.constant 0 : i32
    return %c0_i32, %c0_i32_0 : i32, i32
  }
  func.func @transform_3(%arg0: i32) -> (i32, i32, i32) {
    %c0_i32 = arith.constant 0 : i32
    %c0_i32_0 = arith.constant 0 : i32
    %c0_i32_1 = arith.constant 0 : i32
    %c0_i32_2 = arith.constant 0 : i32
    return %c0_i32, %c0_i32_0, %c0_i32_1 : i32, i32, i32
  }
  func.func @transform_4(%arg0: i32) -> (i32, i32) {
    %c0_i32 = arith.constant 0 : i32
    %c0_i32_0 = arith.constant 0 : i32
    %c0_i32_1 = arith.constant 0 : i32
    return %c0_i32, %c0_i32_0 : i32, i32
  }
  func.func @transform_5(%arg0: i32) -> (i32, i32) {
    %c0_i32 = arith.constant 0 : i32
    %c0_i32_0 = arith.constant 0 : i32
    return %arg0, %c0_i32 : i32, i32
  }
}

</mosaic_0001>

<bundles_post_ra>
// kernel: sequential_forward.1
= control target key start
LH: loop header
LB: loop body
LE: loop exit
PB: predicated region body
PF: predicated region fallthrough
CT: control target
= control target key end

     0   :  { %10 = vsyncpa [#allocation6], 0  ;;  %s7515_s0 = inlined_call_operand.hbm [shape: f32[8,16,16], index: 0, kind: input, shape index: {}]   ;;  %s7516_s1 = inlined_call_operand.hbm [shape: f32[5,16,384], index: 1, kind: input, shape index: {}]   ;;  %s7517_s2 = inlined_call_operand.hbm [shape: f32[1,384], index: 2, kind: input, shape index: {}]   ;;  %s7518_s3 = inlined_call_operand.hbm [shape: f32[5,384,512], index: 3, kind: input, shape index: {}]   ;;  %s7519_s4 = inlined_call_operand.hbm [shape: f32[1,512], index: 4, kind: input, shape index: {}]   ;;  %s7520_s5 = inlined_call_operand.vmem [shape: f32[64,512], index: 5, kind: output, shape index: {}]  }
   0x1   :  { %12 = vsyncpa [#allocation6 + $0x1], 0 }
   0x2   :  { %13 = vsyncpa [#allocation8], 0 }
   0x3   :  { %14 = vsyncpa [#allocation11], 0  ;;  %s6900_s18 = smov 0   ;;  %s6902_s19 = smov 0  }
   0x4   :  { %s6904_s20 = smov 0   ;;  %s6906_s21 = smov 0  }
   0x5 LB: > { %s5148_s22 = sadd.s32 4294967295, %s6856_s21   ;;  %p40_p0 = scmp.ne.s32.totalorder %s6848_s19, %s6844_s18  ;;  %s6856_s21 = sphi %s6906_s21, %s7537_s21   ;;  %s6852_s20 = sphi %s6904_s20, %s7536_s20   ;;  %s6848_s19 = sphi %s6902_s19, %s7535_s19   ;;  %s6844_s18 = sphi %s6900_s18, %s7534_s18  }
   0x6   : > { %p6922_p1 = scmp.eq.s32.totalorder %s5148_s22, 0  ;;  %p5150_p2 = scmp.ge.s32.totalorder %s6856_s21, 1 }
   0x7   : > { %p161_p3 = scmp.lt.s32.totalorder %s6856_s21, 3  ;;  %s6858_s26 = smov [#allocation7]  }
   0x8   : > { %s7525_s23 = scalar_select %p6922_p1, 1, 0 }
   0x9   : > { %p6930_p4 = por %p6922_p1, %p40_p0  ;;  %p6934_p5 = pnand %p5150_p2, %p161_p3 }
   0xa   : > { %s173_s27 = sshll.u32 %s6858_s26, 4  ;;  %s6859_s29 = smov [#allocation10]   ;;  %s174_s27 = int_to_ptr.vmem [resolvable:$true] %s173_s27 }
   0xb   : > { %s7526_s24 = scalar_select %p6930_p4, 1, 0 }
   0xc   : > { %s7527_s25 = scalar_select %p6934_p5, 1, 0 }
   0xd   : > { %p6603_p6 = pneg %p6934_p5  ;;  %s197_s30 = sshll.u32 %s6859_s29, 4  ;;  %s6946_s30 = int_to_ptr.vmem [resolvable:$true] %s197_s30 }
   0xe   : > { %s6672_s8 = scalar_lea.hbm %s7516_s1, 3840 }
   0xf   : > { %p6942_p7 = pnand %p6603_p6, %p6922_p1  ;;  %p6673_p8 = scmp.ne.s32.totalorder %s7516_s1, %s6672_s8 }
  0x10   : > { %p6679_p12 = scmp.lt.u32.totalorder %s6672_s8, %s7516_s1 }
  0x11   : > { %p6956_p9 = pneg %p6942_p7 }
  0x13   : > { %p6675_p10 = pnand %p6956_p9, %p6673_p8 }
  0x15   : > { %p6676_p11 = pneg %p6675_p10 }
  0x17   : > { %p6681_p13 = pnand %p6679_p12, %p6676_p11 }
  0x19   : > { %6684 = shalt.err (!%p6681_p13)
}
  0x1a   : > { %s6685_s14 = scalar_lea.vmem %s174_s27, 3840  ;;  %p6693_p6 = scmp.lt.s32.totalorder %s174_s27, %s174_s27 }
  0x1b   : > { %p6686_p0 = scmp.ne.s32.totalorder %s174_s27, %s6685_s14  ;;  %p6694_p1 = scmp.lt.s32.totalorder %s6685_s14, %s6685_s14 }
  0x1d   : > { %p6688_p2 = pnand %p6686_p0, %p6956_p9  ;;  %p6695_p4 = por %p6694_p1, %p6693_p6 }
  0x1f   : > { %p6689_p3 = pneg %p6688_p2 }
  0x21   : > { %p6696_p5 = pnand %p6695_p4, %p6689_p3 }
  0x23   : > { %6699 = shalt.err (!%p6696_p5)
}
  0x24   : > { %s6860_s15 = smov 384   ;;  %s6861_s16 = smov 24  }
  0x25   : > { %6606 = dma.hbm_to_vmem [thread:$0]  (!%p6942_p7), %s7516_s1, 3840, %s174_s27, [#allocation8], %s6860_s15, %s6860_s15, %s6861_s16  }
  0x26   : > { %s6700_s6 = scalar_lea.hbm %s7518_s3, 122880 }
  0x27   : > { %p6701_p8 = scmp.ne.s32.totalorder %s7518_s3, %s6700_s6  ;;  %p6707_p5 = scmp.lt.u32.totalorder %s6700_s6, %s7518_s3 }
  0x29   : > { %p6703_p1 = pnand %p6701_p8, %p6956_p9 }
  0x2b   : > { %p6704_p4 = pneg %p6703_p1 }
  0x2d   : > { %p6709_p10 = pnand %p6707_p5, %p6704_p4 }
  0x2f   : > { %6712 = shalt.err (!%p6709_p10)
}
  0x30   : > { %s6713_s27 = scalar_lea.vmem %s6946_s30, 122880  ;;  %p6721_p0 = scmp.lt.s32.totalorder %s6946_s30, %s6946_s30 }
  0x31   : > { %p6714_p11 = scmp.ne.s32.totalorder %s6946_s30, %s6713_s27  ;;  %p6722_p2 = scmp.lt.s32.totalorder %s6713_s27, %s6713_s27 }
  0x33   : > { %p6716_p12 = pnand %p6714_p11, %p6956_p9  ;;  %p6723_p3 = por %p6722_p2, %p6721_p0 }
  0x35   : > { %p6717_p13 = pneg %p6716_p12 }
  0x37   : > { %p6724_p6 = pnand %p6723_p3, %p6717_p13 }
  0x39   : > { %6727 = shalt.err (!%p6724_p6)
}
  0x3a   : > { %s6862_s12 = smov 512   ;;  %s6863_s13 = smov 32  }
  0x3b   : > { %6612 = dma.hbm_to_vmem [thread:$0]  (!%p6942_p7), %s7518_s3, 122880, %s6946_s30, [#allocation11], %s6862_s12, %s6862_s12, %s6863_s13  }
  0x3c   : > { %s6864_s16 = smov [#allocation9]   ;;  %s6865_s18 = smov [#allocation12]  }
  0x3d   : > { %s187_s17 = sshll.u32 %s6864_s16, 4  ;;  %s211_s26 = sshll.u32 %s6865_s18, 4  ;;  %s188_s17 = int_to_ptr.vmem [resolvable:$true] %s187_s17  ;;  %s6995_s26 = int_to_ptr.vmem [resolvable:$true] %s211_s26 }
  0x3e   : > { %s6728_s7 = scalar_lea.hbm %s7517_s2, 48 }
  0x3f   : > { %p6729_p8 = scmp.ne.s32.totalorder %s7517_s2, %s6728_s7  ;;  %p6735_p5 = scmp.lt.u32.totalorder %s6728_s7, %s7517_s2 }
  0x41   : > { %p6731_p1 = pnand %p6729_p8, %p6956_p9 }
  0x43   : > { %p6732_p4 = pneg %p6731_p1 }
  0x45   : > { %p6737_p10 = pnand %p6735_p5, %p6732_p4 }
  0x47   : > { %6740 = shalt.err (!%p6737_p10)
}
  0x48   : > { %s6741_s27 = scalar_lea.vmem %s188_s17, 48  ;;  %s6748_s12 = scalar_lea.vmem %s188_s17, 64 }
  0x49   : > { %p6742_p11 = scmp.ne.s32.totalorder %s188_s17, %s6741_s27  ;;  %p6749_p0 = scmp.lt.s32.totalorder %s188_s17, %s188_s17 }
  0x4a   : > { %p6750_p2 = scmp.lt.s32.totalorder %s6748_s12, %s6741_s27 }
  0x4b   : > { %p6744_p12 = pnand %p6742_p11, %p6956_p9 }
  0x4c   : > { %p6751_p3 = por %p6750_p2, %p6749_p0 }
  0x4d   : > { %p6745_p13 = pneg %p6744_p12 }
  0x4f   : > { %p6752_p6 = pnand %p6751_p3, %p6745_p13 }
  0x51   : > { %6755 = shalt.err (!%p6752_p6)
}
  0x52   : > { %6609 = dma.hbm_to_vmem [thread:$0]  (!%p6942_p7), %s7517_s2, 48, %s188_s17, [#allocation8]  }
  0x53   : > { %s6756_s18 = scalar_lea.hbm %s7519_s4, 64 }
  0x54   : > { %p6757_p8 = scmp.ne.s32.totalorder %s7519_s4, %s6756_s18  ;;  %p6763_p5 = scmp.lt.u32.totalorder %s6756_s18, %s7519_s4 }
  0x56   : > { %p6759_p1 = pnand %p6757_p8, %p6956_p9 }
  0x58   : > { %p6760_p4 = pneg %p6759_p1 }
  0x5a   : > { %p6765_p10 = pnand %p6763_p5, %p6760_p4 }
  0x5c   : > { %6768 = shalt.err (!%p6765_p10)
}
  0x5d   : > { %s6769_s17 = scalar_lea.vmem %s6995_s26, 64  ;;  %p6777_p0 = scmp.lt.s32.totalorder %s6995_s26, %s6995_s26 }
  0x5e   : > { %p6770_p11 = scmp.ne.s32.totalorder %s6995_s26, %s6769_s17  ;;  %p6778_p2 = scmp.lt.s32.totalorder %s6769_s17, %s6769_s17 }
  0x60   : > { %p6772_p12 = pnand %p6770_p11, %p6956_p9  ;;  %p6779_p3 = por %p6778_p2, %p6777_p0 }
  0x62   : > { %p6773_p13 = pneg %p6772_p12 }
  0x64   : > { %p6780_p6 = pnand %p6779_p3, %p6773_p13 }
  0x66   : > { %6783 = shalt.err (!%p6780_p6)
}
  0x67   : > { %6615 = dma.hbm_to_vmem [thread:$0]  (!%p6942_p7), %s7519_s4, 64, %s6995_s26, [#allocation11]  }
  0x68   : > { %s7039_s11 = sadd.s32 1, %s6856_s21   ;;  %s27_s28 = sadd.s32 1, %s6852_s20 }
  0x69   : > { %s24_s30 = ssub.s32 %s6856_s21, %s7039_s11  ;;  %p34_p8 = scmp.ne.s32.totalorder %s6852_s20, %s6848_s19 }
  0x6a   : > { %p25_p9 = scmp.eq.s32.totalorder %s24_s30, 0  ;;  %p35_p1 = scmp.eq.s32.totalorder %s6856_s21, 0 }
  0x6b   : > { %p6624_p5 = scmp.lt.s32.totalorder %s6856_s21, 2  ;;  %s222_s12 = sand.u32 1, %s6852_s20  }
  0x6c   : > { %s7048_s27 = scalar_select %p25_p9, %s6852_s20, %s27_s28  }
  0x6d   : > { %p36_p4 = por %p35_p1, %p34_p8  ;;  %s5262_s13 = sshll.u32 %s6856_s21, 10 }
  0x6e   : > { %s5156_s14 = sshll.u32 %s222_s12, 6  ;;  %s7056_s18 = scalar_lea.hbm %s7515_s0, %s5262_s13 }
  0x6f   : > { %s226_s26 = scalar_lea.vmem [#allocation5], %s5156_s14  ;;  %p7058_p7 = pnand %p6624_p5, %p36_p4 }
  0x70   : > { %s234_s29 = sshll.u32 %s226_s26, 4  ;;  %s7064_s7 = scalar_lea.sflag [#allocation6], %s222_s12  ;;  %s7062_s29 = int_to_ptr.vmem [resolvable:$true] %s234_s29 }
  0x71   : > { %s6784_s8 = scalar_lea.hbm %s7056_s18, 1024  ;;  %p6786_p11 = pneg %p7058_p7 }
  0x72   : > { %p6785_p10 = scmp.ne.s32.totalorder %s7056_s18, %s6784_s8  ;;  %s6789_s10 = scalar_lea.hbm %s7515_s0, 2048 }
  0x73   : > { %p6790_p0 = scmp.lt.u32.totalorder %s7056_s18, %s7515_s0  ;;  %p6791_p2 = scmp.lt.u32.totalorder %s6789_s10, %s6784_s8 }
  0x74   : > { %p6787_p12 = pnand %p6786_p11, %p6785_p10  ;;  %p6793_p6 = scmp.lt.u32.totalorder %s6784_s8, %s7056_s18 }
  0x75   : > { %p6792_p3 = por %p6791_p2, %p6790_p0 }
  0x76   : > { %p6788_p13 = pneg %p6787_p12 }
  0x77   : > { %p6794_p9 = por %p6793_p6, %p6792_p3 }
  0x79   : > { %p6795_p8 = pnand %p6794_p9, %p6788_p13 }
  0x7b   : > { %6798 = shalt.err (!%p6795_p8)
}
  0x7c   : > { %s6799_s12 = scalar_lea.vmem %s7062_s29, 1024  ;;  %s6866_s13 = smov [#allocation5]  }
  0x7d   : > { %p6800_p1 = scmp.ne.s32.totalorder %s7062_s29, %s6799_s12  ;;  %s6804_s14 = sshll.u32 %s6866_s13, 4  ;;  %s6805_s14 = int_to_ptr.vmem [resolvable:$false] %s6804_s14 }
  0x7e   : > { %s6806_s15 = scalar_lea.vmem %s6805_s14, 2048  ;;  %p6807_p10 = scmp.lt.s32.totalorder %s7062_s29, %s6805_s14 }
  0x7f   : > { %p6802_p4 = pnand %p6800_p1, %p6786_p11  ;;  %p6808_p12 = scmp.lt.s32.totalorder %s6806_s15, %s6799_s12 }
  0x81   : > { %p6803_p5 = pneg %p6802_p4  ;;  %p6809_p0 = por %p6808_p12, %p6807_p10 }
  0x83   : > { %p6810_p2 = pnand %p6809_p0, %p6803_p5 }
  0x85   : > { %6813 = shalt.err (!%p6810_p2)
}
  0x86   : > { %s6867_s16 = smov 128   ;;  %s6868_s26 = smov 8  }
  0x87   : > { %6619 = dma.hbm_to_vmem [thread:$0]  (!%p7058_p7), %s7056_s18, 1024, %s7062_s29, %s7064_s7, %s6867_s16, %s6867_s16, %s6868_s26  }
  0x88   : > { %p7531_p11 = scmp.ne.s32.totalorder %s7527_s25, 0 }
  0x89   : > { %s248_s8 = sand.u32 (!%p7531_p11), 1, %s6848_s19   ;;  %p7532_p13 = scmp.ne.s32.totalorder (!%p7531_p11), %s7526_s24, 0 }
  0x8a   : > { %246 = sbr.rel (%p7531_p11) target bundleno = 1124 (0x464), region = 40  ;;  %s5161_s17 = sshll.u32 (!%p7531_p11), %s248_s8, 6 }
  0x8b   : > { %s249_s9 = scalar_lea.sflag (!%p7531_p11), [#allocation6], %s248_s8  ;;  %s7095_s10 = scalar_lea.vmem (!%p7531_p11), [#allocation5], %s5161_s17 }
  0x91   : > { %6831 = dma.done.wait (%p7532_p13), %s249_s9, 1024  }
  0x92   : > { %6833 = vsyncadd (%p7532_p13), %s249_s9, 4294966272  ;;  %p7533_p3 = scmp.ne.s32.totalorder %s7525_s23, 0 }
  0x94   : > { %6835 = dma.done.wait (%p7533_p3), [#allocation8], 3888  }
  0x95   : > { %6837 = vsyncadd (%p7533_p3), [#allocation8], 4294963408 }
  0x96   : > { %6839 = dma.done.wait (%p7533_p3), [#allocation11], 122944  }
  0x97   : > { %6841 = vsyncadd (%p7533_p3), [#allocation11], 4294844352  ;;  %v6869_v0 = vmov 0.0   ;;  %v400_v1 = vld [vmem:[#allocation7 + $0x8] sm:$0xff]  ;;  %v403_v2 = vld [vmem:[#allocation7 + $0x20] sm:$0xff]  ;;  %vm306_vm0 = vcmask 130048  }
  0x98   : > { %500 = vmatprep.mubr.f32.mxu1 %v6869_v0  ;;  %714 = vmatprep.mubr.f32.mxu0 %v6869_v0  ;;  %v413_v3 = vld [vmem:[#allocation7 + $0x38] sm:$0xff]  ;;  %v5377_v4 = vpack.c.bf16 %v403_v2, %v400_v1  ;;  %v416_v5 = vld [vmem:[#allocation7 + $0x50] sm:$0xff]  ;;  %v399_v6 = vld [vmem:[#allocation7] sm:$0xff]  ;;  %vm308_vm1 = vcmask 125952   ;;  %vm1731_vm2 = vcmask 1046528   ;;  %vm1760_vm3 = vcmask 1042432  }
  0x99   : > { %v402_v7 = vld [vmem:[#allocation7 + $0x18] sm:$0xff]  ;;  %v5369_v8 = vpack.c.bf16 %v416_v5, %v413_v3  ;;  %v412_v10 = vld [vmem:[#allocation7 + $0x30] sm:$0xff]  ;;  %v415_v11 = vld [vmem:[#allocation7 + $0x48] sm:$0xff]  ;;  %vm1670_vm4 = vcmask 1043456   ;;  %vm1842_vm5 = vcmask 1045504   ;;  %vm1871_vm6 = vcmask 1041408  }
  0x9a   : > { %v5379_v9 = vpack.c.bf16 %v402_v7, %v399_v6  ;;  %v854_v12 = vld [vmem:[#allocation7 + $0x68] sm:$0xff]  ;;  %5378 = vmatprep.subr.bf16.mxu0 %v5377_v4  ;;  %v5371_v13 = vpack.c.bf16 %v415_v11, %v412_v10  ;;  %v857_v14 = vld [vmem:[#allocation7 + $0x80] sm:$0xff]  ;;  %v856_v19 = vld [vmem:[#allocation7 + $0x78] sm:$0xff]  ;;  %vm1953_vm7 = vcmask 1044480   ;;  %vm1982_vm8 = vcmask 1040384   ;;  %s5166_s23 = sshll.u32 %s5148_s22, 2 }
  0x9b   : > { %v325_v15 = vld [vmem:[%s7095_s10 + $0x1] sm:$0xff]  ;;  %5370 = vmatprep.subr.bf16.mxu1 %v5369_v8  ;;  %v5385_v17 = vpack.c.bf16 %v857_v14, %v854_v12  ;;  %v326_v20 = vld [vmem:[%s7095_s10 + $0x9] sm:$0xf]  ;;  %v5175_v21 = vld [vmem:[%s7095_s10 + $0x11] sm:$0xff]  ;;  %p298_p7 = scmp.lt.s32.totalorder %s5166_s23, 7 }
  0x9c   : > { %v304_v16 = vld [vmem:[%s7095_s10] sm:$0xff]  ;;  %5380 = vmatpush1.bf16.msra.mxu0 %v5379_v9  ;;  %328 = vst.msk [vmem:[#allocation2 + $0x30] sm:$0xff] %vm306_vm0, %v325_v15  ;;  %5372 = vmatpush1.bf16.msra.mxu1 %v5371_v13  ;;  %v305_v22 = vld [vmem:[%s7095_s10 + $0x8] sm:$0xf]  ;;  %v5169_v23 = vld [vmem:[%s7095_s10 + $0x10] sm:$0xff] }
  0x9d   : > { %307 = vst.msk [vmem:[#allocation2] sm:$0xff] %vm306_vm0, %v304_v16  ;;  %v853_v18 = vld [vmem:[#allocation7 + $0x60] sm:$0xff]  ;;  %5386 = vmatprep.subr.bf16.mxu0 %v5385_v17  ;;  %332 = vst.msk [vmem:[#allocation2 + $0x3c] sm:$0xff] %vm306_vm0, %v5175_v21  ;;  %v5176_v24 = vld [vmem:[%s7095_s10 + $0x19] sm:$0xf]  ;;  %s7539_s23 = smov (!%p298_p7, %s5166_s23), 7 }
  0x9e   : > { %329 = vst.msk [vmem:[#allocation2 + $0x38] sm:$0xf] %vm308_vm1, %v326_v20  ;;  %309 = vst.msk [vmem:[#allocation2 + $0x8] sm:$0xf] %vm308_vm1, %v305_v22  ;;  %v5170_v25 = vld [vmem:[%s7095_s10 + $0x18] sm:$0xf]  ;;  %v5387_v33 = vpack.c.bf16 %v856_v19, %v853_v18 }
  0x9f   : > { %313 = vst.msk [vmem:[#allocation2 + $0xc] sm:$0xff] %vm306_vm0, %v5169_v23  ;;  %v5177_v26 = vld [vmem:[%s7095_s10 + $0x21] sm:$0xff]  ;;  %v5178_v28 = vld [vmem:[%s7095_s10 + $0x29] sm:$0xf]  ;;  %v5179_v29 = vld [vmem:[%s7095_s10 + $0x31] sm:$0xff]  ;;  %s5263_s24 = sshll.u32 %s7539_s23, 5 }
  0xa0   : > { %333 = vst.msk [vmem:[#allocation2 + $0x44] sm:$0xf] %vm308_vm1, %v5176_v24  ;;  %314 = vst.msk [vmem:[#allocation2 + $0x14] sm:$0xf] %vm308_vm1, %v5170_v25  ;;  %v5171_v27 = vld [vmem:[%s7095_s10 + $0x20] sm:$0xff]  ;;  %v5173_v31 = vld [vmem:[%s7095_s10 + $0x30] sm:$0xff]  ;;  %s7484_s25 = scalar_lea.vmem %s7520_s5, %s5263_s24 }
  0xa1   : > { %336 = vst.msk [vmem:[#allocation2 + $0x48] sm:$0xff] %vm306_vm0, %v5177_v26  ;;  %318 = vst.msk [vmem:[#allocation2 + $0x18] sm:$0xff] %vm306_vm0, %v5171_v27  ;;  %v5172_v30 = vld [vmem:[%s7095_s10 + $0x28] sm:$0xf]  ;;  %v5180_v32 = vld [vmem:[%s7095_s10 + $0x39] sm:$0xf] }
  0xa2   : > { %337 = vst.msk [vmem:[#allocation2 + $0x50] sm:$0xf] %vm308_vm1, %v5178_v28  ;;  %319 = vst.msk [vmem:[#allocation2 + $0x20] sm:$0xf] %vm308_vm1, %v5172_v30  ;;  %v414_v34 = vld [vmem:[#allocation7 + $0x40] sm:$0xff]  ;;  %v417_v35 = vld [vmem:[#allocation7 + $0x58] sm:$0xff] }
  0xa3   : > { %340 = vst.msk [vmem:[#allocation2 + $0x54] sm:$0xff] %vm306_vm0, %v5179_v29  ;;  %323 = vst.msk [vmem:[#allocation2 + $0x24] sm:$0xff] %vm306_vm0, %v5173_v31  ;;  %v5174_v36 = vld [vmem:[%s7095_s10 + $0x38] sm:$0xf]  ;;  %v5373_v37 = vpack.c.bf16 %v417_v35, %v414_v34  ;;  %v1102_v39 = vld [vmem:[#allocation7 + $0xb0] sm:$0xff] }
  0xa4   : > { %341 = vst.msk [vmem:[#allocation2 + $0x5c] sm:$0xf] %vm308_vm1, %v5180_v32  ;;  %324 = vst.msk [vmem:[#allocation2 + $0x2c] sm:$0xf] %vm308_vm1, %v5174_v36  ;;  %v1099_v38 = vld [vmem:[#allocation7 + $0x98] sm:$0xff]  ;;  %v342_v40 = vld [vmem:[%s7095_s10 + $0x2] sm:$0xff] }
  0xa5   : > { %v7144_v41 = vld [vmem:[#allocation2 + $0x30] sm:$0xff]  ;;  %v7146_v42 = vld [vmem:[#allocation2] sm:$0xff]  ;;  %v5393_v43 = vpack.c.bf16 %v1102_v39, %v1099_v38  ;;  %345 = vst.msk [vmem:[#allocation2 + $0x60] sm:$0xff] %vm306_vm0, %v342_v40  ;;  %v343_v44 = vld [vmem:[%s7095_s10 + $0xa] sm:$0xf]  ;;  %5374 = vmatprep.subr.bf16.mxu1 %v5373_v37 }
  0xa6   : > { %5199 = vmatmul.mubr.msk.f32.vlgmr.msra.gmra.mrb[0].mxu1 %vm306_vm0, %v7144_v41  ;;  %5211 = vmatmul.mubr.msk.f32.vlgmr.msra.gmra.mrb[0].mxu0 %vm306_vm0, %v7146_v42  ;;  %v5181_v45 = vld [vmem:[%s7095_s10 + $0x12] sm:$0xff]  ;;  %v7158_v47 = vld [vmem:[#allocation2 + $0x8] sm:$0xff]  ;;  %346 = vst.msk [vmem:[#allocation2 + $0x68] sm:$0xf] %vm308_vm1, %v343_v44  ;;  %v5182_v52 = vld [vmem:[%s7095_s10 + $0x1a] sm:$0xf] }
  0xa7   : > { %5388 = vmatpush1.bf16.msra.mxu0 %v5387_v33  ;;  %506 = vmatprep.mubr.f32.mxu1 %v6869_v0  ;;  %v7156_v46 = vld [vmem:[#allocation2 + $0x38] sm:$0xff]  ;;  %349 = vst.msk [vmem:[#allocation2 + $0x6c] sm:$0xff] %vm306_vm0, %v5181_v45  ;;  %v401_v48 = vld [vmem:[#allocation7 + $0x10] sm:$0xff]  ;;  %v404_v49 = vld [vmem:[#allocation7 + $0x28] sm:$0xff] }
  0xa8   : > { %720 = vmatprep.mubr.f32.mxu0 %v6869_v0  ;;  %5376 = vmatpush3.bf16.msra.mxu1 %v5373_v37  ;;  %v7167_v50 = vld [vmem:[#allocation2 + $0x40] sm:$0xff]  ;;  %v7169_v51 = vpack.c.bf16 %v404_v49, %v401_v48  ;;  %v7174_v53 = vld [vmem:[#allocation2 + $0x10] sm:$0xff]  ;;  %350 = vst.msk [vmem:[#allocation2 + $0x74] sm:$0xf] %vm308_vm1, %v5182_v52  ;;  %v5184_v55 = vld [vmem:[%s7095_s10 + $0x2a] sm:$0xf] }
  0xa9   : > { %5394 = vmatprep.subr.bf16.mxu0 %v5393_v43  ;;  %v5183_v54 = vld [vmem:[%s7095_s10 + $0x22] sm:$0xff]  ;;  %354 = vst.msk [vmem:[#allocation2 + $0x80] sm:$0xf] %vm308_vm1, %v5184_v55  ;;  %v5185_v56 = vld [vmem:[%s7095_s10 + $0x32] sm:$0xff]  ;;  %v5186_v57 = vld [vmem:[%s7095_s10 + $0x3a] sm:$0xf] }
  0xaa   : > { %5200 = vmatmul.mubr.msk.f32.gmra.mrb[2].mxu1 %vm306_vm0, %v7156_v46  ;;  %5212 = vmatmul.mubr.msk.f32.gmra.mrb[2].mxu0 %vm306_vm0, %v7158_v47  ;;  %353 = vst.msk [vmem:[#allocation2 + $0x78] sm:$0xff] %vm306_vm0, %v5183_v54  ;;  %357 = vst.msk [vmem:[#allocation2 + $0x84] sm:$0xff] %vm306_vm0, %v5185_v56  ;;  %v359_v58 = vld [vmem:[%s7095_s10 + $0x3] sm:$0xff]  ;;  %v7195_v60 = vld [vmem:[#allocation2 + $0x18] sm:$0xff] }
  0xab   : > { %512 = vmatprep.mubr.f32.mxu1 %v6869_v0  ;;  %726 = vmatprep.mubr.f32.mxu0 %v6869_v0  ;;  %358 = vst.msk [vmem:[#allocation2 + $0x8c] sm:$0xf] %vm308_vm1, %v5186_v57  ;;  %v7193_v59 = vld [vmem:[#allocation2 + $0x48] sm:$0xff]  ;;  %v5187_v62 = vld [vmem:[%s7095_s10 + $0x13] sm:$0xff]  ;;  %v5188_v63 = vld [vmem:[%s7095_s10 + $0x1b] sm:$0xf] }
  0xac   : > { %5382 = vmatprep.subr.bf16.mxu1 %v7169_v51  ;;  %362 = vst.msk [vmem:[#allocation2 + $0x90] sm:$0xff] %vm306_vm0, %v359_v58  ;;  %v360_v61 = vld [vmem:[%s7095_s10 + $0xb] sm:$0xf]  ;;  %366 = vst.msk [vmem:[#allocation2 + $0x9c] sm:$0xff] %vm306_vm0, %v5187_v62  ;;  %v5189_v1 = vld [vmem:[%s7095_s10 + $0x23] sm:$0xff] }
  0xad   : > { %363 = vst.msk [vmem:[#allocation2 + $0x98] sm:$0xf] %vm308_vm1, %v360_v61  ;;  %367 = vst.msk [vmem:[#allocation2 + $0xa4] sm:$0xf] %vm308_vm1, %v5188_v63  ;;  %v5190_v2 = vld [vmem:[%s7095_s10 + $0x2b] sm:$0xf] }
  0xae   : > { %5201 = vmatmul.mubr.msk.f32.gmra.mrb[4].mxu1 %vm306_vm0, %v7167_v50  ;;  %5213 = vmatmul.mubr.msk.f32.gmra.mrb[4].mxu0 %vm306_vm0, %v7174_v53  ;;  %370 = vst.msk [vmem:[#allocation2 + $0xa8] sm:$0xff] %vm306_vm0, %v5189_v1  ;;  %v5191_v3 = vld [vmem:[%s7095_s10 + $0x33] sm:$0xff]  ;;  %v5192_v4 = vld [vmem:[%s7095_s10 + $0x3b] sm:$0xf]  ;;  %v7216_v6 = vld [vmem:[#allocation2 + $0x20] sm:$0xff] }
  0xaf   : > { %518 = vmatprep.mubr.f32.mxu1 %v6869_v0  ;;  %732 = vmatprep.mubr.f32.mxu0 %v6869_v0  ;;  %371 = vst.msk [vmem:[#allocation2 + $0xb0] sm:$0xf] %vm308_vm1, %v5190_v2  ;;  %v409_v5 = vld [vmem:[#allocation2 + $0x50] sm:$0xff]  ;;  %375 = vst.msk [vmem:[#allocation2 + $0xbc] sm:$0xf] %vm308_vm1, %v5192_v4  ;;  %v376_v7 = vld [vmem:[%s7095_s10 + $0x4] sm:$0xff] }
  0xb0   : > { %374 = vst.msk [vmem:[#allocation2 + $0xb4] sm:$0xff] %vm306_vm0, %v5191_v3  ;;  %379 = vst.msk [vmem:[#allocation2 + $0xc0] sm:$0xff] %vm306_vm0, %v376_v7  ;;  %v377_v8 = vld [vmem:[%s7095_s10 + $0xc] sm:$0xf]  ;;  %v5193_v9 = vld [vmem:[%s7095_s10 + $0x14] sm:$0xff] }
  0xb1   : > { %v5194_v10 = vld [vmem:[%s7095_s10 + $0x1c] sm:$0xf]  ;;  %380 = vst.msk [vmem:[#allocation2 + $0xc8] sm:$0xf] %vm308_vm1, %v377_v8  ;;  %v5195_v12 = vld [vmem:[%s7095_s10 + $0x24] sm:$0xff]  ;;  %v5197_v15 = vld [vmem:[%s7095_s10 + $0x34] sm:$0xff] }
  0xb2   : > { %5202 = vmatmul.mubr.msk.f32.gmra.mrb[6].mxu1 %vm306_vm0, %v7193_v59  ;;  %5214 = vmatmul.mubr.msk.f32.gmra.mrb[6].mxu0 %vm306_vm0, %v7195_v60  ;;  %v410_v11 = vld [vmem:[#allocation2 + $0x58] sm:$0xff]  ;;  %383 = vst.msk [vmem:[#allocation2 + $0xcc] sm:$0xff] %vm306_vm0, %v5193_v9  ;;  %v5196_v13 = vld [vmem:[%s7095_s10 + $0x2c] sm:$0xf]  ;;  %387 = vst.msk [vmem:[#allocation2 + $0xd8] sm:$0xff] %vm306_vm0, %v5195_v12 }
  0xb3   : > { %524 = vmatprep.mubr.f32.mxu1 %v6869_v0  ;;  %738 = vmatprep.mubr.f32.mxu0 %v6869_v0  ;;  %384 = vst.msk [vmem:[#allocation2 + $0xd4] sm:$0xf] %vm308_vm1, %v5194_v10  ;;  %v398_v14 = vld [vmem:[#allocation2 + $0x28] sm:$0xff]  ;;  %388 = vst.msk [vmem:[#allocation2 + $0xe0] sm:$0xf] %vm308_vm1, %v5196_v13  ;;  %v1098_v17 = vld [vmem:[#allocation7 + $0x90] sm:$0xff] }
  0xb4   : > { %v5198_v16 = vld [vmem:[%s7095_s10 + $0x3c] sm:$0xf]  ;;  %v1101_v18 = vld [vmem:[#allocation7 + $0xa8] sm:$0xff]  ;;  %391 = vst.msk [vmem:[#allocation2 + $0xe4] sm:$0xff] %vm306_vm0, %v5197_v15  ;;  %v855_v19 = vld [vmem:[#allocation7 + $0x70] sm:$0xff] }
  0xb5   : > { %392 = vst.msk [vmem:[#allocation2 + $0xec] sm:$0xf] %vm308_vm1, %v5198_v16  ;;  %v858_v20 = vld [vmem:[#allocation7 + $0x88] sm:$0xff]  ;;  %v1347_v22 = vld [vmem:[#allocation7 + $0xe0] sm:$0xff]  ;;  %v5395_v24 = vpack.c.bf16 %v1101_v18, %v1098_v17  ;;  %v848_v28 = vld [vmem:[#allocation2 + $0x70] sm:$0xff] }
  0xb6   : > { %5203 = vmatmul.mubr.msk.f32.gmra.mrb[8].mxu1 %vm306_vm0, %v409_v5  ;;  %5215 = vmatmul.mubr.msk.f32.gmra.mrb[8].mxu0 %vm306_vm0, %v7216_v6  ;;  %v1344_v21 = vld [vmem:[#allocation7 + $0xc8] sm:$0xff]  ;;  %v846_v23 = vld [vmem:[#allocation2 + $0x60] sm:$0xff]  ;;  %v5389_v25 = vpack.c.bf16 %v858_v20, %v855_v19  ;;  %v1103_v30 = vld [vmem:[#allocation7 + $0xb8] sm:$0xff] }
  0xb7   : > { %530 = vmatprep.mubr.f32.mxu1 %v6869_v0  ;;  %744 = vmatprep.mubr.f32.mxu0 %v6869_v0  ;;  %v5401_v26 = vpack.c.bf16 %v1347_v22, %v1344_v21  ;;  %v847_v27 = vld [vmem:[#allocation2 + $0x68] sm:$0xff]  ;;  %v1100_v29 = vld [vmem:[#allocation7 + $0xa0] sm:$0xff]  ;;  %v849_v31 = vld [vmem:[#allocation2 + $0x78] sm:$0xff] }
  0xb8   : > { %v5397_v32 = vpack.c.bf16 %v1103_v30, %v1100_v29  ;;  %v850_v33 = vld [vmem:[#allocation2 + $0x80] sm:$0xff]  ;;  %v851_v34 = vld [vmem:[#allocation2 + $0x88] sm:$0xff]  ;;  %v1346_v36 = vld [vmem:[#allocation7 + $0xd8] sm:$0xff] }
  0xb9   : > { %v1343_v35 = vld [vmem:[#allocation7 + $0xc0] sm:$0xff]  ;;  %v1345_v37 = vld [vmem:[#allocation7 + $0xd0] sm:$0xff]  ;;  %v1348_v38 = vld [vmem:[#allocation7 + $0xe8] sm:$0xff] }
  0xba   : > { %5204 = vmatmul.mubr.msk.f32.gmra.mrb[10].mxu1 %vm306_vm0, %v410_v11  ;;  %5216 = vmatmul.mubr.msk.f32.gmra.mrb[10].mxu0 %vm306_vm0, %v398_v14  ;;  %v2339_v39 = vld [vmem:[#allocation10 + $0x618] sm:$0xff]  ;;  %v5405_v43 = vpack.c.bf16 %v1348_v38, %v1345_v37  ;;  %v1092_v45 = vld [vmem:[#allocation2 + $0x98] sm:$0xff]  ;;  %v2338_v56 = vld [vmem:[#allocation10 + $0x610] sm:$0xff] }
  0xbb   : > { %5308 = vmatprep.mubr.msk.f32.mxu1 %vm306_vm0, %v7144_v41  ;;  %941 = vmatprep.mubr.f32.mxu0 %v6869_v0  ;;  %v2343_v40 = vld [vmem:[#allocation10 + $0x638] sm:$0xff]  ;;  %v2341_v48 = vld [vmem:[#allocation10 + $0x628] sm:$0xff]  ;;  %v2336_v54 = vld [vmem:[#allocation10 + $0x600] sm:$0xff] }
  0xbc   : > { %v1091_v41 = vld [vmem:[#allocation2 + $0x90] sm:$0xff]  ;;  %v5505_v44 = vpack.c.bf16 %v2343_v40, %v2339_v39  ;;  %v1094_v49 = vld [vmem:[#allocation2 + $0xa8] sm:$0xff]  ;;  %v1096_v52 = vld [vmem:[#allocation2 + $0xb8] sm:$0xff] }
  0xbd   : > { %v2340_v55 = vld [vmem:[#allocation10 + $0x620] sm:$0xff]  ;;  %v2342_v57 = vld [vmem:[#allocation10 + $0x630] sm:$0xff]  ;;  %v2345_v58 = vld [vmem:[#allocation10 + $0x648] sm:$0xff] }
  0xbe   : > { %5309 = vmatmul.mubr.msk.f32.vlgmr.msra.gmra.mrb[12].mxu1 %vm306_vm0, %v7156_v46  ;;  %5223 = vmatmul.mubr.msk.f32.vlgmr.msra.gmra.mrb[0].mxu0 %vm306_vm0, %v846_v23  ;;  %v1093_v46 = vld [vmem:[#allocation2 + $0xa0] sm:$0xff]  ;;  %v2351_v61 = vld [vmem:[#allocation10 + $0x678] sm:$0xff]  ;;  %v5411_v1 = vpack.c.bf16 %v2340_v55, %v2336_v54  ;;  %v5507_v2 = vpack.c.bf16 %v2342_v57, %v2338_v56  ;;  %v2344_v3 = vld [vmem:[#allocation10 + $0x640] sm:$0xff] }
  0xbf   : > { %5396 = vmatpush1.bf16.msra.mxu0 %v5395_v24  ;;  %5311 = vmatprep.mubr.msk.f32.mxu1 %vm306_vm0, %v7167_v50  ;;  %v1337_v62 = vld [vmem:[#allocation2 + $0xc8] sm:$0xff]  ;;  %v1338_v63 = vld [vmem:[#allocation2 + $0xd0] sm:$0xff]  ;;  %v1339_v9 = vld [vmem:[#allocation2 + $0xd8] sm:$0xff] }
  0xc0   : > { %947 = vmatprep.mubr.f32.mxu0 %v6869_v0  ;;  %5384 = vmatpush3.bf16.msra.mxu1 %v7169_v51  ;;  %v1095_v51 = vld [vmem:[#allocation2 + $0xb0] sm:$0xff]  ;;  %v2346_v7 = vld [vmem:[#allocation10 + $0x650] sm:$0xff]  ;;  %v2357_v15 = vld [vmem:[#allocation10 + $0x6a8] sm:$0xff] }
  0xc1   : > { %5390 = vmatprep.subr.bf16.mxu1 %v5389_v25  ;;  %5402 = vmatprep.subr.bf16.mxu0 %v5401_v26  ;;  %v2350_v8 = vld [vmem:[#allocation10 + $0x670] sm:$0xff]  ;;  %v2355_v16 = vld [vmem:[#allocation10 + $0x698] sm:$0xff]  ;;  %v2352_v19 = vld [vmem:[#allocation10 + $0x680] sm:$0xff] }
  0xc2   : > { %5312 = vmatmul.mubr.msk.f32.gmra.mrb[14].mxu1 %vm306_vm0, %v7193_v59  ;;  %5224 = vmatmul.mubr.msk.f32.gmra.mrb[2].mxu0 %vm306_vm0, %v847_v27  ;;  %v2349_v59 = vld [vmem:[#allocation10 + $0x668] sm:$0xff]  ;;  %v5511_v12 = vpack.c.bf16 %v2350_v8, %v2346_v7  ;;  %v1341_v13 = vld [vmem:[#allocation2 + $0xe8] sm:$0xff]  ;;  %v2356_v20 = vld [vmem:[#allocation10 + $0x6a0] sm:$0xff] }
  0xc3   : > { %5314 = vmatprep.mubr.msk.f32.mxu1 %vm306_vm0, %v409_v5  ;;  %953 = vmatprep.mubr.f32.mxu0 %v6869_v0  ;;  %v5413_v4 = vpack.c.bf16 %v2349_v59, %v2345_v58  ;;  %v1340_v10 = vld [vmem:[#allocation2 + $0xe0] sm:$0xff]  ;;  %v2359_v18 = vld [vmem:[#allocation10 + $0x6b8] sm:$0xff]  ;;  %v5419_v22 = vpack.c.bf16 %v2356_v20, %v2352_v19  ;;  %v2376_v55 = vld [vmem:[#allocation10 + $0x740] sm:$0xff] }
  0xc4   : > { %v5513_v21 = vpack.c.bf16 %v2359_v18, %v2355_v16  ;;  %v2358_v24 = vld [vmem:[#allocation10 + $0x6b0] sm:$0xff]  ;;  %v2361_v26 = vld [vmem:[#allocation10 + $0x6c8] sm:$0xff]  ;;  %v2367_v30 = vld [vmem:[#allocation10 + $0x6f8] sm:$0xff] }
  0xc5   : > { %v2369_v38 = vld [vmem:[#allocation10 + $0x708] sm:$0xff]  ;;  %v2371_v40 = vld [vmem:[#allocation10 + $0x718] sm:$0xff]  ;;  %v2380_v56 = vld [vmem:[#allocation10 + $0x760] sm:$0xff] }
  0xc6   : > { %5315 = vmatmul.mubr.msk.f32.gmra.mrb[16].mxu1 %vm306_vm0, %v410_v11  ;;  %5225 = vmatmul.mubr.msk.f32.gmra.mrb[4].mxu0 %vm306_vm0, %v848_v28  ;;  %v2373_v39 = vld [vmem:[#allocation10 + $0x728] sm:$0xff]  ;;  %v2383_v54 = vld [vmem:[#allocation10 + $0x778] sm:$0xff]  ;;  %v5431_v58 = vpack.c.bf16 %v2380_v56, %v2376_v55  ;;  %v2378_v59 = vld [vmem:[#allocation10 + $0x750] sm:$0xff] }
  0xc7   : > { %5321 = vmatprep.mubr.msk.f32.mxu1 %vm306_vm0, %v7146_v42  ;;  %959 = vmatprep.mubr.f32.mxu0 %v6869_v0  ;;  %v5403_v42 = vpack.c.bf16 %v1346_v36, %v1343_v35  ;;  %v2362_v35 = vld [vmem:[#allocation10 + $0x6d0] sm:$0xff]  ;;  %v2392_v16 = vld [vmem:[#allocation10 + $0x7c0] sm:$0xff] }
  0xc8   : > { %v2366_v36 = vld [vmem:[#allocation10 + $0x6f0] sm:$0xff] }
  0xc9   : > { %v5519_v37 = vpack.c.bf16 %v2366_v36, %v2362_v35  ;;  %v2386_v8 = vld [vmem:[#allocation10 + $0x790] sm:$0xff]  ;;  %v2413_v35 = vld [vmem:[#allocation10 + $0x868] sm:$0xff] }
  0xca   : > { %5322 = vmatmul.mubr.msk.f32.vlgmr.msra.gmra.mrb[12].mxu1 %vm306_vm0, %v7158_v47  ;;  %5226 = vmatmul.mubr.msk.f32.gmra.mrb[6].mxu0 %vm306_vm0, %v849_v31  ;;  %v2337_v47 = vld [vmem:[#allocation10 + $0x608] sm:$0xff]  ;;  %v2394_v20 = vld [vmem:[#allocation10 + $0x7d0] sm:$0xff] }
  0xcb   : > { %5324 = vmatprep.mubr.msk.f32.mxu1 %vm306_vm0, %v7174_v53  ;;  %965 = vmatprep.mubr.f32.mxu0 %v6869_v0  ;;  %v5409_v50 = vpack.c.bf16 %v2341_v48, %v2337_v47  ;;  %v1336_v53 = vld [vmem:[#allocation2 + $0xc0] sm:$0xff] }
  0xcc   : > { %5392 = vmatpush3.bf16.msra.mxu1 %v5389_v25  ;;  %v2370_v47 = vld [vmem:[#allocation10 + $0x710] sm:$0xff] }
  0xcd   : > { %5398 = vmatprep.subr.bf16.mxu1 %v5397_v32  ;;  %v2374_v48 = vld [vmem:[#allocation10 + $0x730] sm:$0xff] }
  0xce   : > { %5325 = vmatmul.mubr.msk.f32.gmra.mrb[14].mxu1 %vm306_vm0, %v7195_v60  ;;  %5227 = vmatmul.mubr.msk.f32.gmra.mrb[8].mxu0 %vm306_vm0, %v850_v33  ;;  %v2347_v60 = vld [vmem:[#allocation10 + $0x658] sm:$0xff]  ;;  %v2418_v55 = vld [vmem:[#allocation10 + $0x890] sm:$0xff] }
  0xcf   : > { %5327 = vmatprep.mubr.msk.f32.mxu1 %vm306_vm0, %v7216_v6  ;;  %971 = vmatprep.mubr.f32.mxu0 %v6869_v0  ;;  %v5509_v5 = vpack.c.bf16 %v2351_v61, %v2347_v60  ;;  %v2348_v6 = vld [vmem:[#allocation10 + $0x660] sm:$0xff]  ;;  %v2382_v60 = vld [vmem:[#allocation10 + $0x770] sm:$0xff] }
  0xd0   : > { %v5415_v11 = vpack.c.bf16 %v2348_v6, %v2344_v3  ;;  %v5527_v61 = vpack.c.bf16 %v2382_v60, %v2378_v59  ;;  %v2391_v3 = vld [vmem:[#allocation10 + $0x7b8] sm:$0xff]  ;;  %v2425_v59 = vld [vmem:[#allocation10 + $0x8c8] sm:$0xff] }
  0xd1   : > { %v2429_v60 = vld [vmem:[#allocation10 + $0x8e8] sm:$0xff] }
  0xd2   : > { %5328 = vmatmul.mubr.msk.f32.gmra.mrb[16].mxu1 %vm306_vm0, %v398_v14  ;;  %5228 = vmatmul.mubr.msk.f32.gmra.mrb[10].mxu0 %vm306_vm0, %v851_v34  ;;  %v2353_v14 = vld [vmem:[#allocation10 + $0x688] sm:$0xff] }
  0xd3   : > { %5334 = vmatprep.mubr.msk.f32.mxu1 %vm306_vm0, %v846_v23  ;;  %1186 = vmatprep.mubr.f32.mxu0 %v6869_v0  ;;  %v5417_v17 = vpack.c.bf16 %v2357_v15, %v2353_v14  ;;  %v2354_v23 = vld [vmem:[#allocation10 + $0x690] sm:$0xff]  ;;  %v2399_v15 = vld [vmem:[#allocation10 + $0x7f8] sm:$0xff] }
  0xd4   : > { %v5515_v25 = vpack.c.bf16 %v2358_v24, %v2354_v23  ;;  %v2405_v24 = vld [vmem:[#allocation10 + $0x828] sm:$0xff] }
  0xd6   : > { %5335 = vmatmul.mubr.msk.f32.vlgmr.msra.gmra.mrb[12].mxu1 %vm306_vm0, %v847_v27  ;;  %5235 = vmatmul.mubr.msk.f32.vlgmr.msra.gmra.mrb[0].mxu0 %vm306_vm0, %v1091_v41  ;;  %v2365_v27 = vld [vmem:[#allocation10 + $0x6e8] sm:$0xff] }
  0xd7   : > { %5404 = vmatpush1.bf16.msra.mxu0 %v5403_v42  ;;  %5337 = vmatprep.mubr.msk.f32.mxu1 %vm306_vm0, %v848_v28  ;;  %v2363_v28 = vld [vmem:[#allocation10 + $0x6d8] sm:$0xff]  ;;  %v5421_v29 = vpack.c.bf16 %v2365_v27, %v2361_v26 }
  0xd8   : > { %1192 = vmatprep.mubr.f32.mxu0 %v6869_v0  ;;  %5400 = vmatpush3.bf16.msra.mxu1 %v5397_v32  ;;  %v2364_v32 = vld [vmem:[#allocation10 + $0x6e0] sm:$0xff]  ;;  %v2375_v42 = vld [vmem:[#allocation10 + $0x738] sm:$0xff] }
  0xd9   : > { %5406 = vmatprep.subr.bf16.mxu1 %v5405_v43  ;;  %5506 = vmatprep.subr.bf16.mxu0 %v5505_v44  ;;  %v2372_v44 = vld [vmem:[#allocation10 + $0x720] sm:$0xff]  ;;  %v2407_v26 = vld [vmem:[#allocation10 + $0x838] sm:$0xff] }
  0xda   : > { %5338 = vmatmul.mubr.msk.f32.gmra.mrb[14].mxu1 %vm306_vm0, %v849_v31  ;;  %5236 = vmatmul.mubr.msk.f32.gmra.mrb[2].mxu0 %vm306_vm0, %v1092_v45  ;;  %v2360_v31 = vld [vmem:[#allocation10 + $0x6c0] sm:$0xff] }
  0xdb   : > { %5340 = vmatprep.mubr.msk.f32.mxu1 %vm306_vm0, %v850_v33  ;;  %1198 = vmatprep.mubr.f32.mxu0 %v6869_v0  ;;  %v5517_v33 = vpack.c.bf16 %v2367_v30, %v2363_v28  ;;  %v2404_v30 = vld [vmem:[#allocation10 + $0x820] sm:$0xff] }
  0xde   : > { %5341 = vmatmul.mubr.msk.f32.gmra.mrb[16].mxu1 %vm306_vm0, %v851_v34  ;;  %5237 = vmatmul.mubr.msk.f32.gmra.mrb[4].mxu0 %vm306_vm0, %v1093_v46  ;;  %v5423_v34 = vpack.c.bf16 %v2364_v32, %v2360_v31  ;;  %v2402_v31 = vld [vmem:[#allocation10 + $0x810] sm:$0xff] }
  0xdf   : > { %1204 = vmatprep.mubr.f32.mxu0 %v6869_v0  ;;  %5347 = vmatprep.mubr.msk.f32.mxu1 %vm306_vm0, %v1091_v41  ;;  %v5425_v41 = vpack.c.bf16 %v2373_v39, %v2369_v38  ;;  %v2411_v38 = vld [vmem:[#allocation10 + $0x858] sm:$0xff] }
  0xe0   : > { %v2415_v39 = vld [vmem:[#allocation10 + $0x878] sm:$0xff] }
  0xe2   : > { %5238 = vmatmul.mubr.msk.f32.gmra.mrb[6].mxu0 %vm306_vm0, %v1094_v49  ;;  %5348 = vmatmul.mubr.msk.f32.vlgmr.msra.gmra.mrb[12].mxu1 %vm306_vm0, %v1092_v45  ;;  %v5521_v45 = vpack.c.bf16 %v2375_v42, %v2371_v40  ;;  %v2408_v40 = vld [vmem:[#allocation10 + $0x840] sm:$0xff] }
  0xe3   : > { %1210 = vmatprep.mubr.f32.mxu0 %v6869_v0  ;;  %5350 = vmatprep.mubr.msk.f32.mxu1 %vm306_vm0, %v1093_v46  ;;  %v2412_v42 = vld [vmem:[#allocation10 + $0x860] sm:$0xff] }
  0xe4   : > { %5408 = vmatpush3.bf16.msra.mxu1 %v5405_v43  ;;  %v2368_v43 = vld [vmem:[#allocation10 + $0x700] sm:$0xff] }
  0xe5   : > { %5410 = vmatprep.subr.bf16.mxu1 %v5409_v50  ;;  %v5427_v46 = vpack.c.bf16 %v2372_v44, %v2368_v43  ;;  %v2377_v50 = vld [vmem:[#allocation10 + $0x748] sm:$0xff]  ;;  %v2410_v43 = vld [vmem:[#allocation10 + $0x850] sm:$0xff] }
  0xe6   : > { %5239 = vmatmul.mubr.msk.f32.gmra.mrb[8].mxu0 %vm306_vm0, %v1095_v51  ;;  %5351 = vmatmul.mubr.msk.f32.gmra.mrb[14].mxu1 %vm306_vm0, %v1094_v49  ;;  %v5523_v49 = vpack.c.bf16 %v2374_v48, %v2370_v47  ;;  %v2414_v44 = vld [vmem:[#allocation10 + $0x870] sm:$0xff]  ;;  %v2419_v47 = vld [vmem:[#allocation10 + $0x898] sm:$0xff]  ;;  %v5447_v48 = vpack.c.bf16 %v2412_v42, %v2408_v40 }
  0xe7   : > { %1216 = vmatprep.mubr.f32.mxu0 %v6869_v0  ;;  %5353 = vmatprep.mubr.msk.f32.mxu1 %vm306_vm0, %v1095_v51  ;;  %v2381_v51 = vld [vmem:[#allocation10 + $0x768] sm:$0xff]  ;;  %v2454_v42 = vld [vmem:[#allocation10 + $0x9b0] sm:$0xff] }
  0xea   : > { %5240 = vmatmul.mubr.msk.f32.gmra.mrb[10].mxu0 %vm306_vm0, %v1096_v52  ;;  %5354 = vmatmul.mubr.msk.f32.gmra.mrb[16].mxu1 %vm306_vm0, %v1096_v52  ;;  %v2379_v52 = vld [vmem:[#allocation10 + $0x758] sm:$0xff] }
  0xeb   : > { %1431 = vmatprep.mubr.f32.mxu0 %v6869_v0  ;;  %5360 = vmatprep.mubr.msk.f32.mxu1 %vm306_vm0, %v1336_v53  ;;  %v5525_v57 = vpack.c.bf16 %v2383_v54, %v2379_v52  ;;  %v2420_v54 = vld [vmem:[#allocation10 + $0x8a0] sm:$0xff] }
  0xee   : > { %5247 = vmatmul.mubr.msk.f32.vlgmr.msra.gmra.mrb[0].mxu0 %vm306_vm0, %v1336_v53  ;;  %5361 = vmatmul.mubr.msk.f32.vlgmr.msra.gmra.mrb[12].mxu1 %vm306_vm0, %v1337_v62  ;;  %v5429_v53 = vpack.c.bf16 %v2381_v51, %v2377_v50  ;;  %v5543_v50 = vpack.c.bf16 %v2414_v44, %v2410_v43  ;;  %v2457_v44 = vld [vmem:[#allocation10 + $0x9c8] sm:$0xff] }
  0xef   : > { %1437 = vmatprep.mubr.f32.mxu0 %v6869_v0  ;;  %5363 = vmatprep.mubr.msk.f32.mxu1 %vm306_vm0, %v1338_v63 }
  0xf0   : > { %5412 = vmatpush1.bf16.msra.mxu1 %v5411_v1  ;;  %5508 = vmatpush1.bf16.msra.mxu0 %v5507_v2  ;;  %v2387_v1 = vld [vmem:[#allocation10 + $0x798] sm:$0xff] }
  0xf1   : > { %5414 = vmatprep.subr.bf16.mxu1 %v5413_v4  ;;  %5510 = vmatprep.subr.bf16.mxu0 %v5509_v5  ;;  %v2384_v4 = vld [vmem:[#allocation10 + $0x780] sm:$0xff]  ;;  %v5529_v6 = vpack.c.bf16 %v2391_v3, %v2387_v1 }
  0xf2   : > { %5248 = vmatmul.mubr.msk.f32.gmra.mrb[2].mxu0 %vm306_vm0, %v1337_v62  ;;  %5364 = vmatmul.mubr.msk.f32.gmra.mrb[14].mxu1 %vm306_vm0, %v1339_v9  ;;  %v2385_v62 = vld [vmem:[#allocation10 + $0x788] sm:$0xff]  ;;  %v2388_v5 = vld [vmem:[#allocation10 + $0x7a0] sm:$0xff] }
  0xf3   : > { %1443 = vmatprep.mubr.f32.mxu0 %v6869_v0  ;;  %5366 = vmatprep.mubr.msk.f32.mxu1 %vm306_vm0, %v1340_v10  ;;  %v5435_v7 = vpack.c.bf16 %v2388_v5, %v2384_v4  ;;  %v2424_v1 = vld [vmem:[#allocation10 + $0x8c0] sm:$0xff]  ;;  %v2426_v5 = vld [vmem:[#allocation10 + $0x8d0] sm:$0xff] }
  0xf4   : > { %5416 = vmatpush1.bf16.msra.mxu1 %v5415_v11  ;;  %5512 = vmatpush1.bf16.msra.mxu0 %v5511_v12  ;;  %v2393_v11 = vld [vmem:[#allocation10 + $0x7c8] sm:$0xff] }
  0xf5   : > { %5418 = vmatprep.subr.bf16.mxu1 %v5417_v17  ;;  %5514 = vmatprep.subr.bf16.mxu0 %v5513_v21  ;;  %v2397_v12 = vld [vmem:[#allocation10 + $0x7e8] sm:$0xff]  ;;  %v2396_v17 = vld [vmem:[#allocation10 + $0x7e0] sm:$0xff]  ;;  %v2398_v21 = vld [vmem:[#allocation10 + $0x7f0] sm:$0xff] }
  0xf6   : > { %5249 = vmatmul.mubr.msk.f32.gmra.mrb[4].mxu0 %vm306_vm0, %v1338_v63  ;;  %5367 = vmatmul.mubr.msk.f32.gmra.mrb[16].mxu1 %vm306_vm0, %v1341_v13  ;;  %v2389_v63 = vld [vmem:[#allocation10 + $0x7a8] sm:$0xff]  ;;  %v5437_v14 = vpack.c.bf16 %v2397_v12, %v2393_v11  ;;  %v5439_v19 = vpack.c.bf16 %v2396_v17, %v2392_v16  ;;  %v5535_v23 = vpack.c.bf16 %v2398_v21, %v2394_v20  ;;  %v2439_v12 = vld [vmem:[#allocation10 + $0x938] sm:$0xff]  ;;  %v2434_v17 = vld [vmem:[#allocation10 + $0x910] sm:$0xff] }
  0xf7   : > { %1449 = vmatprep.mubr.f32.mxu0 %v6869_v0  ;;  %v5433_v2 = vpack.c.bf16 %v2389_v63, %v2385_v62  ;;  %v5453_v62 = vpack.c.bf16 %v2429_v60, %v2425_v59  ;;  %v2431_v63 = vld [vmem:[#allocation10 + $0x8f8] sm:$0xff]  ;;  %v2441_v20 = vld [vmem:[#allocation10 + $0x948] sm:$0xff] }
  0xf8   : > { %5420 = vmatpush1.bf16.msra.mxu1 %v5419_v22  ;;  %5516 = vmatpush1.bf16.msra.mxu0 %v5515_v25  ;;  %v2401_v22 = vld [vmem:[#allocation10 + $0x808] sm:$0xff]  ;;  %v2403_v25 = vld [vmem:[#allocation10 + $0x818] sm:$0xff] }
  0xf9   : > { %5422 = vmatprep.subr.bf16.mxu1 %v5421_v29  ;;  %5518 = vmatprep.subr.bf16.mxu0 %v5517_v33  ;;  %v5441_v27 = vpack.c.bf16 %v2405_v24, %v2401_v22  ;;  %v5537_v28 = vpack.c.bf16 %v2407_v26, %v2403_v25  ;;  %v2400_v29 = vld [vmem:[#allocation10 + $0x800] sm:$0xff]  ;;  %v2406_v33 = vld [vmem:[#allocation10 + $0x830] sm:$0xff]  ;;  %v2445_v21 = vld [vmem:[#allocation10 + $0x968] sm:$0xff] }
  0xfa   : > { %5250 = vmatmul.mubr.msk.f32.gmra.mrb[6].mxu0 %vm306_vm0, %v1339_v9  ;;  %v2390_v9 = vld [vmem:[#allocation10 + $0x7b0] sm:$0xff]  ;;  %v5443_v32 = vpack.c.bf16 %v2404_v30, %v2400_v29  ;;  %v5539_v36 = vpack.c.bf16 %v2406_v33, %v2402_v31  ;;  %v2443_v22 = vld [vmem:[#allocation10 + $0x958] sm:$0xff]  ;;  %v2440_v25 = vld [vmem:[#allocation10 + $0x940] sm:$0xff] }
  0xfb   : > { %1455 = vmatprep.mubr.f32.mxu0 %v6869_v0  ;;  %v2447_v24 = vld [vmem:[#allocation10 + $0x978] sm:$0xff]  ;;  %v2444_v26 = vld [vmem:[#allocation10 + $0x960] sm:$0xff]  ;;  %v2442_v29 = vld [vmem:[#allocation10 + $0x950] sm:$0xff] }
  0xfc   : > { %5424 = vmatpush1.bf16.msra.mxu1 %v5423_v34  ;;  %5520 = vmatpush1.bf16.msra.mxu0 %v5519_v37  ;;  %v2409_v34 = vld [vmem:[#allocation10 + $0x848] sm:$0xff]  ;;  %v2446_v30 = vld [vmem:[#allocation10 + $0x970] sm:$0xff]  ;;  %v2471_v60 = vld [vmem:[#allocation10 + $0xa38] sm:$0xff] }
  0xfd   : > { %5426 = vmatprep.subr.bf16.mxu1 %v5425_v41  ;;  %5522 = vmatprep.subr.bf16.mxu0 %v5521_v45  ;;  %v5445_v37 = vpack.c.bf16 %v2413_v35, %v2409_v34  ;;  %v5541_v41 = vpack.c.bf16 %v2415_v39, %v2411_v38  ;;  %v2417_v45 = vld [vmem:[#allocation10 + $0x888] sm:$0xff]  ;;  %v5559_v31 = vpack.c.bf16 %v2446_v30, %v2442_v29  ;;  %v2451_v34 = vld [vmem:[#allocation10 + $0x998] sm:$0xff]  ;;  %v2452_v38 = vld [vmem:[#allocation10 + $0x9a0] sm:$0xff] }
  0xfe   : > { %5251 = vmatmul.mubr.msk.f32.gmra.mrb[8].mxu0 %vm306_vm0, %v1340_v10  ;;  %v5531_v10 = vpack.c.bf16 %v2390_v9, %v2386_v8  ;;  %v2433_v8 = vld [vmem:[#allocation10 + $0x908] sm:$0xff] }
  0xff   : > { %1461 = vmatprep.mubr.f32.mxu0 %v6869_v0  ;;  %v2437_v9 = vld [vmem:[#allocation10 + $0x928] sm:$0xff] }
 0x100   : > { %5428 = vmatpush1.bf16.msra.mxu1 %v5427_v46  ;;  %5524 = vmatpush1.bf16.msra.mxu0 %v5523_v49  ;;  %v2421_v46 = vld [vmem:[#allocation10 + $0x8a8] sm:$0xff]  ;;  %v2423_v49 = vld [vmem:[#allocation10 + $0x8b8] sm:$0xff]  ;;  %v5457_v11 = vpack.c.bf16 %v2437_v9, %v2433_v8 }
 0x101   : > { %5430 = vmatprep.subr.bf16.mxu1 %v5429_v53  ;;  %5526 = vmatprep.subr.bf16.mxu0 %v5525_v57  ;;  %v5449_v51 = vpack.c.bf16 %v2421_v46, %v2417_v45  ;;  %v5545_v52 = vpack.c.bf16 %v2423_v49, %v2419_v47  ;;  %v2416_v53 = vld [vmem:[#allocation10 + $0x880] sm:$0xff]  ;;  %v2422_v57 = vld [vmem:[#allocation10 + $0x8b0] sm:$0xff]  ;;  %v2453_v33 = vld [vmem:[#allocation10 + $0x9a8] sm:$0xff] }
 0x102   : > { %5252 = vmatmul.mubr.msk.f32.gmra.mrb[10].mxu0 %vm306_vm0, %v1341_v13  ;;  %v2395_v13 = vld [vmem:[#allocation10 + $0x7d8] sm:$0xff]  ;;  %v5451_v56 = vpack.c.bf16 %v2420_v54, %v2416_v53  ;;  %v2461_v45 = vld [vmem:[#allocation10 + $0x9e8] sm:$0xff]  ;;  %v2456_v49 = vld [vmem:[#allocation10 + $0x9c0] sm:$0xff] }
 0x103   : > { %v5533_v18 = vpack.c.bf16 %v2399_v15, %v2395_v13  ;;  %v2432_v13 = vld [vmem:[#allocation10 + $0x900] sm:$0xff]  ;;  %v2459_v46 = vld [vmem:[#allocation10 + $0x9d8] sm:$0xff]  ;;  %v5469_v47 = vpack.c.bf16 %v2461_v45, %v2457_v44  ;;  %v2458_v53 = vld [vmem:[#allocation10 + $0x9d0] sm:$0xff] }
 0x104   : > { %5432 = vmatpush1.bf16.msra.mxu1 %v5431_v58  ;;  %5528 = vmatpush1.bf16.msra.mxu0 %v5527_v61  ;;  %v5547_v58 = vpack.c.bf16 %v2422_v57, %v2418_v55  ;;  %v2427_v61 = vld [vmem:[#allocation10 + $0x8d8] sm:$0xff]  ;;  %v2462_v54 = vld [vmem:[#allocation10 + $0x9f0] sm:$0xff]  ;;  %v2469_v57 = vld [vmem:[#allocation10 + $0xa28] sm:$0xff] }
 0x105   : > { %5434 = vmatprep.subr.bf16.mxu1 %v5433_v2  ;;  %5530 = vmatprep.subr.bf16.mxu0 %v5529_v6  ;;  %v2428_v2 = vld [vmem:[#allocation10 + $0x8e0] sm:$0xff]  ;;  %v5549_v3 = vpack.c.bf16 %v2431_v63, %v2427_v61  ;;  %v2430_v6 = vld [vmem:[#allocation10 + $0x8f0] sm:$0xff]  ;;  %v5567_v55 = vpack.c.bf16 %v2462_v54, %v2458_v53 }
 0x106   : > { %v5455_v4 = vpack.c.bf16 %v2428_v2, %v2424_v1 }
 0x108   : > { %5436 = vmatpush1.bf16.msra.mxu1 %v5435_v7  ;;  %5532 = vmatpush1.bf16.msra.mxu0 %v5531_v10  ;;  %v5551_v7 = vpack.c.bf16 %v2430_v6, %v2426_v5  ;;  %v2435_v10 = vld [vmem:[#allocation10 + $0x918] sm:$0xff] }
 0x109   : > { %5438 = vmatprep.subr.bf16.mxu1 %v5437_v14  ;;  %5534 = vmatprep.subr.bf16.mxu0 %v5533_v18  ;;  %v2436_v14 = vld [vmem:[#allocation10 + $0x920] sm:$0xff]  ;;  %v5553_v15 = vpack.c.bf16 %v2439_v12, %v2435_v10  ;;  %v2438_v18 = vld [vmem:[#allocation10 + $0x930] sm:$0xff] }
 0x10a   : > { %v5459_v16 = vpack.c.bf16 %v2436_v14, %v2432_v13  ;;  %v1581_v14 = vld [vmem:[#allocation9] sm:$0x7] }
 0x10c   : > { %5440 = vmatpush1.bf16.msra.mxu1 %v5439_v19  ;;  %5536 = vmatpush1.bf16.msra.mxu0 %v5535_v23  ;;  %v5555_v19 = vpack.c.bf16 %v2438_v18, %v2434_v17  ;;  %v5461_v23 = vpack.c.bf16 %v2445_v21, %v2441_v20 }
 0x10d   : > { %5442 = vmatprep.subr.bf16.mxu1 %v5441_v27  ;;  %5538 = vmatprep.subr.bf16.mxu0 %v5537_v28  ;;  %v5557_v27 = vpack.c.bf16 %v2447_v24, %v2443_v22  ;;  %v5463_v28 = vpack.c.bf16 %v2444_v26, %v2440_v25 }
 0x110   : > { %5444 = vmatpush1.bf16.msra.mxu1 %v5443_v32  ;;  %5540 = vmatpush1.bf16.msra.mxu0 %v5539_v36  ;;  %v2449_v32 = vld [vmem:[#allocation10 + $0x988] sm:$0xff]  ;;  %v2455_v36 = vld [vmem:[#allocation10 + $0x9b8] sm:$0xff] }
 0x111   : > { %5446 = vmatprep.subr.bf16.mxu1 %v5445_v37  ;;  %5542 = vmatprep.subr.bf16.mxu0 %v5541_v41  ;;  %v5465_v35 = vpack.c.bf16 %v2453_v33, %v2449_v32  ;;  %v2448_v37 = vld [vmem:[#allocation10 + $0x980] sm:$0xff]  ;;  %v5561_v39 = vpack.c.bf16 %v2455_v36, %v2451_v34  ;;  %v2450_v41 = vld [vmem:[#allocation10 + $0x990] sm:$0xff] }
 0x112   : > { %v5467_v40 = vpack.c.bf16 %v2452_v38, %v2448_v37  ;;  %v5563_v43 = vpack.c.bf16 %v2454_v42, %v2450_v41 }
 0x114   : > { %5448 = vmatpush1.bf16.msra.mxu1 %v5447_v48  ;;  %5544 = vmatpush1.bf16.msra.mxu0 %v5543_v50  ;;  %v2463_v48 = vld [vmem:[#allocation10 + $0x9f8] sm:$0xff]  ;;  %v2460_v50 = vld [vmem:[#allocation10 + $0x9e0] sm:$0xff] }
 0x115   : > { %5450 = vmatprep.subr.bf16.mxu1 %v5449_v51  ;;  %5546 = vmatprep.subr.bf16.mxu0 %v5545_v52  ;;  %v5565_v51 = vpack.c.bf16 %v2463_v48, %v2459_v46  ;;  %v5471_v52 = vpack.c.bf16 %v2460_v50, %v2456_v49 }
 0x118   : > { %5452 = vmatpush1.bf16.msra.mxu1 %v5451_v56  ;;  %5548 = vmatpush1.bf16.msra.mxu0 %v5547_v58  ;;  %v2465_v56 = vld [vmem:[#allocation10 + $0xa08] sm:$0xff]  ;;  %v2467_v58 = vld [vmem:[#allocation10 + $0xa18] sm:$0xff] }
 0x119   : > { %5454 = vmatprep.subr.bf16.mxu1 %v5453_v62  ;;  %5550 = vmatprep.subr.bf16.mxu0 %v5549_v3  ;;  %v5473_v59 = vpack.c.bf16 %v2469_v57, %v2465_v56  ;;  %v5569_v61 = vpack.c.bf16 %v2471_v60, %v2467_v58 }
 0x11c   : > { %5456 = vmatpush1.bf16.msra.mxu1 %v5455_v4  ;;  %5552 = vmatpush1.bf16.msra.mxu0 %v5551_v7 }
 0x11d   : > { %5458 = vmatprep.subr.bf16.mxu1 %v5457_v11  ;;  %5554 = vmatprep.subr.bf16.mxu0 %v5553_v15  ;;  %v1583_v11 = vlaneseq }
 0x11f   : > { %v7331_v12 = vshrl.u32 %v1583_v11, 7 }
 0x120   : > { %5460 = vmatpush1.bf16.msra.mxu1 %v5459_v16  ;;  %5556 = vmatpush1.bf16.msra.mxu0 %v5555_v19 }
 0x121   : > { %5462 = vmatprep.subr.bf16.mxu1 %v5461_v23  ;;  %5558 = vmatprep.subr.bf16.mxu0 %v5557_v27  ;;  %v1593_v13 = vsub.s32 2, %v7331_v12  ;;  %v1585_v15 = vsub.s32 0, %v7331_v12  ;;  %v1589_v16 = vsub.s32 1, %v7331_v12 }
 0x123   : > { %v1594_v17 = vrot.slane %v1581_v14, %v1593_v13  ;;  %v7340_v18 = vrot.slane %v1581_v14, %v1585_v15  ;;  %v7344_v21 = vrot.slane %v1581_v14, %v1589_v16  ;;  %v7359_v14 = vld [vmem:[#allocation10 + $0xa00] sm:$0xff] }
 0x124   : > { %5464 = vmatpush1.bf16.msra.mxu1 %v5463_v28  ;;  %5560 = vmatpush1.bf16.msra.mxu0 %v5559_v31 }
 0x125   : > { %5466 = vmatprep.subr.bf16.mxu1 %v5465_v35  ;;  %5562 = vmatprep.subr.bf16.mxu0 %v5561_v39 }
 0x128   : > { %5468 = vmatpush1.bf16.msra.mxu1 %v5467_v40  ;;  %5564 = vmatpush1.bf16.msra.mxu0 %v5563_v43 }
 0x129   : > { %5470 = vmatprep.subr.bf16.mxu1 %v5469_v47  ;;  %5566 = vmatprep.subr.bf16.mxu0 %v5565_v51 }
 0x12c   : > { %5472 = vmatpush1.bf16.msra.mxu1 %v5471_v52  ;;  %5568 = vmatpush1.bf16.msra.mxu0 %v5567_v55 }
 0x12d   : > { %5474 = vmatprep.subr.bf16.mxu1 %v5473_v59  ;;  %5570 = vmatprep.subr.bf16.mxu0 %v5569_v61 }
 0x179   : > { %v502_v62 = vpop.f32.mrb[0].mxu1 }
 0x17a   : > { %v504_v63 = vpop.f32.mrb[1].mxu1 }
 0x17d   : > { %v508_v1 = vpop.f32.mrb[2].mxu1 }
 0x17e   : > { %v510_v2 = vpop.f32.mrb[3].mxu1 }
 0x181   : > { %v514_v3 = vpop.f32.mrb[4].mxu1 }
 0x182   : > { %v516_v4 = vpop.f32.mrb[5].mxu1 }
 0x185   : > { %v7319_v5 = vpop.f32.mrb[6].mxu1 }
 0x186   : > { %v7321_v6 = vpop.f32.mrb[7].mxu1 }
 0x189   : > { %v7323_v7 = vpop.f32.mrb[8].mxu1 }
 0x18a   : > { %v7325_v8 = vpop.f32.mrb[9].mxu1 }
 0x18d   : > { %v7327_v9 = vpop.f32.mrb[10].mxu1 }
 0x18e   : > { %v7329_v10 = vpop.f32.mrb[11].mxu1 }
 0x1c1   : > { %v1433_v19 = vpop.f32.mrb[0].mxu0  ;;  %v5362_v20 = vpop.f32.mrb[12].mxu1 }
 0x1c2   : > { %v6369_v22 = vadd.f32 %v1433_v19, %v502_v62  ;;  %v1603_v23 = vadd.f32 %v5362_v20, %v1594_v17  ;;  %v1435_v24 = vpop.f32.mrb[1].mxu0  ;;  %v1534_v25 = vpop.f32.mrb[13].mxu1  ;;  %v2466_v19 = vld [vmem:[#allocation10 + $0xa10] sm:$0xff] }
 0x1c3   : > { %v6370_v26 = vadd.f32 %v1435_v24, %v504_v63  ;;  %v1600_v27 = vadd.f32 %v1594_v17, %v1534_v25  ;;  %v2470_v24 = vld [vmem:[#allocation10 + $0xa30] sm:$0xff]  ;;  %v7362_v25 = vld [vmem:[#allocation10 + $0xa48] sm:$0xff] }
 0x1c4   : > { %v1598_v28 = vadd.f32 %v6369_v22, %v7340_v18  ;;  %v1621_v29 = vmax.f32 %v1603_v23, 0.0 }
 0x1c5   : > { %v1599_v30 = vadd.f32 %v6370_v26, %v7344_v21  ;;  %v1618_v31 = vmax.f32 %v1600_v27, 0.0  ;;  %v1439_v32 = vpop.f32.mrb[2].mxu0  ;;  %v5365_v33 = vpop.f32.mrb[14].mxu1 }
 0x1c6   : > { %v1616_v34 = vmax.f32 %v1598_v28, 0.0  ;;  %1639 = vst [vmem:[#allocation3 + $0x28] sm:$0xff] %v1621_v29  ;;  %v6371_v35 = vadd.f32 %v1439_v32, %v508_v1  ;;  %v1609_v36 = vadd.f32 %v5365_v33, %v1594_v17  ;;  %v1441_v37 = vpop.f32.mrb[3].mxu0  ;;  %v1544_v38 = vpop.f32.mrb[15].mxu1  ;;  %v2477_v29 = vld [vmem:[#allocation10 + $0xa68] sm:$0xff] }
 0x1c7   : > { %v7348_v39 = vmax.f32 %v1599_v30, 0.0  ;;  %1636 = vst [vmem:[#allocation3 + $0x10] sm:$0xff] %v1618_v31  ;;  %v6372_v40 = vadd.f32 %v1441_v37, %v510_v2  ;;  %v1606_v41 = vadd.f32 %v1594_v17, %v1544_v38 }
 0x1c8   : > { %1634 = vst [vmem:[#allocation3] sm:$0xff] %v1616_v34  ;;  %v1601_v42 = vadd.f32 %v6371_v35, %v7340_v18  ;;  %v1627_v43 = vmax.f32 %v1609_v36, 0.0  ;;  %v2479_v34 = vld [vmem:[#allocation10 + $0xa78] sm:$0xff] }
 0x1c9   : > { %1635 = vst [vmem:[#allocation3 + $0x8] sm:$0xff] %v7348_v39  ;;  %v1602_v44 = vadd.f32 %v6372_v40, %v7344_v21  ;;  %v1624_v45 = vmax.f32 %v1606_v41, 0.0  ;;  %v1445_v46 = vpop.f32.mrb[4].mxu0  ;;  %v5368_v47 = vpop.f32.mrb[16].mxu1  ;;  %v7368_v40 = vld [vmem:[#allocation10 + $0xa40] sm:$0xff] }
 0x1ca   : > { %v1619_v48 = vmax.f32 %v1601_v42, 0.0  ;;  %1645 = vst [vmem:[#allocation3 + $0x58] sm:$0xff] %v1627_v43  ;;  %v6373_v49 = vadd.f32 %v1445_v46, %v514_v3  ;;  %v1615_v50 = vadd.f32 %v5368_v47, %v1594_v17  ;;  %v1447_v51 = vpop.f32.mrb[5].mxu0  ;;  %v1554_v52 = vpop.f32.mrb[17].mxu1  ;;  %v7370_v41 = vld [vmem:[#allocation10 + $0xa60] sm:$0xff]  ;;  %v7372_v42 = vld [vmem:[#allocation10 + $0xa50] sm:$0xff] }
 0x1cb   : > { %v1620_v53 = vmax.f32 %v1602_v44, 0.0  ;;  %1642 = vst [vmem:[#allocation3 + $0x40] sm:$0xff] %v1624_v45  ;;  %v6374_v54 = vadd.f32 %v1447_v51, %v516_v4  ;;  %v1612_v55 = vadd.f32 %v1594_v17, %v1554_v52  ;;  %v2468_v17 = vld [vmem:[#allocation10 + $0xa20] sm:$0xff]  ;;  %v2478_v43 = vld [vmem:[#allocation10 + $0xa70] sm:$0xff] }
 0x1cc   : > { %1637 = vst [vmem:[#allocation3 + $0x18] sm:$0xff] %v1619_v48  ;;  %v1604_v56 = vadd.f32 %v6373_v49, %v7340_v18  ;;  %v1633_v57 = vmax.f32 %v1615_v50, 0.0  ;;  %v5475_v33 = vpack.c.bf16 %v2468_v17, %v7359_v14  ;;  %v5477_v49 = vpack.c.bf16 %v2477_v29, %v7362_v25  ;;  %v2481_v50 = vld [vmem:[#allocation10 + $0xa88] sm:$0xff]  ;;  %v2484_v14 = vld [vmem:[#allocation10 + $0xaa0] sm:$0xff]  ;;  %v2490_v29 = vld [vmem:[#allocation10 + $0xad0] sm:$0xff] }
 0x1cd   : > { %1638 = vst [vmem:[#allocation3 + $0x20] sm:$0xff] %v1620_v53  ;;  %v1605_v58 = vadd.f32 %v6374_v54, %v7344_v21  ;;  %v1630_v59 = vmax.f32 %v1612_v55, 0.0  ;;  %v1451_v60 = vpop.f32.mrb[6].mxu0  ;;  %v2493_v25 = vld [vmem:[#allocation10 + $0xae8] sm:$0xff] }
 0x1ce   : > { %v1622_v61 = vmax.f32 %v1604_v56, 0.0  ;;  %1651 = vst [vmem:[#allocation3 + $0x88] sm:$0xff] %v1633_v57  ;;  %v6375_v62 = vadd.f32 %v1451_v60, %v7319_v5  ;;  %v1453_v63 = vpop.f32.mrb[7].mxu0  ;;  %v2485_v57 = vld [vmem:[#allocation10 + $0xaa8] sm:$0xff] }
 0x1cf   : > { %v1623_v1 = vmax.f32 %v1605_v58, 0.0  ;;  %1648 = vst [vmem:[#allocation3 + $0x70] sm:$0xff] %v1630_v59  ;;  %v6376_v2 = vadd.f32 %v1453_v63, %v7321_v6  ;;  %v1719_v27 = vld [vmem:[#allocation3] sm:$0xfe] }
 0x1d0   : > { %1640 = vst [vmem:[#allocation3 + $0x30] sm:$0xff] %v1622_v61  ;;  %v1607_v3 = vadd.f32 %v6375_v62, %v7340_v18  ;;  %v1720_v23 = vld [vmem:[#allocation3 + $0x8] sm:$0xfe]  ;;  %v1732_v47 = vrot.slane %v1719_v27, 1  ;;  %v2483_v61 = vld [vmem:[#allocation10 + $0xa98] sm:$0xff] }
 0x1d1   : > { %1641 = vst [vmem:[#allocation3 + $0x38] sm:$0xff] %v1623_v1  ;;  %v1608_v4 = vadd.f32 %v6376_v2, %v7344_v21  ;;  %v1457_v11 = vpop.f32.mrb[8].mxu0  ;;  %v1735_v37 = vrot.slane %v1720_v23, 1  ;;  %v2487_v62 = vld [vmem:[#allocation10 + $0xab8] sm:$0xff]  ;;  %v2489_v23 = vld [vmem:[#allocation10 + $0xac8] sm:$0xff]  ;;  %v2488_v27 = vld [vmem:[#allocation10 + $0xac0] sm:$0xff] }
 0x1d2   : > { %v1625_v20 = vmax.f32 %v1607_v3, 0.0  ;;  %v6377_v22 = vadd.f32 %v1457_v11, %v7323_v7  ;;  %v1459_v5 = vpop.f32.mrb[9].mxu0  ;;  %v2475_v7 = vld [vmem:[#allocation10 + $0xa58] sm:$0xff]  ;;  %v5479_v3 = vpack.c.bf16 %v7370_v41, %v7368_v40  ;;  %v2480_v11 = vld [vmem:[#allocation10 + $0xa80] sm:$0xff] }
 0x1d3   : > { %v1626_v6 = vmax.f32 %v1608_v4, 0.0  ;;  %v6378_v26 = vadd.f32 %v1459_v5, %v7325_v8  ;;  %v1722_v28 = vld [vmem:[#allocation3 + $0x18] sm:$0x1]  ;;  %v5571_v8 = vpack.c.bf16 %v2470_v24, %v2466_v19  ;;  %v5573_v54 = vpack.c.bf16 %v2479_v34, %v2475_v7  ;;  %v1748_v55 = vld [vmem:[#allocation3 + $0x18] sm:$0xe0]  ;;  %v2497_v7 = vld [vmem:[#allocation10 + $0xb08] sm:$0xff] }
 0x1d4   : > { %1643 = vst [vmem:[#allocation3 + $0x48] sm:$0xff] %v1625_v20  ;;  %v1610_v30 = vadd.f32 %v6377_v22, %v7340_v18  ;;  %v1723_v31 = vld [vmem:[#allocation3 + $0x20] sm:$0x1]  ;;  %v1733_v32 = vrot.slane %v1722_v28, 1  ;;  %v1749_v48 = vld [vmem:[#allocation3 + $0x20] sm:$0xe0]  ;;  %v5575_v4 = vpack.c.bf16 %v2478_v43, %v7372_v42  ;;  %v5577_v20 = vpack.c.bf16 %v2487_v62, %v2483_v61 }
 0x1d5   : > { %1644 = vst [vmem:[#allocation3 + $0x50] sm:$0xff] %v1626_v6  ;;  %v1611_v35 = vadd.f32 %v6378_v26, %v7344_v21  ;;  %v1463_v36 = vpop.f32.mrb[10].mxu0  ;;  %v1736_v38 = vrot.slane %v1723_v31, 1  ;;  %v1764_v63 = vrot.slane %v1749_v48, 5  ;;  %v2482_v22 = vld [vmem:[#allocation10 + $0xa90] sm:$0xff]  ;;  %v2491_v6 = vld [vmem:[#allocation10 + $0xad8] sm:$0xff]  ;;  %v5485_v34 = vpack.c.bf16 %v2493_v25, %v2489_v23 }
 0x1d6   : > { %v1628_v44 = vmax.f32 %v1610_v30, 0.0  ;;  %v6379_v45 = vadd.f32 %v1463_v36, %v7327_v9  ;;  %v1465_v46 = vpop.f32.mrb[11].mxu0  ;;  %v1734_v9 = vsel %vm1731_vm2, %v1732_v47, %v1733_v32  ;;  %v2486_v5 = vld [vmem:[#allocation10 + $0xab0] sm:$0xff]  ;;  %v2495_v26 = vld [vmem:[#allocation10 + $0xaf8] sm:$0xff]  ;;  %v2492_v28 = vld [vmem:[#allocation10 + $0xae0] sm:$0xff]  ;;  %v5483_v30 = vpack.c.bf16 %v2484_v14, %v2480_v11 }
 0x1d7   : > { %v1629_v51 = vmax.f32 %v1611_v35, 0.0  ;;  %v6380_v52 = vadd.f32 %v1465_v46, %v7329_v10  ;;  %v1737_v53 = vsel %vm1731_vm2, %v1735_v37, %v1736_v38  ;;  %v1751_v56 = vld [vmem:[#allocation3 + $0x30] sm:$0x1f]  ;;  %v5579_v31 = vpack.c.bf16 %v2486_v5, %v2482_v22  ;;  %v2499_v41 = vld [vmem:[#allocation10 + $0xb18] sm:$0xff]  ;;  %v2500_v46 = vld [vmem:[#allocation10 + $0xb20] sm:$0xff] }
 0x1d8   : > { %1646 = vst [vmem:[#allocation3 + $0x60] sm:$0xff] %v1628_v44  ;;  %v1613_v58 = vadd.f32 %v6379_v45, %v7340_v18  ;;  %2592 = vmatprep.mubr.f32.mxu1 %v1737_v53  ;;  %2770 = vmatprep.mubr.f32.mxu0 %v1737_v53  ;;  %v1752_v59 = vld [vmem:[#allocation3 + $0x38] sm:$0x1f]  ;;  %v1762_v60 = vrot.slane %v1751_v56, 5  ;;  %v1761_v18 = vrot.slane %v1748_v55, 5  ;;  %v5581_v35 = vpack.c.bf16 %v2495_v26, %v2491_v6  ;;  %v2501_v38 = vld [vmem:[#allocation10 + $0xb28] sm:$0xff] }
 0x1d9   : > { %1647 = vst [vmem:[#allocation3 + $0x68] sm:$0xff] %v1629_v51  ;;  %v1614_v10 = vadd.f32 %v6380_v52, %v7344_v21  ;;  %2593 = vmatmul.mubr.f32.vlgmr.msra.gmra.mrb[18].mxu1 %v1734_v9  ;;  %2771 = vmatmul.mubr.f32.vlgmr.msra.gmra.mrb[12].mxu0 %v1734_v9  ;;  %v1765_v1 = vrot.slane %v1752_v59, 5  ;;  %v5481_v21 = vpack.c.bf16 %v2485_v57, %v2481_v50  ;;  %v2503_v42 = vld [vmem:[#allocation10 + $0xb38] sm:$0xff]  ;;  %v2496_v45 = vld [vmem:[#allocation10 + $0xb00] sm:$0xff]  ;;  %v2498_v47 = vld [vmem:[#allocation10 + $0xb10] sm:$0xff] }
 0x1da   : > { %v1631_v2 = vmax.f32 %v1613_v58, 0.0  ;;  %5476 = vmatpush1.bf16.msra.mxu1 %v5475_v33  ;;  %5572 = vmatpush1.bf16.msra.mxu0 %v5571_v8  ;;  %v1763_v24 = vsel %vm1760_vm3, %v1761_v18, %v1762_v60  ;;  %v2494_v33 = vld [vmem:[#allocation10 + $0xaf0] sm:$0xff]  ;;  %v2505_v53 = vld [vmem:[#allocation10 + $0xb48] sm:$0xff]  ;;  %v5489_v55 = vpack.c.bf16 %v2501_v38, %v2497_v7  ;;  %v5585_v56 = vpack.c.bf16 %v2503_v42, %v2499_v41  ;;  %v2507_v62 = vld [vmem:[#allocation10 + $0xb58] sm:$0xff] }
 0x1db   : > { %v1632_v17 = vmax.f32 %v1614_v10, 0.0  ;;  %v1766_v19 = vsel %vm1760_vm3, %v1764_v63, %v1765_v1  ;;  %5478 = vmatprep.subr.bf16.mxu1 %v5477_v49  ;;  %5574 = vmatprep.subr.bf16.mxu0 %v5573_v54  ;;  %v1776_v36 = vld [vmem:[#allocation3 + $0x48] sm:$0xfe]  ;;  %v5487_v49 = vpack.c.bf16 %v2492_v28, %v2488_v27  ;;  %v5583_v50 = vpack.c.bf16 %v2494_v33, %v2490_v29  ;;  %v2502_v52 = vld [vmem:[#allocation10 + $0xb30] sm:$0xff]  ;;  %v2511_v10 = vld [vmem:[#allocation10 + $0xb78] sm:$0xff] }
 0x1dc   : > { %1649 = vst [vmem:[#allocation3 + $0x78] sm:$0xff] %v1631_v2  ;;  %2598 = vmatprep.mubr.f32.mxu1 %v1766_v19  ;;  %2776 = vmatprep.mubr.f32.mxu0 %v1766_v19  ;;  %v1777_v32 = vld [vmem:[#allocation3 + $0x50] sm:$0xfe]  ;;  %v1788_v48 = vrot.slane %v1776_v36, 1  ;;  %v5491_v18 = vpack.c.bf16 %v2500_v46, %v2496_v45  ;;  %v2508_v11 = vld [vmem:[#allocation10 + $0xb60] sm:$0xff]  ;;  %v5589_v19 = vpack.c.bf16 %v2511_v10, %v2507_v62  ;;  %v2519_v25 = vld [vmem:[#allocation10 + $0xbb8] sm:$0xff] }
 0x1dd   : > { %1650 = vst [vmem:[#allocation3 + $0x80] sm:$0xff] %v1632_v17  ;;  %2599 = vmatmul.mubr.f32.gmra.mrb[20].mxu1 %v1763_v24  ;;  %2777 = vmatmul.mubr.f32.gmra.mrb[14].mxu0 %v1763_v24  ;;  %v1791_v43 = vrot.slane %v1777_v32, 1  ;;  %v2509_v9 = vld [vmem:[#allocation10 + $0xb68] sm:$0xff]  ;;  %v2515_v24 = vld [vmem:[#allocation10 + $0xb98] sm:$0xff]  ;;  %v2512_v27 = vld [vmem:[#allocation10 + $0xb80] sm:$0xff] }
 0x1de   : > { %5480 = vmatpush1.bf16.msra.mxu1 %v5479_v3  ;;  %5576 = vmatpush1.bf16.msra.mxu0 %v5575_v4  ;;  %v5587_v3 = vpack.c.bf16 %v2502_v52, %v2498_v47  ;;  %v2504_v4 = vld [vmem:[#allocation10 + $0xb40] sm:$0xff]  ;;  %v5493_v17 = vpack.c.bf16 %v2509_v9, %v2505_v53  ;;  %v2513_v22 = vld [vmem:[#allocation10 + $0xb88] sm:$0xff]  ;;  %v2518_v32 = vld [vmem:[#allocation10 + $0xbb0] sm:$0xff] }
 0x1df   : > { %5482 = vmatprep.subr.bf16.mxu1 %v5481_v21  ;;  %5578 = vmatprep.subr.bf16.mxu0 %v5577_v20  ;;  %v1779_v37 = vld [vmem:[#allocation3 + $0x60] sm:$0x1]  ;;  %v1803_v57 = vld [vmem:[#allocation3 + $0x60] sm:$0xe0]  ;;  %v2506_v21 = vld [vmem:[#allocation10 + $0xb50] sm:$0xff]  ;;  %v5495_v6 = vpack.c.bf16 %v2508_v11, %v2504_v4 }
 0x1e0   : > { %v1780_v8 = vld [vmem:[#allocation3 + $0x68] sm:$0x1]  ;;  %v1789_v40 = vrot.slane %v1779_v37, 1  ;;  %v1804_v51 = vld [vmem:[#allocation3 + $0x68] sm:$0xe0]  ;;  %v1815_v2 = vrot.slane %v1803_v57, 5 }
 0x1e1   : > { %v1792_v44 = vrot.slane %v1780_v8, 1  ;;  %v1818_v63 = vrot.slane %v1804_v51, 5  ;;  %v2510_v20 = vld [vmem:[#allocation10 + $0xb70] sm:$0xff]  ;;  %v2517_v23 = vld [vmem:[#allocation10 + $0xba8] sm:$0xff]  ;;  %v2516_v28 = vld [vmem:[#allocation10 + $0xba0] sm:$0xff] }
 0x1e2   : > { %5484 = vmatpush1.bf16.msra.mxu1 %v5483_v30  ;;  %5580 = vmatpush1.bf16.msra.mxu0 %v5579_v31  ;;  %v1790_v59 = vsel %vm1731_vm2, %v1788_v48, %v1789_v40  ;;  %v5591_v26 = vpack.c.bf16 %v2510_v20, %v2506_v21  ;;  %v5497_v29 = vpack.c.bf16 %v2517_v23, %v2513_v22  ;;  %v2514_v31 = vld [vmem:[#allocation10 + $0xb90] sm:$0xff]  ;;  %v2521_v33 = vld [vmem:[#allocation10 + $0xbc8] sm:$0xff]  ;;  %v2520_v38 = vld [vmem:[#allocation10 + $0xbc0] sm:$0xff] }
 0x1e3   : > { %v1793_v54 = vsel %vm1731_vm2, %v1791_v43, %v1792_v44  ;;  %5486 = vmatprep.subr.bf16.mxu1 %v5485_v34  ;;  %5582 = vmatprep.subr.bf16.mxu0 %v5581_v35  ;;  %v1806_v58 = vld [vmem:[#allocation3 + $0x78] sm:$0x1f]  ;;  %v5593_v30 = vpack.c.bf16 %v2519_v25, %v2515_v24  ;;  %v2525_v7 = vld [vmem:[#allocation10 + $0xbe8] sm:$0xff]  ;;  %v5499_v36 = vpack.c.bf16 %v2516_v28, %v2512_v27  ;;  %v2524_v8 = vld [vmem:[#allocation10 + $0xbe0] sm:$0xff] }
 0x1e4   : > { %2604 = vmatprep.mubr.f32.mxu1 %v1793_v54  ;;  %2782 = vmatprep.mubr.f32.mxu0 %v1793_v54  ;;  %v1807_v60 = vld [vmem:[#allocation3 + $0x80] sm:$0x1f]  ;;  %v1816_v61 = vrot.slane %v1806_v58, 5  ;;  %v5595_v37 = vpack.c.bf16 %v2518_v32, %v2514_v31  ;;  %v5501_v40 = vpack.c.bf16 %v2525_v7, %v2521_v33  ;;  %v2522_v42 = vld [vmem:[#allocation10 + $0xbd0] sm:$0xff]  ;;  %v2132_v44 = vld [vmem:[#allocation10 + $0x8] sm:$0xff] }
 0x1e5   : > { %2605 = vmatmul.mubr.f32.gmra.mrb[22].mxu1 %v1790_v59  ;;  %2783 = vmatmul.mubr.f32.gmra.mrb[16].mxu0 %v1790_v59  ;;  %v1819_v1 = vrot.slane %v1807_v60, 5  ;;  %v2523_v34 = vld [vmem:[#allocation10 + $0xbd8] sm:$0xff]  ;;  %v2526_v43 = vld [vmem:[#allocation10 + $0xbf0] sm:$0xff]  ;;  %v2136_v45 = vld [vmem:[#allocation10 + $0x28] sm:$0xff] }
 0x1e6   : > { %5488 = vmatpush1.bf16.msra.mxu1 %v5487_v49  ;;  %5584 = vmatpush1.bf16.msra.mxu0 %v5583_v50  ;;  %v1817_v5 = vsel %vm1760_vm3, %v1815_v2, %v1816_v61  ;;  %v2527_v35 = vld [vmem:[#allocation10 + $0xbf8] sm:$0xff]  ;;  %v1721_v48 = vld [vmem:[#allocation3 + $0x10] sm:$0xfe]  ;;  %v1724_v49 = vld [vmem:[#allocation3 + $0x28] sm:$0x1]  ;;  %v5503_v50 = vpack.c.bf16 %v2524_v8, %v2520_v38  ;;  %v5599_v51 = vpack.c.bf16 %v2526_v43, %v2522_v42 }
 0x1e7   : > { %v1820_v14 = vsel %vm1760_vm3, %v1818_v63, %v1819_v1  ;;  %5490 = vmatprep.subr.bf16.mxu1 %v5489_v55  ;;  %5586 = vmatprep.subr.bf16.mxu0 %v5585_v56  ;;  %v5597_v41 = vpack.c.bf16 %v2527_v35, %v2523_v34  ;;  %v2134_v46 = vld [vmem:[#allocation10 + $0x18] sm:$0xff]  ;;  %v2131_v52 = vld [vmem:[#allocation10] sm:$0xff]  ;;  %v5601_v53 = vpack.c.bf16 %v2136_v45, %v2132_v44  ;;  %v2133_v56 = vld [vmem:[#allocation10 + $0x10] sm:$0xff]  ;;  %v1738_v58 = vrot.slane %v1721_v48, 1 }
 0x1e8   : > { %2610 = vmatprep.mubr.f32.mxu1 %v1820_v14  ;;  %2788 = vmatprep.mubr.f32.mxu0 %v1820_v14  ;;  %v2138_v47 = vld [vmem:[#allocation10 + $0x38] sm:$0xff]  ;;  %v2135_v55 = vld [vmem:[#allocation10 + $0x20] sm:$0xff]  ;;  %v2137_v57 = vld [vmem:[#allocation10 + $0x30] sm:$0xff]  ;;  %v1739_v9 = vrot.slane %v1724_v49, 1 }
 0x1e9   : > { %2611 = vmatmul.mubr.f32.gmra.mrb[24].mxu1 %v1817_v5  ;;  %2789 = vmatmul.mubr.f32.gmra.mrb[18].mxu0 %v1817_v5  ;;  %v5697_v54 = vpack.c.bf16 %v2138_v47, %v2134_v46  ;;  %v2140_v59 = vld [vmem:[#allocation10 + $0x48] sm:$0xff]  ;;  %v1753_v61 = vld [vmem:[#allocation3 + $0x40] sm:$0x1f]  ;;  %v5603_v63 = vpack.c.bf16 %v2135_v55, %v2131_v52  ;;  %v5699_v1 = vpack.c.bf16 %v2137_v57, %v2133_v56  ;;  %v2141_v4 = vld [vmem:[#allocation10 + $0x50] sm:$0xff] }
 0x1ea   : > { %5492 = vmatpush1.bf16.msra.mxu1 %v5491_v18  ;;  %5588 = vmatpush1.bf16.msra.mxu0 %v5587_v3  ;;  %v2144_v60 = vld [vmem:[#allocation10 + $0x68] sm:$0xff]  ;;  %v2142_v62 = vld [vmem:[#allocation10 + $0x58] sm:$0xff]  ;;  %v2139_v2 = vld [vmem:[#allocation10 + $0x40] sm:$0xff]  ;;  %v1740_v14 = vsel %vm1731_vm2, %v1738_v58, %v1739_v9 }
 0x1eb   : > { %5494 = vmatprep.subr.bf16.mxu1 %v5493_v17  ;;  %5590 = vmatprep.subr.bf16.mxu0 %v5589_v19  ;;  %v2146_v10 = vld [vmem:[#allocation10 + $0x78] sm:$0xff]  ;;  %v2143_v18 = vld [vmem:[#allocation10 + $0x60] sm:$0xff]  ;;  %v1750_v3 = vld [vmem:[#allocation3 + $0x28] sm:$0xe0]  ;;  %v1768_v17 = vrot.slane %v1753_v61, 5  ;;  %v5605_v19 = vpack.c.bf16 %v2144_v60, %v2140_v59 }
 0x1ec   : > { %2681 = vmatprep.mubr.f32.mxu1 %v6869_v0  ;;  %2859 = vmatprep.mubr.f32.mxu0 %v6869_v0  ;;  %v2145_v11 = vld [vmem:[#allocation10 + $0x70] sm:$0xff]  ;;  %v5701_v21 = vpack.c.bf16 %v2146_v10, %v2142_v62  ;;  %v2148_v20 = vld [vmem:[#allocation10 + $0x88] sm:$0xff]  ;;  %v2150_v23 = vld [vmem:[#allocation10 + $0x98] sm:$0xff]  ;;  %v1767_v25 = vrot.slane %v1750_v3, 5 }
 0x1ed   : > { %v2152_v22 = vld [vmem:[#allocation10 + $0xa8] sm:$0xff]  ;;  %v2154_v24 = vld [vmem:[#allocation10 + $0xb8] sm:$0xff]  ;;  %v2147_v27 = vld [vmem:[#allocation10 + $0x80] sm:$0xff] }
 0x1ee   : > { %5496 = vmatpush1.bf16.msra.mxu1 %v5495_v6  ;;  %5592 = vmatpush1.bf16.msra.mxu0 %v5591_v26  ;;  %v1781_v5 = vld [vmem:[#allocation3 + $0x70] sm:$0x1]  ;;  %v5607_v6 = vpack.c.bf16 %v2143_v18, %v2139_v2  ;;  %v5703_v26 = vpack.c.bf16 %v2145_v11, %v2141_v4  ;;  %v2151_v28 = vld [vmem:[#allocation10 + $0xa0] sm:$0xff]  ;;  %v2153_v31 = vld [vmem:[#allocation10 + $0xb0] sm:$0xff]  ;;  %v1769_v32 = vsel %vm1760_vm3, %v1767_v25, %v1768_v17 }
 0x1ef   : > { %5498 = vmatprep.subr.bf16.mxu1 %v5497_v29  ;;  %5594 = vmatprep.subr.bf16.mxu0 %v5593_v30  ;;  %v1778_v29 = vld [vmem:[#allocation3 + $0x58] sm:$0xfe]  ;;  %v1795_v33 = vrot.slane %v1781_v5, 1  ;;  %v5609_v7 = vpack.c.bf16 %v2152_v22, %v2148_v20  ;;  %v5705_v34 = vpack.c.bf16 %v2154_v24, %v2150_v23  ;;  %v2156_v35 = vld [vmem:[#allocation10 + $0xc8] sm:$0xff]  ;;  %v1805_v38 = vld [vmem:[#allocation3 + $0x70] sm:$0xe0]  ;;  %v5611_v42 = vpack.c.bf16 %v2151_v28, %v2147_v27 }
 0x1f0   : > { %v2149_v30 = vld [vmem:[#allocation10 + $0x90] sm:$0xff]  ;;  %v1808_v8 = vld [vmem:[#allocation3 + $0x88] sm:$0x1f]  ;;  %v1821_v48 = vrot.slane %v1805_v38, 5  ;;  %v2166_v55 = vld [vmem:[#allocation10 + $0x118] sm:$0xff] }
 0x1f1   : > { %v5707_v43 = vpack.c.bf16 %v2153_v31, %v2149_v30  ;;  %v2155_v45 = vld [vmem:[#allocation10 + $0xc0] sm:$0xff]  ;;  %v1822_v49 = vrot.slane %v1808_v8, 5  ;;  %v2161_v52 = vld [vmem:[#allocation10 + $0xf0] sm:$0xff]  ;;  %v2170_v56 = vld [vmem:[#allocation10 + $0x138] sm:$0xff] }
 0x1f2   : > { %5500 = vmatpush1.bf16.msra.mxu1 %v5499_v36  ;;  %5596 = vmatpush1.bf16.msra.mxu0 %v5595_v37  ;;  %v2160_v36 = vld [vmem:[#allocation10 + $0xe8] sm:$0xff]  ;;  %v2158_v37 = vld [vmem:[#allocation10 + $0xd8] sm:$0xff]  ;;  %v2159_v46 = vld [vmem:[#allocation10 + $0xe0] sm:$0xff]  ;;  %v5713_v10 = vpack.c.bf16 %v2170_v56, %v2166_v55 }
 0x1f3   : > { %5502 = vmatprep.subr.bf16.mxu1 %v5501_v40  ;;  %5598 = vmatprep.subr.bf16.mxu0 %v5597_v41  ;;  %v2162_v40 = vld [vmem:[#allocation10 + $0xf8] sm:$0xff]  ;;  %v1794_v41 = vrot.slane %v1778_v29, 1  ;;  %v5613_v44 = vpack.c.bf16 %v2160_v36, %v2156_v35  ;;  %v5615_v57 = vpack.c.bf16 %v2159_v46, %v2155_v45  ;;  %v2163_v9 = vld [vmem:[#allocation10 + $0x100] sm:$0xff]  ;;  %v2165_v60 = vld [vmem:[#allocation10 + $0x110] sm:$0xff]  ;;  %v1823_v61 = vsel %vm1760_vm3, %v1821_v48, %v1822_v49 }
 0x1f4   : > { %v2167_v59 = vld [vmem:[#allocation10 + $0x120] sm:$0xff]  ;;  %v2176_v2 = vld [vmem:[#allocation10 + $0x168] sm:$0xff]  ;;  %v2174_v18 = vld [vmem:[#allocation10 + $0x158] sm:$0xff] }
 0x1f5   : > { %v1796_v47 = vsel %vm1731_vm2, %v1794_v41, %v1795_v33  ;;  %v2178_v3 = vld [vmem:[#allocation10 + $0x178] sm:$0xff]  ;;  %v5619_v4 = vpack.c.bf16 %v2167_v59, %v2163_v9  ;;  %v2171_v17 = vld [vmem:[#allocation10 + $0x140] sm:$0xff]  ;;  %v2177_v22 = vld [vmem:[#allocation10 + $0x170] sm:$0xff] }
 0x1f6   : > { %5504 = vmatpush1.bf16.msra.mxu1 %v5503_v50  ;;  %5600 = vmatpush1.bf16.msra.mxu0 %v5599_v51  ;;  %v5709_v50 = vpack.c.bf16 %v2162_v40, %v2158_v37  ;;  %v2157_v51 = vld [vmem:[#allocation10 + $0xd0] sm:$0xff]  ;;  %v5717_v20 = vpack.c.bf16 %v2178_v3, %v2174_v18  ;;  %v2180_v5 = vld [vmem:[#allocation10 + $0x188] sm:$0xff]  ;;  %v2182_v24 = vld [vmem:[#allocation10 + $0x198] sm:$0xff] }
 0x1f7   : > { %5602 = vmatprep.subr.bf16.mxu1 %v5601_v53  ;;  %5698 = vmatprep.subr.bf16.mxu0 %v5697_v54  ;;  %v2164_v53 = vld [vmem:[#allocation10 + $0x108] sm:$0xff]  ;;  %v5711_v58 = vpack.c.bf16 %v2161_v52, %v2157_v51  ;;  %v2186_v25 = vld [vmem:[#allocation10 + $0x1b8] sm:$0xff]  ;;  %v2183_v28 = vld [vmem:[#allocation10 + $0x1a0] sm:$0xff] }
 0x1f8   : > { %v2168_v54 = vld [vmem:[#allocation10 + $0x128] sm:$0xff]  ;;  %v2181_v29 = vld [vmem:[#allocation10 + $0x190] sm:$0xff]  ;;  %v5721_v30 = vpack.c.bf16 %v2186_v25, %v2182_v24  ;;  %v2187_v38 = vld [vmem:[#allocation10 + $0x1c0] sm:$0xff] }
 0x1f9   : > { %2682 = vmatmul.mubr.f32.vlgmr.msra.gmra.mrb[18].mxu1 %v1740_v14  ;;  %2860 = vmatmul.mubr.f32.vlgmr.msra.gmra.mrb[12].mxu0 %v1740_v14  ;;  %v5617_v62 = vpack.c.bf16 %v2168_v54, %v2164_v53  ;;  %v2184_v23 = vld [vmem:[#allocation10 + $0x1a8] sm:$0xff]  ;;  %v2185_v31 = vld [vmem:[#allocation10 + $0x1b0] sm:$0xff]  ;;  %v2191_v8 = vld [vmem:[#allocation10 + $0x1e0] sm:$0xff] }
 0x1fa   : > { %5604 = vmatpush1.bf16.msra.mxu1 %v5603_v63  ;;  %5700 = vmatpush1.bf16.msra.mxu0 %v5699_v1  ;;  %v2169_v63 = vld [vmem:[#allocation10 + $0x130] sm:$0xff]  ;;  %v2172_v1 = vld [vmem:[#allocation10 + $0x148] sm:$0xff]  ;;  %v5625_v27 = vpack.c.bf16 %v2184_v23, %v2180_v5  ;;  %v5723_v36 = vpack.c.bf16 %v2185_v31, %v2181_v29  ;;  %v2198_v45 = vld [vmem:[#allocation10 + $0x218] sm:$0xff] }
 0x1fb   : > { %2687 = vmatprep.mubr.f32.mxu1 %v6869_v0  ;;  %2865 = vmatprep.mubr.f32.mxu0 %v6869_v0  ;;  %v5715_v11 = vpack.c.bf16 %v2169_v63, %v2165_v60  ;;  %v5621_v14 = vpack.c.bf16 %v2176_v2, %v2172_v1  ;;  %v2192_v33 = vld [vmem:[#allocation10 + $0x1e8] sm:$0xff]  ;;  %v2189_v40 = vld [vmem:[#allocation10 + $0x1d0] sm:$0xff]  ;;  %v2202_v46 = vld [vmem:[#allocation10 + $0x238] sm:$0xff] }
 0x1fc   : > { %5606 = vmatprep.subr.bf16.mxu1 %v5605_v19  ;;  %5702 = vmatprep.subr.bf16.mxu0 %v5701_v21  ;;  %v2175_v19 = vld [vmem:[#allocation10 + $0x160] sm:$0xff]  ;;  %v2173_v21 = vld [vmem:[#allocation10 + $0x150] sm:$0xff]  ;;  %v5729_v53 = vpack.c.bf16 %v2202_v46, %v2198_v45  ;;  %v2204_v55 = vld [vmem:[#allocation10 + $0x248] sm:$0xff] }
 0x1fd   : > { %2688 = vmatmul.mubr.f32.gmra.mrb[20].mxu1 %v1769_v32  ;;  %2866 = vmatmul.mubr.f32.gmra.mrb[14].mxu0 %v1769_v32  ;;  %v2188_v32 = vld [vmem:[#allocation10 + $0x1c8] sm:$0xff]  ;;  %v2199_v51 = vld [vmem:[#allocation10 + $0x220] sm:$0xff]  ;;  %v2197_v52 = vld [vmem:[#allocation10 + $0x210] sm:$0xff] }
 0x1fe   : > { %5608 = vmatpush1.bf16.msra.mxu1 %v5607_v6  ;;  %5704 = vmatpush1.bf16.msra.mxu0 %v5703_v26  ;;  %v5623_v6 = vpack.c.bf16 %v2175_v19, %v2171_v17  ;;  %v5719_v26 = vpack.c.bf16 %v2177_v22, %v2173_v21  ;;  %v5629_v37 = vpack.c.bf16 %v2192_v33, %v2188_v32  ;;  %v2201_v54 = vld [vmem:[#allocation10 + $0x230] sm:$0xff]  ;;  %v2208_v56 = vld [vmem:[#allocation10 + $0x268] sm:$0xff]  ;;  %v2214_v3 = vld [vmem:[#allocation10 + $0x298] sm:$0xff] }
 0x1ff   : > { %2693 = vmatprep.mubr.f32.mxu1 %v6869_v0  ;;  %2871 = vmatprep.mubr.f32.mxu0 %v6869_v0  ;;  %v5731_v59 = vpack.c.bf16 %v2201_v54, %v2197_v52  ;;  %v5637_v60 = vpack.c.bf16 %v2208_v56, %v2204_v55  ;;  %v2209_v1 = vld [vmem:[#allocation10 + $0x270] sm:$0xff]  ;;  %v2212_v2 = vld [vmem:[#allocation10 + $0x288] sm:$0xff]  ;;  %v2211_v19 = vld [vmem:[#allocation10 + $0x280] sm:$0xff] }
 0x200   : > { %5610 = vmatprep.subr.bf16.mxu1 %v5609_v7  ;;  %5706 = vmatprep.subr.bf16.mxu0 %v5705_v34  ;;  %v2190_v7 = vld [vmem:[#allocation10 + $0x1d8] sm:$0xff]  ;;  %v2216_v18 = vld [vmem:[#allocation10 + $0x2a8] sm:$0xff]  ;;  %v2215_v21 = vld [vmem:[#allocation10 + $0x2a0] sm:$0xff] }
 0x201   : > { %2694 = vmatmul.mubr.f32.gmra.mrb[22].mxu1 %v1796_v47  ;;  %2872 = vmatmul.mubr.f32.gmra.mrb[16].mxu0 %v1796_v47  ;;  %v2194_v34 = vld [vmem:[#allocation10 + $0x1f8] sm:$0xff]  ;;  %v5631_v47 = vpack.c.bf16 %v2191_v8, %v2187_v38  ;;  %v5641_v17 = vpack.c.bf16 %v2216_v18, %v2212_v2  ;;  %v2217_v5 = vld [vmem:[#allocation10 + $0x2b0] sm:$0xff]  ;;  %v2220_v23 = vld [vmem:[#allocation10 + $0x2c8] sm:$0xff] }
 0x202   : > { %5612 = vmatpush1.bf16.msra.mxu1 %v5611_v42  ;;  %5708 = vmatpush1.bf16.msra.mxu0 %v5707_v43  ;;  %v5725_v41 = vpack.c.bf16 %v2194_v34, %v2190_v7  ;;  %v2193_v42 = vld [vmem:[#allocation10 + $0x1f0] sm:$0xff]  ;;  %v2196_v43 = vld [vmem:[#allocation10 + $0x208] sm:$0xff]  ;;  %v2222_v25 = vld [vmem:[#allocation10 + $0x2d8] sm:$0xff] }
 0x203   : > { %2699 = vmatprep.mubr.f32.mxu1 %v6869_v0  ;;  %2877 = vmatprep.mubr.f32.mxu0 %v6869_v0  ;;  %v5727_v48 = vpack.c.bf16 %v2193_v42, %v2189_v40  ;;  %v2224_v24 = vld [vmem:[#allocation10 + $0x2e8] sm:$0xff]  ;;  %v2223_v29 = vld [vmem:[#allocation10 + $0x2e0] sm:$0xff]  ;;  %v2225_v32 = vld [vmem:[#allocation10 + $0x2f0] sm:$0xff] }
 0x204   : > { %5614 = vmatprep.subr.bf16.mxu1 %v5613_v44  ;;  %5710 = vmatprep.subr.bf16.mxu0 %v5709_v50  ;;  %v2200_v44 = vld [vmem:[#allocation10 + $0x228] sm:$0xff]  ;;  %v2195_v50 = vld [vmem:[#allocation10 + $0x200] sm:$0xff]  ;;  %v2230_v34 = vld [vmem:[#allocation10 + $0x318] sm:$0xff] }
 0x205   : > { %2700 = vmatmul.mubr.f32.gmra.mrb[24].mxu1 %v1823_v61  ;;  %2878 = vmatmul.mubr.f32.gmra.mrb[18].mxu0 %v1823_v61  ;;  %v5633_v49 = vpack.c.bf16 %v2200_v44, %v2196_v43  ;;  %v5635_v9 = vpack.c.bf16 %v2199_v51, %v2195_v50  ;;  %v2203_v61 = vld [vmem:[#allocation10 + $0x240] sm:$0xff]  ;;  %v2228_v33 = vld [vmem:[#allocation10 + $0x308] sm:$0xff]  ;;  %v2233_v43 = vld [vmem:[#allocation10 + $0x330] sm:$0xff] }
 0x206   : > { %5616 = vmatpush1.bf16.msra.mxu1 %v5615_v57  ;;  %2948 = vmatprep.mubr.f32.mxu1 %v7348_v39  ;;  %v2206_v57 = vld [vmem:[#allocation10 + $0x258] sm:$0xff]  ;;  %v2232_v7 = vld [vmem:[#allocation10 + $0x328] sm:$0xff]  ;;  %v2227_v8 = vld [vmem:[#allocation10 + $0x300] sm:$0xff] }
 0x207   : > { %5712 = vmatpush1.bf16.msra.mxu0 %v5711_v58  ;;  %3126 = vmatprep.mubr.f32.mxu0 %v7348_v39  ;;  %v2179_v39 = vld [vmem:[#allocation10 + $0x180] sm:$0xff]  ;;  %v2210_v58 = vld [vmem:[#allocation10 + $0x278] sm:$0xff]  ;;  %v5649_v38 = vpack.c.bf16 %v2232_v7, %v2228_v33  ;;  %v2236_v44 = vld [vmem:[#allocation10 + $0x348] sm:$0xff] }
 0x208   : > { %5618 = vmatprep.subr.bf16.mxu1 %v5617_v62  ;;  %5714 = vmatprep.subr.bf16.mxu0 %v5713_v10  ;;  %v5627_v35 = vpack.c.bf16 %v2183_v28, %v2179_v39  ;;  %v2207_v62 = vld [vmem:[#allocation10 + $0x260] sm:$0xff]  ;;  %v2205_v10 = vld [vmem:[#allocation10 + $0x250] sm:$0xff]  ;;  %v5733_v63 = vpack.c.bf16 %v2210_v58, %v2206_v57  ;;  %v5645_v39 = vpack.c.bf16 %v2224_v24, %v2220_v23  ;;  %v2240_v45 = vld [vmem:[#allocation10 + $0x368] sm:$0xff] }
 0x209   : > { %v2219_v28 = vld [vmem:[#allocation10 + $0x2c0] sm:$0xff]  ;;  %v2238_v46 = vld [vmem:[#allocation10 + $0x358] sm:$0xff]  ;;  %v5653_v50 = vpack.c.bf16 %v2240_v45, %v2236_v44  ;;  %v2241_v55 = vld [vmem:[#allocation10 + $0x370] sm:$0xff] }
 0x20a   : > { %5620 = vmatpush1.bf16.msra.mxu1 %v5619_v4  ;;  %v2218_v4 = vld [vmem:[#allocation10 + $0x2b8] sm:$0xff]  ;;  %v2231_v40 = vld [vmem:[#allocation10 + $0x320] sm:$0xff]  ;;  %v2244_v56 = vld [vmem:[#allocation10 + $0x388] sm:$0xff] }
 0x20b   : > { %5716 = vmatpush1.bf16.msra.mxu0 %v5715_v11  ;;  %5622 = vmatprep.subr.bf16.mxu1 %v5621_v14  ;;  %v5639_v11 = vpack.c.bf16 %v2207_v62, %v2203_v61  ;;  %v5735_v14 = vpack.c.bf16 %v2209_v1, %v2205_v10  ;;  %v5737_v22 = vpack.c.bf16 %v2218_v4, %v2214_v3  ;;  %v2235_v51 = vld [vmem:[#allocation10 + $0x340] sm:$0xff]  ;;  %v2248_v57 = vld [vmem:[#allocation10 + $0x3a8] sm:$0xff]  ;;  %v2246_v58 = vld [vmem:[#allocation10 + $0x398] sm:$0xff] }
 0x20c   : > { %5718 = vmatprep.subr.bf16.mxu0 %v5717_v20  ;;  %v2213_v20 = vld [vmem:[#allocation10 + $0x290] sm:$0xff]  ;;  %v2239_v52 = vld [vmem:[#allocation10 + $0x360] sm:$0xff]  ;;  %v5657_v61 = vpack.c.bf16 %v2248_v57, %v2244_v56  ;;  %v2252_v18 = vld [vmem:[#allocation10 + $0x3c8] sm:$0xff] }
 0x20d   : > { %v2243_v62 = vld [vmem:[#allocation10 + $0x380] sm:$0xff]  ;;  %v2249_v2 = vld [vmem:[#allocation10 + $0x3b0] sm:$0xff]  ;;  %v2256_v3 = vld [vmem:[#allocation10 + $0x3e8] sm:$0xff] }
 0x20e   : > { %5624 = vmatpush1.bf16.msra.mxu1 %v5623_v6  ;;  %v2226_v6 = vld [vmem:[#allocation10 + $0x2f8] sm:$0xff]  ;;  %v2247_v10 = vld [vmem:[#allocation10 + $0x3a0] sm:$0xff]  ;;  %v2257_v23 = vld [vmem:[#allocation10 + $0x3f0] sm:$0xff] }
 0x20f   : > { %5720 = vmatpush1.bf16.msra.mxu0 %v5719_v26  ;;  %5626 = vmatprep.subr.bf16.mxu1 %v5625_v27  ;;  %v5643_v26 = vpack.c.bf16 %v2215_v21, %v2211_v19  ;;  %v5739_v27 = vpack.c.bf16 %v2217_v5, %v2213_v20  ;;  %v5741_v31 = vpack.c.bf16 %v2226_v6, %v2222_v25  ;;  %v2254_v4 = vld [vmem:[#allocation10 + $0x3d8] sm:$0xff]  ;;  %v2251_v21 = vld [vmem:[#allocation10 + $0x3c0] sm:$0xff]  ;;  %v2260_v24 = vld [vmem:[#allocation10 + $0x408] sm:$0xff] }
 0x210   : > { %5722 = vmatprep.subr.bf16.mxu0 %v5721_v30  ;;  %v2221_v30 = vld [vmem:[#allocation10 + $0x2d0] sm:$0xff]  ;;  %v5661_v19 = vpack.c.bf16 %v2256_v3, %v2252_v18  ;;  %v2255_v20 = vld [vmem:[#allocation10 + $0x3e0] sm:$0xff]  ;;  %v2264_v25 = vld [vmem:[#allocation10 + $0x428] sm:$0xff] }
 0x211   : > { %v2262_v6 = vld [vmem:[#allocation10 + $0x418] sm:$0xff]  ;;  %v1659_v33 = vld [vmem:[#allocation3 + $0x20] sm:$0xf0]  ;;  %v2261_v7 = vld [vmem:[#allocation10 + $0x410] sm:$0xff] }
 0x212   : > { %5628 = vmatpush1.bf16.msra.mxu1 %v5627_v35  ;;  %v2234_v35 = vld [vmem:[#allocation10 + $0x338] sm:$0xff]  ;;  %v2267_v44 = vld [vmem:[#allocation10 + $0x440] sm:$0xff]  ;;  %v2281_v18 = vld [vmem:[#allocation10 + $0x4b0] sm:$0xff] }
 0x213   : > { %5724 = vmatpush1.bf16.msra.mxu0 %v5723_v36  ;;  %5630 = vmatprep.subr.bf16.mxu1 %v5629_v37  ;;  %v5647_v36 = vpack.c.bf16 %v2223_v29, %v2219_v28  ;;  %v5743_v37 = vpack.c.bf16 %v2225_v32, %v2221_v30  ;;  %v5745_v42 = vpack.c.bf16 %v2234_v35, %v2230_v34  ;;  %v2259_v30 = vld [vmem:[#allocation10 + $0x400] sm:$0xff]  ;;  %v2265_v34 = vld [vmem:[#allocation10 + $0x430] sm:$0xff]  ;;  %v2278_v57 = vld [vmem:[#allocation10 + $0x498] sm:$0xff] }
 0x214   : > { %5726 = vmatprep.subr.bf16.mxu0 %v5725_v41  ;;  %v2229_v41 = vld [vmem:[#allocation10 + $0x310] sm:$0xff]  ;;  %v5665_v29 = vpack.c.bf16 %v2264_v25, %v2260_v24  ;;  %v1652_v45 = vld [vmem:[#allocation3] sm:$0xff]  ;;  %v2284_v3 = vld [vmem:[#allocation10 + $0x4c8] sm:$0xff] }
 0x215   : > { %v2283_v24 = vld [vmem:[#allocation10 + $0x4c0] sm:$0xff] }
 0x216   : > { %5632 = vmatpush1.bf16.msra.mxu1 %v5631_v47  ;;  %v2242_v47 = vld [vmem:[#allocation10 + $0x378] sm:$0xff]  ;;  %v1686_v25 = vld [vmem:[#allocation3 + $0x48] sm:$0xff] }
 0x217   : > { %5728 = vmatpush1.bf16.msra.mxu0 %v5727_v48  ;;  %5634 = vmatprep.subr.bf16.mxu1 %v5633_v49  ;;  %v5651_v48 = vpack.c.bf16 %v2231_v40, %v2227_v8  ;;  %v5747_v49 = vpack.c.bf16 %v2233_v43, %v2229_v41  ;;  %v5749_v54 = vpack.c.bf16 %v2242_v47, %v2238_v46  ;;  %v2270_v8 = vld [vmem:[#allocation10 + $0x458] sm:$0xff]  ;;  %v1674_v41 = vrot.slane %v1659_v33, 4  ;;  %v2296_v33 = vld [vmem:[#allocation10 + $0x528] sm:$0xff] }
 0x218   : > { %5730 = vmatprep.subr.bf16.mxu0 %v5729_v53  ;;  %v2237_v53 = vld [vmem:[#allocation10 + $0x350] sm:$0xff]  ;;  %v2274_v40 = vld [vmem:[#allocation10 + $0x478] sm:$0xff]  ;;  %v5763_v46 = vpack.c.bf16 %v2265_v34, %v2261_v7 }
 0x219   : > { %v1658_v43 = vld [vmem:[#allocation3 + $0x18] sm:$0xf0] }
 0x21a   : > { %5636 = vmatpush1.bf16.msra.mxu1 %v5635_v9  ;;  %v2250_v9 = vld [vmem:[#allocation10 + $0x3b8] sm:$0xff]  ;;  %v1671_v56 = vrot.slane %v1658_v43, 4 }
 0x21b   : > { %5732 = vmatpush1.bf16.msra.mxu0 %v5731_v59  ;;  %5638 = vmatprep.subr.bf16.mxu1 %v5637_v60  ;;  %v5655_v59 = vpack.c.bf16 %v2239_v52, %v2235_v51  ;;  %v5751_v60 = vpack.c.bf16 %v2241_v55, %v2237_v53  ;;  %v5753_v1 = vpack.c.bf16 %v2250_v9, %v2246_v58  ;;  %v2273_v53 = vld [vmem:[#allocation10 + $0x470] sm:$0xff]  ;;  %v2280_v55 = vld [vmem:[#allocation10 + $0x4a8] sm:$0xff]  ;;  %v2282_v58 = vld [vmem:[#allocation10 + $0x4b8] sm:$0xff] }
 0x21c   : > { %5734 = vmatprep.subr.bf16.mxu0 %v5733_v63  ;;  %v2245_v63 = vld [vmem:[#allocation10 + $0x390] sm:$0xff]  ;;  %v5765_v52 = vpack.c.bf16 %v2274_v40, %v2270_v8  ;;  %v1696_v9 = vld [vmem:[#allocation3 + $0x80] sm:$0xf]  ;;  %v2291_v40 = vld [vmem:[#allocation10 + $0x500] sm:$0xff] }
 0x21d   : > { %v2294_v34 = vld [vmem:[#allocation10 + $0x518] sm:$0xff] }
 0x21e   : > { %5640 = vmatpush1.bf16.msra.mxu1 %v5639_v11  ;;  %v2258_v11 = vld [vmem:[#allocation10 + $0x3f8] sm:$0xff] }
 0x21f   : > { %5736 = vmatpush1.bf16.msra.mxu0 %v5735_v14  ;;  %5642 = vmatprep.subr.bf16.mxu1 %v5641_v17  ;;  %v5659_v14 = vpack.c.bf16 %v2247_v10, %v2243_v62  ;;  %v5755_v17 = vpack.c.bf16 %v2249_v2, %v2245_v63  ;;  %v5757_v5 = vpack.c.bf16 %v2258_v11, %v2254_v4  ;;  %v2277_v62 = vld [vmem:[#allocation10 + $0x490] sm:$0xff]  ;;  %v1693_v2 = vld [vmem:[#allocation3 + $0x68] sm:$0xf0] }
 0x220   : > { %5738 = vmatprep.subr.bf16.mxu0 %v5737_v22  ;;  %v2253_v22 = vld [vmem:[#allocation10 + $0x3d0] sm:$0xff]  ;;  %v5769_v11 = vpack.c.bf16 %v2282_v58, %v2278_v57  ;;  %v2308_v57 = vld [vmem:[#allocation10 + $0x588] sm:$0xff] }
 0x221   : > { %v5759_v28 = vpack.c.bf16 %v2257_v23, %v2253_v22  ;;  %v1687_v4 = vld [vmem:[#allocation3 + $0x50] sm:$0xff]  ;;  %v1707_v22 = vrot.slane %v1693_v2, 4  ;;  %v1692_v23 = vld [vmem:[#allocation3 + $0x60] sm:$0xf0] }
 0x222   : > { %5644 = vmatpush1.bf16.msra.mxu1 %v5643_v26  ;;  %v2266_v26 = vld [vmem:[#allocation10 + $0x438] sm:$0xff]  ;;  %v1704_v7 = vrot.slane %v1692_v23, 4  ;;  %v2312_v58 = vld [vmem:[#allocation10 + $0x5a8] sm:$0xff] }
 0x223   : > { %5740 = vmatpush1.bf16.msra.mxu0 %v5739_v27  ;;  %5646 = vmatprep.subr.bf16.mxu1 %v5645_v39  ;;  %v5663_v27 = vpack.c.bf16 %v2255_v20, %v2251_v21  ;;  %v1662_v39 = vld [vmem:[#allocation3 + $0x38] sm:$0xf]  ;;  %v5761_v32 = vpack.c.bf16 %v2266_v26, %v2262_v6  ;;  %v2286_v21 = vld [vmem:[#allocation10 + $0x4d8] sm:$0xff]  ;;  %v5771_v6 = vpack.c.bf16 %v2281_v18, %v2277_v62 }
 0x224   : > { %5742 = vmatprep.subr.bf16.mxu0 %v5741_v31  ;;  %v2263_v31 = vld [vmem:[#allocation10 + $0x420] sm:$0xff]  ;;  %v1675_v35 = vrot.slane %v1662_v39, 4  ;;  %v2290_v20 = vld [vmem:[#allocation10 + $0x4f8] sm:$0xff]  ;;  %v5689_v62 = vpack.c.bf16 %v2312_v58, %v2308_v57  ;;  %v2313_v18 = vld [vmem:[#allocation10 + $0x5b0] sm:$0xff] }
 0x225   : > { %v2287_v39 = vld [vmem:[#allocation10 + $0x4e0] sm:$0xff] }
 0x226   : > { %5648 = vmatpush1.bf16.msra.mxu1 %v5647_v36  ;;  %v1661_v36 = vld [vmem:[#allocation3 + $0x30] sm:$0xf]  ;;  %v1676_v51 = vsel %vm1670_vm4, %v1674_v41, %v1675_v35  ;;  %v2298_v35 = vld [vmem:[#allocation10 + $0x538] sm:$0xff]  ;;  %v2295_v41 = vld [vmem:[#allocation10 + $0x520] sm:$0xff] }
 0x227   : > { %5744 = vmatpush1.bf16.msra.mxu0 %v5743_v37  ;;  %5650 = vmatprep.subr.bf16.mxu1 %v5649_v38  ;;  %v2268_v37 = vld [vmem:[#allocation10 + $0x448] sm:$0xff]  ;;  %v1672_v47 = vrot.slane %v1661_v36, 4  ;;  %v5679_v36 = vpack.c.bf16 %v2287_v39, %v2283_v24  ;;  %v5777_v43 = vpack.c.bf16 %v2298_v35, %v2294_v34  ;;  %v2321_v24 = vld [vmem:[#allocation10 + $0x5f0] sm:$0xff]  ;;  %v1663_v34 = vld [vmem:[#allocation3 + $0x40] sm:$0xf] }
 0x228   : > { %5746 = vmatprep.subr.bf16.mxu0 %v5745_v42  ;;  %v2272_v38 = vld [vmem:[#allocation10 + $0x468] sm:$0xff]  ;;  %v5667_v42 = vpack.c.bf16 %v2263_v31, %v2259_v30  ;;  %v5773_v30 = vpack.c.bf16 %v2290_v20, %v2286_v21  ;;  %v2289_v31 = vld [vmem:[#allocation10 + $0x4f0] sm:$0xff]  ;;  %v2315_v20 = vld [vmem:[#allocation10 + $0x5c0] sm:$0xff] }
 0x229   : > { %v1673_v10 = vsel %vm1670_vm4, %v1671_v56, %v1672_v47  ;;  %v2302_v47 = vld [vmem:[#allocation10 + $0x558] sm:$0xff]  ;;  %v2305_v56 = vld [vmem:[#allocation10 + $0x570] sm:$0xff]  ;;  %v3262_v35 = vld [vmem:[#allocation10 + $0xc48] sm:$0xff] }
 0x22a   : > { %5652 = vmatpush1.bf16.msra.mxu1 %v5651_v48  ;;  %v5669_v48 = vpack.c.bf16 %v2272_v38, %v2268_v37  ;;  %v3269_v57 = vld [vmem:[#allocation10 + $0xc80] sm:$0xff] }
 0x22b   : > { %5748 = vmatpush1.bf16.msra.mxu0 %v5747_v49  ;;  %5654 = vmatprep.subr.bf16.mxu1 %v5653_v50  ;;  %v2271_v49 = vld [vmem:[#allocation10 + $0x460] sm:$0xff]  ;;  %v2269_v50 = vld [vmem:[#allocation10 + $0x450] sm:$0xff] }
 0x22c   : > { %5750 = vmatprep.subr.bf16.mxu0 %v5749_v54  ;;  %v2276_v54 = vld [vmem:[#allocation10 + $0x488] sm:$0xff]  ;;  %v5767_v63 = vpack.c.bf16 %v2273_v53, %v2269_v50  ;;  %v2303_v53 = vld [vmem:[#allocation10 + $0x560] sm:$0xff] }
 0x22d   : > { %v3273_v58 = vld [vmem:[#allocation10 + $0xca0] sm:$0xff] }
 0x22e   : > { %5656 = vmatpush1.bf16.msra.mxu1 %v5655_v59  ;;  %v5671_v59 = vpack.c.bf16 %v2271_v49, %v2267_v44  ;;  %v2297_v44 = vld [vmem:[#allocation10 + $0x530] sm:$0xff]  ;;  %v5683_v49 = vpack.c.bf16 %v2295_v41, %v2291_v40  ;;  %v1660_v41 = vld [vmem:[#allocation3 + $0x28] sm:$0xf0] }
 0x22f   : > { %5752 = vmatpush1.bf16.msra.mxu0 %v5751_v60  ;;  %5658 = vmatprep.subr.bf16.mxu1 %v5657_v61  ;;  %v2275_v60 = vld [vmem:[#allocation10 + $0x480] sm:$0xff] }
 0x230   : > { %5754 = vmatprep.subr.bf16.mxu0 %v5753_v1  ;;  %v2279_v61 = vld [vmem:[#allocation10 + $0x4a0] sm:$0xff]  ;;  %v5673_v1 = vpack.c.bf16 %v2280_v55, %v2276_v54  ;;  %v2301_v54 = vld [vmem:[#allocation10 + $0x550] sm:$0xff] }
 0x232   : > { %5660 = vmatpush1.bf16.msra.mxu1 %v5659_v14  ;;  %v1708_v14 = vrot.slane %v1696_v9, 4  ;;  %v2310_v9 = vld [vmem:[#allocation10 + $0x598] sm:$0xff] }
 0x233   : > { %5756 = vmatpush1.bf16.msra.mxu0 %v5755_v17  ;;  %5662 = vmatprep.subr.bf16.mxu1 %v5661_v19  ;;  %v1695_v17 = vld [vmem:[#allocation3 + $0x78] sm:$0xf]  ;;  %v2288_v19 = vld [vmem:[#allocation10 + $0x4e8] sm:$0xff] }
 0x234   : > { %5758 = vmatprep.subr.bf16.mxu0 %v5757_v5  ;;  %v5675_v5 = vpack.c.bf16 %v2279_v61, %v2275_v60  ;;  %v1705_v26 = vrot.slane %v1695_v17, 4  ;;  %v5783_v61 = vpack.c.bf16 %v2305_v56, %v2301_v54  ;;  %v3272_v54 = vld [vmem:[#allocation10 + $0xc98] sm:$0xff] }
 0x236   : > { %5664 = vmatpush1.bf16.msra.mxu1 %v5663_v27  ;;  %v5677_v27 = vpack.c.bf16 %v2288_v19, %v2284_v3  ;;  %v1706_v37 = vsel %vm1670_vm4, %v1704_v7, %v1705_v26  ;;  %v2316_v3 = vld [vmem:[#allocation10 + $0x5c8] sm:$0xff]  ;;  %v3256_v26 = vld [vmem:[#allocation10 + $0xc18] sm:$0xff]  ;;  %v3259_v7 = vld [vmem:[#allocation10 + $0xc30] sm:$0xff] }
 0x237   : > { %5760 = vmatpush1.bf16.msra.mxu0 %v5759_v28  ;;  %5666 = vmatprep.subr.bf16.mxu1 %v5665_v29  ;;  %v2285_v28 = vld [vmem:[#allocation10 + $0x4d0] sm:$0xff]  ;;  %v1709_v29 = vsel %vm1670_vm4, %v1707_v22, %v1708_v14  ;;  %v2322_v14 = vld [vmem:[#allocation10 + $0x5f8] sm:$0xff]  ;;  %v2319_v22 = vld [vmem:[#allocation10 + $0x5e0] sm:$0xff] }
 0x238   : > { %5762 = vmatprep.subr.bf16.mxu0 %v5761_v32  ;;  %v2292_v32 = vld [vmem:[#allocation10 + $0x508] sm:$0xff]  ;;  %v5775_v38 = vpack.c.bf16 %v2289_v31, %v2285_v28  ;;  %v5695_v39 = vpack.c.bf16 %v2319_v22, %v2315_v20  ;;  %v3257_v31 = vld [vmem:[#allocation10 + $0xc20] sm:$0xff] }
 0x239   : > { %2949 = vmatmul.mubr.f32.vlgmr.msra.gmra.mrb[18].mxu1 %v1652_v45  ;;  %v5681_v8 = vpack.c.bf16 %v2296_v33, %v2292_v32  ;;  %v3255_v33 = vld [vmem:[#allocation10 + $0xc10] sm:$0xff] }
 0x23a   : > { %3127 = vmatmul.mubr.f32.vlgmr.msra.gmra.mrb[12].mxu0 %v1652_v45  ;;  %2954 = vmatprep.mubr.f32.mxu1 %v1676_v51  ;;  %v2300_v45 = vld [vmem:[#allocation10 + $0x548] sm:$0xff]  ;;  %v5891_v40 = vpack.c.bf16 %v3259_v7, %v3255_v33  ;;  %v3289_v33 = vld [vmem:[#allocation10 + $0xd20] sm:$0xff]  ;;  %v3287_v7 = vld [vmem:[#allocation10 + $0xd10] sm:$0xff] }
 0x23b   : > { %5668 = vmatpush1.bf16.msra.mxu1 %v5667_v42  ;;  %3132 = vmatprep.mubr.f32.mxu0 %v1676_v51  ;;  %v2293_v42 = vld [vmem:[#allocation10 + $0x510] sm:$0xff] }
 0x23c   : > { %5764 = vmatpush1.bf16.msra.mxu0 %v5763_v46  ;;  %5670 = vmatprep.subr.bf16.mxu1 %v5669_v48  ;;  %v2304_v46 = vld [vmem:[#allocation10 + $0x568] sm:$0xff]  ;;  %v2306_v48 = vld [vmem:[#allocation10 + $0x578] sm:$0xff]  ;;  %v5779_v50 = vpack.c.bf16 %v2297_v44, %v2293_v42  ;;  %v3261_v42 = vld [vmem:[#allocation10 + $0xc40] sm:$0xff] }
 0x23d   : > { %2955 = vmatmul.mubr.f32.gmra.mrb[20].mxu1 %v1673_v10  ;;  %5766 = vmatprep.subr.bf16.mxu0 %v5765_v52  ;;  %v5685_v51 = vpack.c.bf16 %v2304_v46, %v2300_v45  ;;  %v2299_v52 = vld [vmem:[#allocation10 + $0x540] sm:$0xff]  ;;  %v5781_v55 = vpack.c.bf16 %v2306_v48, %v2302_v47  ;;  %v1654_v44 = vld [vmem:[#allocation3 + $0x10] sm:$0xff]  ;;  %v1678_v45 = vrot.slane %v1663_v34, 4 }
 0x23e   : > { %3133 = vmatmul.mubr.f32.gmra.mrb[14].mxu0 %v1673_v10  ;;  %2960 = vmatprep.mubr.f32.mxu1 %v1687_v4  ;;  %v5687_v60 = vpack.c.bf16 %v2303_v53, %v2299_v52  ;;  %v2307_v10 = vld [vmem:[#allocation10 + $0x580] sm:$0xff]  ;;  %v3263_v47 = vld [vmem:[#allocation10 + $0xc50] sm:$0xff]  ;;  %v1677_v52 = vrot.slane %v1660_v41, 4  ;;  %v3296_v41 = vld [vmem:[#allocation10 + $0xd58] sm:$0xff] }
 0x23f   : > { %5672 = vmatpush1.bf16.msra.mxu1 %v5671_v59  ;;  %3138 = vmatprep.mubr.f32.mxu0 %v1687_v4  ;;  %v2314_v59 = vld [vmem:[#allocation10 + $0x5b8] sm:$0xff]  ;;  %v2320_v4 = vld [vmem:[#allocation10 + $0x5e8] sm:$0xff]  ;;  %v3267_v48 = vld [vmem:[#allocation10 + $0xc70] sm:$0xff] }
 0x240   : > { %5768 = vmatpush1.bf16.msra.mxu0 %v5767_v63  ;;  %5674 = vmatprep.subr.bf16.mxu1 %v5673_v1  ;;  %v2311_v63 = vld [vmem:[#allocation10 + $0x5a0] sm:$0xff]  ;;  %v2309_v1 = vld [vmem:[#allocation10 + $0x590] sm:$0xff]  ;;  %v5785_v2 = vpack.c.bf16 %v2314_v59, %v2310_v9  ;;  %v5693_v21 = vpack.c.bf16 %v2320_v4, %v2316_v3  ;;  %v5895_v56 = vpack.c.bf16 %v3267_v48, %v3263_v47  ;;  %v3280_v3 = vld [vmem:[#allocation10 + $0xcd8] sm:$0xff] }
 0x241   : > { %2961 = vmatmul.mubr.f32.gmra.mrb[22].mxu1 %v1686_v25  ;;  %5770 = vmatprep.subr.bf16.mxu0 %v5769_v11  ;;  %v2318_v11 = vld [vmem:[#allocation10 + $0x5d8] sm:$0xff]  ;;  %v5691_v17 = vpack.c.bf16 %v2311_v63, %v2307_v10  ;;  %v5787_v19 = vpack.c.bf16 %v2313_v18, %v2309_v1  ;;  %v1679_v9 = vsel %vm1670_vm4, %v1677_v52, %v1678_v45  ;;  %v1697_v63 = vld [vmem:[#allocation3 + $0x88] sm:$0xf]  ;;  %v3278_v1 = vld [vmem:[#allocation10 + $0xcc8] sm:$0xff] }
 0x242   : > { %3139 = vmatmul.mubr.f32.gmra.mrb[16].mxu0 %v1686_v25  ;;  %2966 = vmatprep.mubr.f32.mxu1 %v1709_v29  ;;  %v5789_v23 = vpack.c.bf16 %v2322_v14, %v2318_v11  ;;  %v3254_v25 = vld [vmem:[#allocation10 + $0xc08] sm:$0xff]  ;;  %v5803_v18 = vpack.c.bf16 %v3273_v58, %v3269_v57  ;;  %v3284_v4 = vld [vmem:[#allocation10 + $0xcf8] sm:$0xff]  ;;  %v3277_v14 = vld [vmem:[#allocation10 + $0xcc0] sm:$0xff]  ;;  %v1711_v22 = vrot.slane %v1697_v63, 4 }
 0x243   : > { %5676 = vmatpush1.bf16.msra.mxu1 %v5675_v5  ;;  %3144 = vmatprep.mubr.f32.mxu0 %v1709_v29  ;;  %v2317_v5 = vld [vmem:[#allocation10 + $0x5d0] sm:$0xff]  ;;  %v3293_v47 = vld [vmem:[#allocation10 + $0xd40] sm:$0xff]  ;;  %v3302_v52 = vld [vmem:[#allocation10 + $0xd88] sm:$0xff] }
 0x244   : > { %5772 = vmatpush1.bf16.msra.mxu0 %v5771_v6  ;;  %5678 = vmatprep.subr.bf16.mxu1 %v5677_v27  ;;  %v3258_v6 = vld [vmem:[#allocation10 + $0xc28] sm:$0xff]  ;;  %v3260_v27 = vld [vmem:[#allocation10 + $0xc38] sm:$0xff]  ;;  %v5791_v28 = vpack.c.bf16 %v2321_v24, %v2317_v5  ;;  %v3283_v24 = vld [vmem:[#allocation10 + $0xcf0] sm:$0xff] }
 0x245   : > { %2967 = vmatmul.mubr.f32.gmra.mrb[24].mxu1 %v1706_v37  ;;  %5774 = vmatprep.subr.bf16.mxu0 %v5773_v30  ;;  %v5793_v29 = vpack.c.bf16 %v3258_v6, %v3254_v25  ;;  %v3253_v30 = vld [vmem:[#allocation10 + $0xc00] sm:$0xff]  ;;  %v5889_v32 = vpack.c.bf16 %v3260_v27, %v3256_v26  ;;  %v5901_v25 = vpack.c.bf16 %v3284_v4, %v3280_v3  ;;  %v3286_v26 = vld [vmem:[#allocation10 + $0xd08] sm:$0xff] }
 0x246   : > { %3145 = vmatmul.mubr.f32.gmra.mrb[18].mxu0 %v1706_v37  ;;  %3037 = vmatprep.mubr.f32.mxu1 %v6869_v0  ;;  %v5795_v37 = vpack.c.bf16 %v3257_v31, %v3253_v30  ;;  %v1831_v6 = vld [vmem:[#allocation3 + $0x8] sm:$0xfc]  ;;  %v3292_v30 = vld [vmem:[#allocation10 + $0xd38] sm:$0xff] }
 0x247   : > { %5680 = vmatpush1.bf16.msra.mxu1 %v5679_v36  ;;  %3215 = vmatprep.mubr.f32.mxu0 %v6869_v0  ;;  %v3266_v36 = vld [vmem:[#allocation10 + $0xc68] sm:$0xff]  ;;  %v3297_v48 = vld [vmem:[#allocation10 + $0xd60] sm:$0xff] }
 0x248   : > { %5776 = vmatpush1.bf16.msra.mxu0 %v5775_v38  ;;  %5682 = vmatprep.subr.bf16.mxu1 %v5681_v8  ;;  %v3264_v38 = vld [vmem:[#allocation10 + $0xc58] sm:$0xff]  ;;  %v5797_v46 = vpack.c.bf16 %v3266_v36, %v3262_v35  ;;  %v3290_v27 = vld [vmem:[#allocation10 + $0xd28] sm:$0xff]  ;;  %v1846_v35 = vrot.slane %v1831_v6, 2 }
 0x249   : > { %5778 = vmatprep.subr.bf16.mxu0 %v5777_v43  ;;  %v3268_v8 = vld [vmem:[#allocation10 + $0xc78] sm:$0xff]  ;;  %v3265_v43 = vld [vmem:[#allocation10 + $0xc60] sm:$0xff]  ;;  %v5809_v36 = vpack.c.bf16 %v3290_v27, %v3286_v26  ;;  %v3314_v63 = vld [vmem:[#allocation10 + $0xde8] sm:$0xff] }
 0x24a   : > { %v5799_v53 = vpack.c.bf16 %v3265_v43, %v3261_v42  ;;  %v3300_v42 = vld [vmem:[#allocation10 + $0xd78] sm:$0xff]  ;;  %v3317_v26 = vld [vmem:[#allocation10 + $0xe00] sm:$0xff] }
 0x24b   : > { %5684 = vmatpush1.bf16.msra.mxu1 %v5683_v49  ;;  %v5893_v49 = vpack.c.bf16 %v3268_v8, %v3264_v38  ;;  %v3294_v38 = vld [vmem:[#allocation10 + $0xd48] sm:$0xff]  ;;  %v3321_v27 = vld [vmem:[#allocation10 + $0xe20] sm:$0xff] }
 0x24c   : > { %5780 = vmatpush1.bf16.msra.mxu0 %v5779_v50  ;;  %5686 = vmatprep.subr.bf16.mxu1 %v5685_v51  ;;  %v3270_v50 = vld [vmem:[#allocation10 + $0xc88] sm:$0xff] }
 0x24d   : > { %5782 = vmatprep.subr.bf16.mxu0 %v5781_v55  ;;  %v3274_v51 = vld [vmem:[#allocation10 + $0xca8] sm:$0xff]  ;;  %v3276_v55 = vld [vmem:[#allocation10 + $0xcb8] sm:$0xff] }
 0x24e   : > { %v5801_v59 = vpack.c.bf16 %v3274_v51, %v3270_v50  ;;  %v5897_v10 = vpack.c.bf16 %v3276_v55, %v3272_v54  ;;  %v3298_v8 = vld [vmem:[#allocation10 + $0xd68] sm:$0xff]  ;;  %v5909_v50 = vpack.c.bf16 %v3300_v42, %v3296_v41  ;;  %v3299_v51 = vld [vmem:[#allocation10 + $0xd70] sm:$0xff]  ;;  %v3304_v54 = vld [vmem:[#allocation10 + $0xd98] sm:$0xff] }
 0x24f   : > { %5688 = vmatpush1.bf16.msra.mxu1 %v5687_v60  ;;  %v3271_v60 = vld [vmem:[#allocation10 + $0xc90] sm:$0xff]  ;;  %v3308_v55 = vld [vmem:[#allocation10 + $0xdb8] sm:$0xff]  ;;  %v3334_v41 = vld [vmem:[#allocation10 + $0xe88] sm:$0xff] }
 0x250   : > { %5784 = vmatpush1.bf16.msra.mxu0 %v5783_v61  ;;  %5690 = vmatprep.subr.bf16.mxu1 %v5689_v62  ;;  %v3275_v61 = vld [vmem:[#allocation10 + $0xcb0] sm:$0xff]  ;;  %v3338_v42 = vld [vmem:[#allocation10 + $0xea8] sm:$0xff] }
 0x251   : > { %5786 = vmatprep.subr.bf16.mxu0 %v5785_v2  ;;  %v1694_v62 = vld [vmem:[#allocation3 + $0x70] sm:$0xf0]  ;;  %v3282_v2 = vld [vmem:[#allocation10 + $0xce8] sm:$0xff]  ;;  %v5899_v11 = vpack.c.bf16 %v3275_v61, %v3271_v60  ;;  %v5913_v61 = vpack.c.bf16 %v3308_v55, %v3304_v54  ;;  %v3344_v55 = vld [vmem:[#allocation10 + $0xed8] sm:$0xff] }
 0x252   : > { %v1710_v20 = vrot.slane %v1694_v62, 4  ;;  %v5805_v5 = vpack.c.bf16 %v3282_v2, %v3278_v1  ;;  %v3303_v60 = vld [vmem:[#allocation10 + $0xd90] sm:$0xff]  ;;  %v3312_v1 = vld [vmem:[#allocation10 + $0xdd8] sm:$0xff]  ;;  %v3346_v54 = vld [vmem:[#allocation10 + $0xee8] sm:$0xff] }
 0x253   : > { %5692 = vmatpush1.bf16.msra.mxu1 %v5691_v17  ;;  %v3281_v17 = vld [vmem:[#allocation10 + $0xce0] sm:$0xff]  ;;  %v3307_v62 = vld [vmem:[#allocation10 + $0xdb0] sm:$0xff]  ;;  %v3316_v2 = vld [vmem:[#allocation10 + $0xdf8] sm:$0xff] }
 0x254   : > { %5788 = vmatpush1.bf16.msra.mxu0 %v5787_v19  ;;  %5694 = vmatprep.subr.bf16.mxu1 %v5693_v21  ;;  %v1834_v19 = vld [vmem:[#allocation3 + $0x20] sm:$0x3]  ;;  %v1688_v21 = vld [vmem:[#allocation3 + $0x58] sm:$0xff]  ;;  %v1712_v34 = vsel %vm1670_vm4, %v1710_v20, %v1711_v22  ;;  %v5915_v3 = vpack.c.bf16 %v3307_v62, %v3303_v60  ;;  %v3318_v20 = vld [vmem:[#allocation10 + $0xe08] sm:$0xff] }
 0x255   : > { %5790 = vmatprep.subr.bf16.mxu0 %v5789_v23  ;;  %v3279_v23 = vld [vmem:[#allocation10 + $0xcd0] sm:$0xff]  ;;  %v3322_v22 = vld [vmem:[#allocation10 + $0xe28] sm:$0xff]  ;;  %v3345_v60 = vld [vmem:[#allocation10 + $0xee0] sm:$0xff] }
 0x256   : > { %v5903_v31 = vpack.c.bf16 %v3283_v24, %v3279_v23  ;;  %v3324_v23 = vld [vmem:[#allocation10 + $0xe38] sm:$0xff]  ;;  %v5825_v6 = vpack.c.bf16 %v3322_v22, %v3318_v20  ;;  %v3355_v20 = vld [vmem:[#allocation10 + $0xf30] sm:$0xff]  ;;  %v3358_v22 = vld [vmem:[#allocation10 + $0xf48] sm:$0xff] }
 0x257   : > { %5696 = vmatpush1.bf16.msra.mxu1 %v5695_v39  ;;  %v5807_v39 = vpack.c.bf16 %v3281_v17, %v3277_v14  ;;  %v3313_v14 = vld [vmem:[#allocation10 + $0xde0] sm:$0xff]  ;;  %v3311_v17 = vld [vmem:[#allocation10 + $0xdd0] sm:$0xff] }
 0x258   : > { %5792 = vmatpush1.bf16.msra.mxu0 %v5791_v28  ;;  %5794 = vmatprep.subr.bf16.mxu1 %v5793_v29  ;;  %v1847_v28 = vrot.slane %v1834_v19, 2  ;;  %v3288_v29 = vld [vmem:[#allocation10 + $0xd18] sm:$0xff]  ;;  %v5917_v19 = vpack.c.bf16 %v3316_v2, %v3312_v1  ;;  %v3354_v1 = vld [vmem:[#allocation10 + $0xf28] sm:$0xff] }
 0x259   : > { %5890 = vmatprep.subr.bf16.mxu0 %v5889_v32  ;;  %v3285_v32 = vld [vmem:[#allocation10 + $0xd00] sm:$0xff]  ;;  %v3352_v2 = vld [vmem:[#allocation10 + $0xf18] sm:$0xff] }
 0x25a   : > { %3038 = vmatmul.mubr.f32.vlgmr.msra.gmra.mrb[18].mxu1 %v1654_v44  ;;  %v1848_v43 = vsel %vm1842_vm5, %v1846_v35, %v1847_v28 }
 0x25b   : > { %3216 = vmatmul.mubr.f32.vlgmr.msra.gmra.mrb[12].mxu0 %v1654_v44  ;;  %5796 = vmatpush1.bf16.msra.mxu1 %v5795_v37  ;;  %v3291_v37 = vld [vmem:[#allocation10 + $0xd30] sm:$0xff]  ;;  %v5811_v44 = vpack.c.bf16 %v3289_v33, %v3285_v32  ;;  %v3328_v32 = vld [vmem:[#allocation10 + $0xe58] sm:$0xff] }
 0x25c   : > { %5892 = vmatpush1.bf16.msra.mxu0 %v5891_v40  ;;  %3043 = vmatprep.mubr.f32.mxu1 %v6869_v0  ;;  %v5905_v40 = vpack.c.bf16 %v3292_v30, %v3288_v29  ;;  %v5907_v45 = vpack.c.bf16 %v3291_v37, %v3287_v7  ;;  %v3323_v29 = vld [vmem:[#allocation10 + $0xe30] sm:$0xff]  ;;  %v3326_v30 = vld [vmem:[#allocation10 + $0xe48] sm:$0xff]  ;;  %v3332_v33 = vld [vmem:[#allocation10 + $0xe78] sm:$0xff]  ;;  %v5827_v7 = vpack.c.bf16 %v3321_v27, %v3317_v26 }
 0x25d   : > { %3221 = vmatprep.mubr.f32.mxu0 %v6869_v0  ;;  %5798 = vmatprep.subr.bf16.mxu1 %v5797_v46  ;;  %v5813_v46 = vpack.c.bf16 %v3298_v8, %v3294_v38  ;;  %v3329_v37 = vld [vmem:[#allocation10 + $0xe60] sm:$0xff]  ;;  %v3327_v38 = vld [vmem:[#allocation10 + $0xe50] sm:$0xff]  ;;  %v5925_v8 = vpack.c.bf16 %v3332_v33, %v3328_v32  ;;  %v3370_v32 = vld [vmem:[#allocation10 + $0xfa8] sm:$0xff] }
 0x25e   : > { %3044 = vmatmul.mubr.f32.gmra.mrb[20].mxu1 %v1679_v9  ;;  %5894 = vmatprep.subr.bf16.mxu0 %v5893_v49  ;;  %v3295_v49 = vld [vmem:[#allocation10 + $0xd50] sm:$0xff]  ;;  %v3357_v27 = vld [vmem:[#allocation10 + $0xf40] sm:$0xff]  ;;  %v3368_v33 = vld [vmem:[#allocation10 + $0xf98] sm:$0xff] }
 0x25f   : > { %3222 = vmatmul.mubr.f32.gmra.mrb[14].mxu0 %v1679_v9  ;;  %5800 = vmatpush1.bf16.msra.mxu1 %v5799_v53  ;;  %v3306_v53 = vld [vmem:[#allocation10 + $0xda8] sm:$0xff]  ;;  %v5911_v57 = vpack.c.bf16 %v3299_v51, %v3295_v49  ;;  %v3301_v9 = vld [vmem:[#allocation10 + $0xd80] sm:$0xff] }
 0x260   : > { %5896 = vmatpush1.bf16.msra.mxu0 %v5895_v56  ;;  %3049 = vmatprep.mubr.f32.mxu1 %v6869_v0  ;;  %v5815_v56 = vpack.c.bf16 %v3297_v48, %v3293_v47  ;;  %v5817_v58 = vpack.c.bf16 %v3306_v53, %v3302_v52  ;;  %v5833_v47 = vpack.c.bf16 %v3338_v42, %v3334_v41  ;;  %v3333_v48 = vld [vmem:[#allocation10 + $0xe80] sm:$0xff]  ;;  %v3339_v52 = vld [vmem:[#allocation10 + $0xeb0] sm:$0xff]  ;;  %v3342_v53 = vld [vmem:[#allocation10 + $0xec8] sm:$0xff] }
 0x261   : > { %3227 = vmatprep.mubr.f32.mxu0 %v6869_v0  ;;  %5802 = vmatprep.subr.bf16.mxu1 %v5801_v59  ;;  %v3305_v59 = vld [vmem:[#allocation10 + $0xda0] sm:$0xff]  ;;  %v3371_v41 = vld [vmem:[#allocation10 + $0xfb0] sm:$0xff]  ;;  %v3374_v42 = vld [vmem:[#allocation10 + $0xfc8] sm:$0xff] }
 0x262   : > { %3050 = vmatmul.mubr.f32.gmra.mrb[22].mxu1 %v1688_v21  ;;  %5898 = vmatprep.subr.bf16.mxu0 %v5897_v10  ;;  %v3310_v10 = vld [vmem:[#allocation10 + $0xdc8] sm:$0xff]  ;;  %v3337_v49 = vld [vmem:[#allocation10 + $0xea0] sm:$0xff] }
 0x263   : > { %3228 = vmatmul.mubr.f32.gmra.mrb[16].mxu0 %v1688_v21  ;;  %5804 = vmatpush1.bf16.msra.mxu1 %v5803_v18  ;;  %v5819_v18 = vpack.c.bf16 %v3305_v59, %v3301_v9  ;;  %v5821_v4 = vpack.c.bf16 %v3314_v63, %v3310_v10  ;;  %v3315_v21 = vld [vmem:[#allocation10 + $0xdf0] sm:$0xff]  ;;  %v5837_v9 = vpack.c.bf16 %v3346_v54, %v3342_v53  ;;  %v3341_v59 = vld [vmem:[#allocation10 + $0xec0] sm:$0xff]  ;;  %v3350_v63 = vld [vmem:[#allocation10 + $0xf08] sm:$0xff] }
 0x264   : > { %5900 = vmatpush1.bf16.msra.mxu0 %v5899_v11  ;;  %3055 = vmatprep.mubr.f32.mxu1 %v6869_v0  ;;  %v3309_v11 = vld [vmem:[#allocation10 + $0xdc0] sm:$0xff]  ;;  %v3347_v10 = vld [vmem:[#allocation10 + $0xef0] sm:$0xff]  ;;  %v3382_v54 = vld [vmem:[#allocation10 + $0x1008] sm:$0xff] }
 0x265   : > { %3233 = vmatprep.mubr.f32.mxu0 %v6869_v0  ;;  %5806 = vmatprep.subr.bf16.mxu1 %v5805_v5  ;;  %v3320_v5 = vld [vmem:[#allocation10 + $0xe18] sm:$0xff]  ;;  %v5823_v24 = vpack.c.bf16 %v3313_v14, %v3309_v11  ;;  %v5841_v11 = vpack.c.bf16 %v3354_v1, %v3350_v63  ;;  %v3349_v14 = vld [vmem:[#allocation10 + $0xf00] sm:$0xff]  ;;  %v3379_v53 = vld [vmem:[#allocation10 + $0xff0] sm:$0xff] }
 0x266   : > { %3056 = vmatmul.mubr.f32.gmra.mrb[24].mxu1 %v1712_v34  ;;  %5902 = vmatprep.subr.bf16.mxu0 %v5901_v25  ;;  %v5919_v25 = vpack.c.bf16 %v3315_v21, %v3311_v17  ;;  %v5921_v28 = vpack.c.bf16 %v3324_v23, %v3320_v5  ;;  %v3353_v17 = vld [vmem:[#allocation10 + $0xf20] sm:$0xff]  ;;  %v3362_v5 = vld [vmem:[#allocation10 + $0xf68] sm:$0xff]  ;;  %v3360_v23 = vld [vmem:[#allocation10 + $0xf58] sm:$0xff] }
 0x267   : > { %3234 = vmatmul.mubr.f32.gmra.mrb[18].mxu0 %v1712_v34  ;;  %5808 = vmatpush1.bf16.msra.mxu1 %v5807_v39  ;;  %v3319_v39 = vld [vmem:[#allocation10 + $0xe10] sm:$0xff]  ;;  %v5845_v26 = vpack.c.bf16 %v3362_v5, %v3358_v22  ;;  %v3392_v22 = vld [vmem:[#allocation10 + $0x1058] sm:$0xff] }
 0x268   : > { %3509 = vmatprep.mubr.f32.mxu1 %v1848_v43  ;;  %5904 = vmatpush1.bf16.msra.mxu0 %v5903_v31  ;;  %v3330_v31 = vld [vmem:[#allocation10 + $0xe68] sm:$0xff]  ;;  %v5923_v34 = vpack.c.bf16 %v3323_v29, %v3319_v39  ;;  %v3361_v39 = vld [vmem:[#allocation10 + $0xf60] sm:$0xff]  ;;  %v3396_v5 = vld [vmem:[#allocation10 + $0x1078] sm:$0xff] }
 0x269   : > { %3687 = vmatprep.mubr.f32.mxu0 %v1848_v43  ;;  %5810 = vmatprep.subr.bf16.mxu1 %v5809_v36  ;;  %v5829_v35 = vpack.c.bf16 %v3330_v31, %v3326_v30  ;;  %v3325_v36 = vld [vmem:[#allocation10 + $0xe40] sm:$0xff]  ;;  %v3336_v43 = vld [vmem:[#allocation10 + $0xe98] sm:$0xff]  ;;  %v3363_v30 = vld [vmem:[#allocation10 + $0xf70] sm:$0xff] }
 0x26a   : > { %5906 = vmatprep.subr.bf16.mxu0 %v5905_v40  ;;  %v3331_v40 = vld [vmem:[#allocation10 + $0xe70] sm:$0xff]  ;;  %v3366_v31 = vld [vmem:[#allocation10 + $0xf88] sm:$0xff] }
 0x26b   : > { %5812 = vmatpush1.bf16.msra.mxu1 %v5811_v44  ;;  %v3340_v44 = vld [vmem:[#allocation10 + $0xeb8] sm:$0xff]  ;;  %v1862_v63 = vld [vmem:[#allocation3 + $0x30] sm:$0x3f] }
 0x26c   : > { %5908 = vmatpush1.bf16.msra.mxu0 %v5907_v45  ;;  %5814 = vmatprep.subr.bf16.mxu1 %v5813_v46  ;;  %v5831_v45 = vpack.c.bf16 %v3329_v37, %v3325_v36  ;;  %v5927_v46 = vpack.c.bf16 %v3331_v40, %v3327_v38  ;;  %v5929_v51 = vpack.c.bf16 %v3340_v44, %v3336_v43  ;;  %v3365_v37 = vld [vmem:[#allocation10 + $0xf80] sm:$0xff]  ;;  %v3378_v43 = vld [vmem:[#allocation10 + $0xfe8] sm:$0xff]  ;;  %v3376_v44 = vld [vmem:[#allocation10 + $0xfd8] sm:$0xff] }
 0x26d   : > { %5910 = vmatprep.subr.bf16.mxu0 %v5909_v50  ;;  %v3335_v50 = vld [vmem:[#allocation10 + $0xe90] sm:$0xff]  ;;  %v5849_v36 = vpack.c.bf16 %v3370_v32, %v3366_v31  ;;  %v3369_v38 = vld [vmem:[#allocation10 + $0xfa0] sm:$0xff] }
 0x26e   : > { %v3393_v31 = vld [vmem:[#allocation10 + $0x1060] sm:$0xff]  ;;  %v3391_v32 = vld [vmem:[#allocation10 + $0x1050] sm:$0xff] }
 0x26f   : > { %5816 = vmatpush1.bf16.msra.mxu1 %v5815_v56  ;;  %v3348_v56 = vld [vmem:[#allocation10 + $0xef8] sm:$0xff] }
 0x270   : > { %5912 = vmatpush1.bf16.msra.mxu0 %v5911_v57  ;;  %5818 = vmatprep.subr.bf16.mxu1 %v5817_v58  ;;  %v5835_v57 = vpack.c.bf16 %v3337_v49, %v3333_v48  ;;  %v5931_v58 = vpack.c.bf16 %v3339_v52, %v3335_v50  ;;  %v5933_v62 = vpack.c.bf16 %v3348_v56, %v3344_v55  ;;  %v3373_v49 = vld [vmem:[#allocation10 + $0xfc0] sm:$0xff]  ;;  %v3386_v55 = vld [vmem:[#allocation10 + $0x1028] sm:$0xff]  ;;  %v1833_v56 = vld [vmem:[#allocation3 + $0x18] sm:$0x3] }
 0x271   : > { %5914 = vmatprep.subr.bf16.mxu0 %v5913_v61  ;;  %v3343_v61 = vld [vmem:[#allocation10 + $0xed0] sm:$0xff]  ;;  %v5853_v48 = vpack.c.bf16 %v3378_v43, %v3374_v42  ;;  %v3377_v50 = vld [vmem:[#allocation10 + $0xfe0] sm:$0xff]  ;;  %v1844_v1 = vrot.slane %v1833_v56, 2 }
 0x272   : > { %v1918_v42 = vld [vmem:[#allocation3 + $0x80] sm:$0x3f] }
 0x273   : > { %5820 = vmatpush1.bf16.msra.mxu1 %v5819_v18  ;;  %v3356_v18 = vld [vmem:[#allocation10 + $0xf38] sm:$0xff]  ;;  %v1930_v56 = vrot.slane %v1918_v42, 6  ;;  %v3427_v42 = vld [vmem:[#allocation10 + $0x1170] sm:$0xff] }
 0x274   : > { %5916 = vmatpush1.bf16.msra.mxu0 %v5915_v3  ;;  %5822 = vmatprep.subr.bf16.mxu1 %v5821_v4  ;;  %v5839_v3 = vpack.c.bf16 %v3345_v60, %v3341_v59  ;;  %v5935_v4 = vpack.c.bf16 %v3347_v10, %v3343_v61  ;;  %v5937_v21 = vpack.c.bf16 %v3356_v18, %v3352_v2  ;;  %v1863_v59 = vld [vmem:[#allocation3 + $0x38] sm:$0x3f]  ;;  %v1830_v61 = vld [vmem:[#allocation3] sm:$0xfc] }
 0x275   : > { %5918 = vmatprep.subr.bf16.mxu0 %v5917_v19  ;;  %v3351_v19 = vld [vmem:[#allocation10 + $0xf10] sm:$0xff]  ;;  %v1860_v10 = vld [vmem:[#allocation3 + $0x20] sm:$0xc0] }
 0x276   : > { %v3381_v18 = vld [vmem:[#allocation10 + $0x1000] sm:$0xff] }
 0x277   : > { %5824 = vmatpush1.bf16.msra.mxu1 %v5823_v24  ;;  %v3364_v24 = vld [vmem:[#allocation10 + $0xf78] sm:$0xff] }
 0x278   : > { %5920 = vmatpush1.bf16.msra.mxu0 %v5919_v25  ;;  %5826 = vmatprep.subr.bf16.mxu1 %v5825_v6  ;;  %v5843_v25 = vpack.c.bf16 %v3353_v17, %v3349_v14  ;;  %v5939_v6 = vpack.c.bf16 %v3355_v20, %v3351_v19  ;;  %v5941_v29 = vpack.c.bf16 %v3364_v24, %v3360_v23  ;;  %v3387_v14 = vld [vmem:[#allocation10 + $0x1030] sm:$0xff]  ;;  %v1859_v17 = vld [vmem:[#allocation3 + $0x18] sm:$0xc0]  ;;  %v3390_v19 = vld [vmem:[#allocation10 + $0x1048] sm:$0xff]  ;;  %v1843_v20 = vrot.slane %v1830_v61, 2 }
 0x279   : > { %5922 = vmatprep.subr.bf16.mxu0 %v5921_v28  ;;  %v3359_v28 = vld [vmem:[#allocation10 + $0xf50] sm:$0xff]  ;;  %v1891_v23 = vld [vmem:[#allocation3 + $0x68] sm:$0x3]  ;;  %v1875_v24 = vrot.slane %v1860_v10, 6  ;;  %v3412_v61 = vld [vmem:[#allocation10 + $0x10f8] sm:$0xff] }
 0x27b   : > { %5828 = vmatpush1.bf16.msra.mxu1 %v5827_v7  ;;  %v3372_v7 = vld [vmem:[#allocation10 + $0xfb8] sm:$0xff] }
 0x27c   : > { %5924 = vmatpush1.bf16.msra.mxu0 %v5923_v34  ;;  %5830 = vmatprep.subr.bf16.mxu1 %v5829_v35  ;;  %v5847_v34 = vpack.c.bf16 %v3361_v39, %v3357_v27  ;;  %v5943_v35 = vpack.c.bf16 %v3363_v30, %v3359_v28  ;;  %v5945_v40 = vpack.c.bf16 %v3372_v7, %v3368_v33  ;;  %v1873_v28 = vrot.slane %v1862_v63, 6  ;;  %v3389_v30 = vld [vmem:[#allocation10 + $0x1040] sm:$0xff] }
 0x27d   : > { %5926 = vmatprep.subr.bf16.mxu0 %v5925_v8  ;;  %v3367_v8 = vld [vmem:[#allocation10 + $0xf90] sm:$0xff]  ;;  %v1845_v27 = vsel %vm1842_vm5, %v1843_v20, %v1844_v1  ;;  %v5957_v7 = vpack.c.bf16 %v3396_v5, %v3392_v22  ;;  %v1914_v63 = vld [vmem:[#allocation3 + $0x60] sm:$0xc0]  ;;  %v3414_v20 = vld [vmem:[#allocation10 + $0x1108] sm:$0xff] }
 0x27e   : > { %v3418_v22 = vld [vmem:[#allocation10 + $0x1128] sm:$0xff]  ;;  %v1926_v5 = vrot.slane %v1914_v63, 6 }
 0x27f   : > { %5832 = vmatpush1.bf16.msra.mxu1 %v5831_v45  ;;  %v3380_v45 = vld [vmem:[#allocation10 + $0xff8] sm:$0xff]  ;;  %v1832_v63 = vld [vmem:[#allocation3 + $0x10] sm:$0xfc] }
 0x280   : > { %5928 = vmatpush1.bf16.msra.mxu0 %v5927_v46  ;;  %5834 = vmatprep.subr.bf16.mxu1 %v5833_v47  ;;  %v5851_v46 = vpack.c.bf16 %v3369_v38, %v3365_v37  ;;  %v5947_v47 = vpack.c.bf16 %v3371_v41, %v3367_v8  ;;  %v5949_v52 = vpack.c.bf16 %v3380_v45, %v3376_v44  ;;  %v3398_v37 = vld [vmem:[#allocation10 + $0x1088] sm:$0xff]  ;;  %v1872_v8 = vrot.slane %v1859_v17, 6  ;;  %v3404_v41 = vld [vmem:[#allocation10 + $0x10b8] sm:$0xff] }
 0x281   : > { %5930 = vmatprep.subr.bf16.mxu0 %v5929_v51  ;;  %v3375_v51 = vld [vmem:[#allocation10 + $0xfd0] sm:$0xff]  ;;  %v3402_v38 = vld [vmem:[#allocation10 + $0x10a8] sm:$0xff]  ;;  %v5863_v44 = vpack.c.bf16 %v3393_v31, %v3389_v30 }
 0x282   : > { %v5951_v60 = vpack.c.bf16 %v3379_v53, %v3375_v51  ;;  %v1915_v45 = vld [vmem:[#allocation3 + $0x68] sm:$0xc0]  ;;  %v3397_v51 = vld [vmem:[#allocation10 + $0x1080] sm:$0xff]  ;;  %v3399_v53 = vld [vmem:[#allocation10 + $0x1090] sm:$0xff] }
 0x283   : > { %5836 = vmatpush1.bf16.msra.mxu1 %v5835_v57  ;;  %v3384_v57 = vld [vmem:[#allocation10 + $0x1018] sm:$0xff]  ;;  %v3419_v31 = vld [vmem:[#allocation10 + $0x1130] sm:$0xff] }
 0x284   : > { %5932 = vmatpush1.bf16.msra.mxu0 %v5931_v58  ;;  %5838 = vmatprep.subr.bf16.mxu1 %v5837_v9  ;;  %v3388_v58 = vld [vmem:[#allocation10 + $0x1038] sm:$0xff]  ;;  %v5855_v9 = vpack.c.bf16 %v3377_v50, %v3373_v49  ;;  %v5865_v50 = vpack.c.bf16 %v3402_v38, %v3398_v37  ;;  %v3421_v38 = vld [vmem:[#allocation10 + $0x1140] sm:$0xff] }
 0x285   : > { %5934 = vmatprep.subr.bf16.mxu0 %v5933_v62  ;;  %v5857_v62 = vpack.c.bf16 %v3386_v55, %v3382_v54  ;;  %v5953_v2 = vpack.c.bf16 %v3388_v58, %v3384_v57  ;;  %v3403_v57 = vld [vmem:[#allocation10 + $0x10b0] sm:$0xff]  ;;  %v3406_v58 = vld [vmem:[#allocation10 + $0x10c8] sm:$0xff] }
 0x287   : > { %5840 = vmatpush1.bf16.msra.mxu1 %v5839_v3  ;;  %v3385_v3 = vld [vmem:[#allocation10 + $0x1020] sm:$0xff] }
 0x288   : > { %5936 = vmatpush1.bf16.msra.mxu0 %v5935_v4  ;;  %5842 = vmatprep.subr.bf16.mxu1 %v5841_v11  ;;  %v3383_v4 = vld [vmem:[#allocation10 + $0x1010] sm:$0xff]  ;;  %v1876_v11 = vrot.slane %v1863_v59, 6 }
 0x289   : > { %5938 = vmatprep.subr.bf16.mxu0 %v5937_v21  ;;  %v3394_v21 = vld [vmem:[#allocation10 + $0x1068] sm:$0xff]  ;;  %v5955_v39 = vpack.c.bf16 %v3387_v14, %v3383_v4  ;;  %v3405_v4 = vld [vmem:[#allocation10 + $0x10c0] sm:$0xff]  ;;  %v3407_v14 = vld [vmem:[#allocation10 + $0x10d0] sm:$0xff] }
 0x28a   : > { %v1877_v33 = vsel %vm1871_vm6, %v1875_v24, %v1876_v11  ;;  %v3409_v11 = vld [vmem:[#allocation10 + $0x10e0] sm:$0xff]  ;;  %v3420_v24 = vld [vmem:[#allocation10 + $0x1138] sm:$0xff] }
 0x28b   : > { %5844 = vmatpush1.bf16.msra.mxu1 %v5843_v25  ;;  %v5859_v25 = vpack.c.bf16 %v3385_v3, %v3381_v18 }
 0x28c   : > { %5940 = vmatpush1.bf16.msra.mxu0 %v5939_v6  ;;  %5846 = vmatprep.subr.bf16.mxu1 %v5845_v26  ;;  %v1888_v6 = vld [vmem:[#allocation3 + $0x50] sm:$0xfc]  ;;  %v1890_v26 = vld [vmem:[#allocation3 + $0x60] sm:$0x3] }
 0x28d   : > { %5942 = vmatprep.subr.bf16.mxu0 %v5941_v29  ;;  %v5861_v29 = vpack.c.bf16 %v3394_v21, %v3390_v19  ;;  %v1902_v43 = vrot.slane %v1888_v6, 2  ;;  %v1900_v49 = vrot.slane %v1890_v26, 2  ;;  %v3411_v21 = vld [vmem:[#allocation10 + $0x10f0] sm:$0xff] }
 0x28e   : > { %v5967_v26 = vpack.c.bf16 %v3411_v21, %v3407_v14  ;;  %v3837_v14 = vld [vmem:[#allocation10 + $0x1238] sm:$0xff] }
 0x28f   : > { %5848 = vmatpush1.bf16.msra.mxu1 %v5847_v34  ;;  %v1903_v34 = vrot.slane %v1891_v23, 2  ;;  %v3416_v23 = vld [vmem:[#allocation10 + $0x1118] sm:$0xff] }
 0x290   : > { %5944 = vmatpush1.bf16.msra.mxu0 %v5943_v35  ;;  %5850 = vmatprep.subr.bf16.mxu1 %v5849_v36  ;;  %v3395_v35 = vld [vmem:[#allocation10 + $0x1070] sm:$0xff]  ;;  %v1887_v36 = vld [vmem:[#allocation3 + $0x48] sm:$0xfc]  ;;  %v5969_v30 = vpack.c.bf16 %v3420_v24, %v3416_v23 }
 0x291   : > { %5946 = vmatprep.subr.bf16.mxu0 %v5945_v40  ;;  %v3400_v40 = vld [vmem:[#allocation10 + $0x1098] sm:$0xff]  ;;  %v1904_v54 = vsel %vm1842_vm5, %v1902_v43, %v1903_v34  ;;  %v1899_v59 = vrot.slane %v1887_v36, 2  ;;  %v3430_v43 = vld [vmem:[#allocation10 + $0x1188] sm:$0xff] }
 0x292   : > { %v5961_v55 = vpack.c.bf16 %v3404_v41, %v3400_v40  ;;  %v3428_v34 = vld [vmem:[#allocation10 + $0x1178] sm:$0xff]  ;;  %v3423_v40 = vld [vmem:[#allocation10 + $0x1150] sm:$0xff] }
 0x293   : > { %5852 = vmatpush1.bf16.msra.mxu1 %v5851_v46  ;;  %v1917_v46 = vld [vmem:[#allocation3 + $0x78] sm:$0x3f]  ;;  %v1901_v1 = vsel %vm1842_vm5, %v1899_v59, %v1900_v49 }
 0x294   : > { %5948 = vmatpush1.bf16.msra.mxu0 %v5947_v47  ;;  %5854 = vmatprep.subr.bf16.mxu1 %v5853_v48  ;;  %v1874_v47 = vsel %vm1871_vm6, %v1872_v8, %v1873_v28  ;;  %v5959_v48 = vpack.c.bf16 %v3395_v35, %v3391_v32  ;;  %v1927_v18 = vrot.slane %v1917_v46, 6  ;;  %v3417_v28 = vld [vmem:[#allocation10 + $0x1120] sm:$0xff]  ;;  %v3422_v32 = vld [vmem:[#allocation10 + $0x1148] sm:$0xff]  ;;  %v3436_v46 = vld [vmem:[#allocation10 + $0x11b8] sm:$0xff] }
 0x295   : > { %5950 = vmatprep.subr.bf16.mxu0 %v5949_v52  ;;  %v3401_v52 = vld [vmem:[#allocation10 + $0x10a0] sm:$0xff] }
 0x296   : > { %v5867_v10 = vpack.c.bf16 %v3401_v52, %v3397_v51  ;;  %v1928_v6 = vsel %vm1871_vm6, %v1926_v5, %v1927_v18  ;;  %v3425_v8 = vld [vmem:[#allocation10 + $0x1160] sm:$0xff]  ;;  %v3431_v52 = vld [vmem:[#allocation10 + $0x1190] sm:$0xff]  ;;  %v3831_v18 = vld [vmem:[#allocation10 + $0x1208] sm:$0xff]  ;;  %v1849_v5 = vrot.slane %v1832_v63, 2 }
 0x297   : > { %5856 = vmatpush1.bf16.msra.mxu1 %v5855_v9  ;;  %v3410_v9 = vld [vmem:[#allocation10 + $0x10e8] sm:$0xff]  ;;  %v3433_v51 = vld [vmem:[#allocation10 + $0x11a0] sm:$0xff] }
 0x298   : > { %5952 = vmatpush1.bf16.msra.mxu0 %v5951_v60  ;;  %5858 = vmatprep.subr.bf16.mxu1 %v5857_v62  ;;  %v3408_v60 = vld [vmem:[#allocation10 + $0x10d8] sm:$0xff]  ;;  %v1929_v62 = vrot.slane %v1915_v45, 6  ;;  %v5869_v3 = vpack.c.bf16 %v3410_v9, %v3406_v58 }
 0x299   : > { %5954 = vmatprep.subr.bf16.mxu0 %v5953_v2  ;;  %v5963_v2 = vpack.c.bf16 %v3403_v57, %v3399_v53  ;;  %v5965_v19 = vpack.c.bf16 %v3412_v61, %v3408_v60  ;;  %v3432_v45 = vld [vmem:[#allocation10 + $0x1198] sm:$0xff]  ;;  %v3437_v61 = vld [vmem:[#allocation10 + $0x11c0] sm:$0xff] }
 0x29a   : > { %3510 = vmatmul.mubr.f32.vlgmr.msra.gmra.mrb[18].mxu1 %v1845_v27  ;;  %v1931_v17 = vsel %vm1871_vm6, %v1929_v62, %v1930_v56  ;;  %v5977_v53 = vpack.c.bf16 %v3436_v46, %v3432_v45  ;;  %v3442_v56 = vld [vmem:[#allocation10 + $0x11e8] sm:$0xff]  ;;  %v3440_v57 = vld [vmem:[#allocation10 + $0x11d8] sm:$0xff]  ;;  %v3441_v62 = vld [vmem:[#allocation10 + $0x11e0] sm:$0xff] }
 0x29b   : > { %3688 = vmatmul.mubr.f32.vlgmr.msra.gmra.mrb[12].mxu0 %v1845_v27  ;;  %3515 = vmatprep.mubr.f32.mxu1 %v1877_v33  ;;  %v5873_v27 = vpack.c.bf16 %v3418_v22, %v3414_v20  ;;  %v3444_v58 = vld [vmem:[#allocation10 + $0x11f8] sm:$0xff]  ;;  %v3830_v20 = vld [vmem:[#allocation10 + $0x1200] sm:$0xff] }
 0x29c   : > { %5860 = vmatpush1.bf16.msra.mxu1 %v5859_v25  ;;  %3693 = vmatprep.mubr.f32.mxu0 %v1877_v33  ;;  %v5871_v25 = vpack.c.bf16 %v3409_v11, %v3405_v4  ;;  %v3426_v33 = vld [vmem:[#allocation10 + $0x1168] sm:$0xff]  ;;  %v1835_v4 = vld [vmem:[#allocation3 + $0x28] sm:$0x3]  ;;  %v3833_v11 = vld [vmem:[#allocation10 + $0x1218] sm:$0xff] }
 0x29d   : > { %5956 = vmatpush1.bf16.msra.mxu0 %v5955_v39  ;;  %5862 = vmatprep.subr.bf16.mxu1 %v5861_v29  ;;  %v3413_v39 = vld [vmem:[#allocation10 + $0x1100] sm:$0xff]  ;;  %v3415_v29 = vld [vmem:[#allocation10 + $0x1110] sm:$0xff]  ;;  %v5877_v37 = vpack.c.bf16 %v3426_v33, %v3422_v32  ;;  %v1850_v23 = vrot.slane %v1835_v4, 2  ;;  %v6081_v24 = vpack.c.bf16 %v3837_v14, %v3833_v11  ;;  %v1861_v32 = vld [vmem:[#allocation3 + $0x28] sm:$0xc0] }
 0x29e   : > { %3516 = vmatmul.mubr.f32.gmra.mrb[20].mxu1 %v1874_v47  ;;  %5958 = vmatprep.subr.bf16.mxu0 %v5957_v7  ;;  %v3424_v7 = vld [vmem:[#allocation10 + $0x1158] sm:$0xff]  ;;  %v5875_v35 = vpack.c.bf16 %v3417_v28, %v3413_v39  ;;  %v5971_v36 = vpack.c.bf16 %v3419_v31, %v3415_v29  ;;  %v3834_v22 = vld [vmem:[#allocation10 + $0x1220] sm:$0xff]  ;;  %v3843_v39 = vld [vmem:[#allocation10 + $0x1268] sm:$0xff] }
 0x29f   : > { %3694 = vmatmul.mubr.f32.gmra.mrb[14].mxu0 %v1874_v47  ;;  %3521 = vmatprep.mubr.f32.mxu1 %v1904_v54  ;;  %v5973_v41 = vpack.c.bf16 %v3428_v34, %v3424_v7  ;;  %v5879_v47 = vpack.c.bf16 %v3425_v8, %v3421_v38  ;;  %v5987_v28 = vpack.c.bf16 %v3834_v22, %v3830_v20  ;;  %v3841_v29 = vld [vmem:[#allocation10 + $0x1258] sm:$0xff]  ;;  %v3838_v33 = vld [vmem:[#allocation10 + $0x1240] sm:$0xff]  ;;  %v3844_v38 = vld [vmem:[#allocation10 + $0x1270] sm:$0xff] }
 0x2a0   : > { %5864 = vmatpush1.bf16.msra.mxu1 %v5863_v44  ;;  %3699 = vmatprep.mubr.f32.mxu0 %v1904_v54  ;;  %v3434_v44 = vld [vmem:[#allocation10 + $0x11a8] sm:$0xff]  ;;  %v3435_v54 = vld [vmem:[#allocation10 + $0x11b0] sm:$0xff]  ;;  %v3842_v7 = vld [vmem:[#allocation10 + $0x1260] sm:$0xff]  ;;  %v1851_v34 = vsel %vm1842_vm5, %v1849_v5, %v1850_v23 }
 0x2a1   : > { %5960 = vmatpush1.bf16.msra.mxu0 %v5959_v48  ;;  %5866 = vmatprep.subr.bf16.mxu1 %v5865_v50  ;;  %v5975_v48 = vpack.c.bf16 %v3427_v42, %v3423_v40  ;;  %v5881_v49 = vpack.c.bf16 %v3434_v44, %v3430_v43  ;;  %v3429_v50 = vld [vmem:[#allocation10 + $0x1180] sm:$0xff]  ;;  %v5979_v59 = vpack.c.bf16 %v3435_v54, %v3431_v52  ;;  %v1892_v40 = vld [vmem:[#allocation3 + $0x70] sm:$0x3]  ;;  %v1878_v43 = vrot.slane %v1861_v32, 6  ;;  %v3849_v45 = vld [vmem:[#allocation10 + $0x1298] sm:$0xff] }
 0x2a2   : > { %3522 = vmatmul.mubr.f32.gmra.mrb[22].mxu1 %v1901_v1  ;;  %5962 = vmatprep.subr.bf16.mxu0 %v5961_v55  ;;  %v3438_v55 = vld [vmem:[#allocation10 + $0x11c8] sm:$0xff]  ;;  %v5883_v9 = vpack.c.bf16 %v3433_v51, %v3429_v50  ;;  %v5991_v44 = vpack.c.bf16 %v3842_v7, %v3838_v33  ;;  %v3853_v46 = vld [vmem:[#allocation10 + $0x12b8] sm:$0xff]  ;;  %v3850_v50 = vld [vmem:[#allocation10 + $0x12a0] sm:$0xff]  ;;  %v1906_v52 = vrot.slane %v1892_v40, 2 }
 0x2a3   : > { %3700 = vmatmul.mubr.f32.gmra.mrb[16].mxu0 %v1901_v1  ;;  %3527 = vmatprep.mubr.f32.mxu1 %v1931_v17  ;;  %v5885_v60 = vpack.c.bf16 %v3442_v56, %v3438_v55  ;;  %v5981_v1 = vpack.c.bf16 %v3444_v58, %v3440_v57  ;;  %v3851_v42 = vld [vmem:[#allocation10 + $0x12a8] sm:$0xff]  ;;  %v3848_v54 = vld [vmem:[#allocation10 + $0x1290] sm:$0xff]  ;;  %v6089_v57 = vpack.c.bf16 %v3853_v46, %v3849_v45 }
 0x2a4   : > { %5868 = vmatpush1.bf16.msra.mxu1 %v5867_v10  ;;  %3705 = vmatprep.mubr.f32.mxu0 %v1931_v17  ;;  %v3439_v10 = vld [vmem:[#allocation10 + $0x11d0] sm:$0xff]  ;;  %v5887_v17 = vpack.c.bf16 %v3441_v62, %v3437_v61  ;;  %v1919_v58 = vld [vmem:[#allocation3 + $0x88] sm:$0x3f]  ;;  %v3857_v62 = vld [vmem:[#allocation10 + $0x12d8] sm:$0xff] }
 0x2a5   : > { %5964 = vmatpush1.bf16.msra.mxu0 %v5963_v2  ;;  %5870 = vmatprep.subr.bf16.mxu1 %v5869_v3  ;;  %v3443_v2 = vld [vmem:[#allocation10 + $0x11f0] sm:$0xff]  ;;  %v3835_v3 = vld [vmem:[#allocation10 + $0x1228] sm:$0xff]  ;;  %v1933_v11 = vrot.slane %v1919_v58, 6 }
 0x2a6   : > { %3528 = vmatmul.mubr.f32.gmra.mrb[24].mxu1 %v1928_v6  ;;  %5966 = vmatprep.subr.bf16.mxu0 %v5965_v19  ;;  %v5983_v19 = vpack.c.bf16 %v3443_v2, %v3439_v10  ;;  %v5985_v21 = vpack.c.bf16 %v3835_v3, %v3831_v18  ;;  %v3852_v55 = vld [vmem:[#allocation10 + $0x12b0] sm:$0xff]  ;;  %v3861_v10 = vld [vmem:[#allocation10 + $0x12f8] sm:$0xff]  ;;  %v3858_v2 = vld [vmem:[#allocation10 + $0x12e0] sm:$0xff] }
 0x2a7   : > { %3706 = vmatmul.mubr.f32.gmra.mrb[18].mxu0 %v1928_v6  ;;  %3598 = vmatprep.mubr.f32.mxu1 %v6869_v0  ;;  %v3836_v6 = vld [vmem:[#allocation10 + $0x1230] sm:$0xff]  ;;  %v6091_v63 = vpack.c.bf16 %v3852_v55, %v3848_v54  ;;  %v1945_v18 = vld [vmem:[#allocation3 + $0x20] sm:$0x7]  ;;  %v1942_v20 = vld [vmem:[#allocation3 + $0x8] sm:$0xf8] }
 0x2a8   : > { %5872 = vmatpush1.bf16.msra.mxu1 %v5871_v25  ;;  %3776 = vmatprep.mubr.f32.mxu0 %v6869_v0  ;;  %v3832_v25 = vld [vmem:[#allocation10 + $0x1210] sm:$0xff]  ;;  %v3863_v22 = vld [vmem:[#allocation10 + $0x1308] sm:$0xff]  ;;  %v3882_v54 = vld [vmem:[#allocation10 + $0x13a0] sm:$0xff] }
 0x2a9   : > { %5968 = vmatpush1.bf16.msra.mxu0 %v5967_v26  ;;  %5874 = vmatprep.subr.bf16.mxu1 %v5873_v27  ;;  %v1864_v26 = vld [vmem:[#allocation3 + $0x40] sm:$0x3f]  ;;  %v3839_v27 = vld [vmem:[#allocation10 + $0x1248] sm:$0xff]  ;;  %v6083_v31 = vpack.c.bf16 %v3836_v6, %v3832_v25  ;;  %v1916_v56 = vld [vmem:[#allocation3 + $0x70] sm:$0xc0] }
 0x2aa   : > { %5970 = vmatprep.subr.bf16.mxu0 %v5969_v30  ;;  %v3845_v30 = vld [vmem:[#allocation10 + $0x1278] sm:$0xff]  ;;  %v1932_v4 = vrot.slane %v1916_v56, 6  ;;  %v3867_v5 = vld [vmem:[#allocation10 + $0x1328] sm:$0xff]  ;;  %v3868_v32 = vld [vmem:[#allocation10 + $0x1330] sm:$0xff] }
 0x2ab   : > { %v6085_v8 = vpack.c.bf16 %v3845_v30, %v3841_v29  ;;  %v3865_v25 = vld [vmem:[#allocation10 + $0x1318] sm:$0xff]  ;;  %v1957_v30 = vrot.slane %v1942_v20, 3  ;;  %v3871_v33 = vld [vmem:[#allocation10 + $0x1348] sm:$0xff]  ;;  %v3876_v45 = vld [vmem:[#allocation10 + $0x1370] sm:$0xff] }
 0x2ac   : > { %5876 = vmatpush1.bf16.msra.mxu1 %v5875_v35  ;;  %v1879_v35 = vrot.slane %v1864_v26, 6  ;;  %v3869_v6 = vld [vmem:[#allocation10 + $0x1338] sm:$0xff]  ;;  %v1934_v29 = vsel %vm1871_vm6, %v1932_v4, %v1933_v11  ;;  %v3875_v7 = vld [vmem:[#allocation10 + $0x1368] sm:$0xff]  ;;  %v3880_v55 = vld [vmem:[#allocation10 + $0x1390] sm:$0xff] }
 0x2ad   : > { %5972 = vmatpush1.bf16.msra.mxu0 %v5971_v36  ;;  %5878 = vmatprep.subr.bf16.mxu1 %v5877_v37  ;;  %v5989_v36 = vpack.c.bf16 %v3843_v39, %v3839_v27  ;;  %v3840_v37 = vld [vmem:[#allocation10 + $0x1250] sm:$0xff]  ;;  %v3862_v27 = vld [vmem:[#allocation10 + $0x1300] sm:$0xff]  ;;  %v6005_v40 = vpack.c.bf16 %v3875_v7, %v3871_v33  ;;  %v3879_v46 = vld [vmem:[#allocation10 + $0x1388] sm:$0xff] }
 0x2ae   : > { %5974 = vmatprep.subr.bf16.mxu0 %v5973_v41  ;;  %v3847_v41 = vld [vmem:[#allocation10 + $0x1288] sm:$0xff]  ;;  %v1880_v51 = vsel %vm1871_vm6, %v1878_v43, %v1879_v35  ;;  %v3866_v39 = vld [vmem:[#allocation10 + $0x1320] sm:$0xff]  ;;  %v3873_v35 = vld [vmem:[#allocation10 + $0x1358] sm:$0xff] }
 0x2af   : > { %v3872_v43 = vld [vmem:[#allocation10 + $0x1350] sm:$0xff]  ;;  %v3887_v58 = vld [vmem:[#allocation10 + $0x13c8] sm:$0xff] }
 0x2b0   : > { %5880 = vmatpush1.bf16.msra.mxu1 %v5879_v47  ;;  %v6087_v47 = vpack.c.bf16 %v3844_v38, %v3840_v37  ;;  %v6003_v38 = vpack.c.bf16 %v3866_v39, %v3862_v27  ;;  %v3895_v4 = vld [vmem:[#allocation10 + $0x1408] sm:$0xff]  ;;  %v3905_v27 = vld [vmem:[#allocation10 + $0x1458] sm:$0xff]  ;;  %v3904_v33 = vld [vmem:[#allocation10 + $0x1450] sm:$0xff] }
 0x2b1   : > { %5976 = vmatpush1.bf16.msra.mxu0 %v5975_v48  ;;  %5882 = vmatprep.subr.bf16.mxu1 %v5881_v49  ;;  %v1889_v48 = vld [vmem:[#allocation3 + $0x58] sm:$0xfc]  ;;  %v3846_v49 = vld [vmem:[#allocation10 + $0x1280] sm:$0xff]  ;;  %v3899_v11 = vld [vmem:[#allocation10 + $0x1428] sm:$0xff] }
 0x2b2   : > { %5978 = vmatprep.subr.bf16.mxu0 %v5977_v53  ;;  %v5993_v53 = vpack.c.bf16 %v3851_v42, %v3847_v41  ;;  %v5995_v61 = vpack.c.bf16 %v3850_v50, %v3846_v49  ;;  %v3870_v41 = vld [vmem:[#allocation10 + $0x1340] sm:$0xff]  ;;  %v3885_v49 = vld [vmem:[#allocation10 + $0x13b8] sm:$0xff]  ;;  %v6017_v20 = vpack.c.bf16 %v3899_v11, %v3895_v4  ;;  %v3932_v4 = vld [vmem:[#allocation10 + $0x1530] sm:$0xff] }
 0x2b3   : > { %v3874_v42 = vld [vmem:[#allocation10 + $0x1360] sm:$0xff]  ;;  %v3909_v39 = vld [vmem:[#allocation10 + $0x1478] sm:$0xff]  ;;  %v3935_v11 = vld [vmem:[#allocation10 + $0x1548] sm:$0xff] }
 0x2b4   : > { %5884 = vmatpush1.bf16.msra.mxu1 %v5883_v9  ;;  %v3855_v9 = vld [vmem:[#allocation10 + $0x12c8] sm:$0xff]  ;;  %v6007_v50 = vpack.c.bf16 %v3874_v42, %v3870_v41  ;;  %v6117_v7 = vpack.c.bf16 %v3909_v39, %v3905_v27  ;;  %v3910_v42 = vld [vmem:[#allocation10 + $0x1480] sm:$0xff]  ;;  %v3945_v39 = vld [vmem:[#allocation10 + $0x1598] sm:$0xff] }
 0x2b5   : > { %5980 = vmatpush1.bf16.msra.mxu0 %v5979_v59  ;;  %5886 = vmatprep.subr.bf16.mxu1 %v5885_v60  ;;  %v3859_v59 = vld [vmem:[#allocation10 + $0x12e8] sm:$0xff]  ;;  %v1905_v60 = vrot.slane %v1889_v48, 2  ;;  %v3881_v48 = vld [vmem:[#allocation10 + $0x1398] sm:$0xff] }
 0x2b6   : > { %5982 = vmatprep.subr.bf16.mxu0 %v5981_v1  ;;  %v3854_v1 = vld [vmem:[#allocation10 + $0x12c0] sm:$0xff]  ;;  %v5997_v14 = vpack.c.bf16 %v3859_v59, %v3855_v9  ;;  %v6105_v56 = vpack.c.bf16 %v3885_v49, %v3881_v48  ;;  %v3891_v9 = vld [vmem:[#allocation10 + $0x13e8] sm:$0xff]  ;;  %v3889_v59 = vld [vmem:[#allocation10 + $0x13d8] sm:$0xff] }
 0x2b7   : > { %v1907_v3 = vsel %vm1842_vm5, %v1905_v60, %v1906_v52  ;;  %v5999_v23 = vpack.c.bf16 %v3858_v2, %v3854_v1  ;;  %v3893_v60 = vld [vmem:[#allocation10 + $0x13f8] sm:$0xff]  ;;  %v3890_v1 = vld [vmem:[#allocation10 + $0x13e0] sm:$0xff]  ;;  %v3888_v2 = vld [vmem:[#allocation10 + $0x13d0] sm:$0xff] }
 0x2b8   : > { %5888 = vmatpush1.bf16.msra.mxu1 %v5887_v17  ;;  %v3856_v17 = vld [vmem:[#allocation10 + $0x12d0] sm:$0xff]  ;;  %v3923_v48 = vld [vmem:[#allocation10 + $0x14e8] sm:$0xff]  ;;  %v3921_v49 = vld [vmem:[#allocation10 + $0x14d8] sm:$0xff] }
 0x2b9   : > { %5984 = vmatpush1.bf16.msra.mxu0 %v5983_v19  ;;  %5986 = vmatprep.subr.bf16.mxu1 %v5985_v21  ;;  %v3860_v19 = vld [vmem:[#allocation10 + $0x12f0] sm:$0xff]  ;;  %v6093_v21 = vpack.c.bf16 %v3861_v10, %v3857_v62  ;;  %v6013_v10 = vpack.c.bf16 %v3891_v9, %v3887_v58  ;;  %v3927_v9 = vld [vmem:[#allocation10 + $0x1508] sm:$0xff] }
 0x2ba   : > { %6082 = vmatprep.subr.bf16.mxu0 %v6081_v24  ;;  %v1958_v24 = vrot.slane %v1945_v18, 3  ;;  %v6095_v26 = vpack.c.bf16 %v3860_v19, %v3856_v17  ;;  %v6109_v18 = vpack.c.bf16 %v3893_v60, %v3889_v59  ;;  %v3901_v17 = vld [vmem:[#allocation10 + $0x1438] sm:$0xff]  ;;  %v3924_v58 = vld [vmem:[#allocation10 + $0x14f0] sm:$0xff]  ;;  %v3931_v59 = vld [vmem:[#allocation10 + $0x1528] sm:$0xff] }
 0x2bb   : > { %3599 = vmatmul.mubr.f32.vlgmr.msra.gmra.mrb[18].mxu1 %v1851_v34  ;;  %v3929_v60 = vld [vmem:[#allocation10 + $0x1518] sm:$0xff]  ;;  %v3947_v27 = vld [vmem:[#allocation10 + $0x15a8] sm:$0xff] }
 0x2bc   : > { %3777 = vmatmul.mubr.f32.vlgmr.msra.gmra.mrb[12].mxu0 %v1851_v34  ;;  %5988 = vmatpush1.bf16.msra.mxu1 %v5987_v28  ;;  %v3864_v28 = vld [vmem:[#allocation10 + $0x1310] sm:$0xff]  ;;  %v6097_v34 = vpack.c.bf16 %v3869_v6, %v3865_v25  ;;  %v1959_v37 = vsel %vm1953_vm7, %v1957_v30, %v1958_v24  ;;  %v3903_v6 = vld [vmem:[#allocation10 + $0x1448] sm:$0xff] }
 0x2bd   : > { %6084 = vmatpush1.bf16.msra.mxu0 %v6083_v31  ;;  %3604 = vmatprep.mubr.f32.mxu1 %v6869_v0  ;;  %v6001_v31 = vpack.c.bf16 %v3867_v5, %v3863_v22  ;;  %v3894_v22 = vld [vmem:[#allocation10 + $0x1400] sm:$0xff]  ;;  %v3900_v25 = vld [vmem:[#allocation10 + $0x1430] sm:$0xff] }
 0x2be   : > { %3782 = vmatprep.mubr.f32.mxu0 %v6869_v0  ;;  %5990 = vmatprep.subr.bf16.mxu1 %v5989_v36  ;;  %v3877_v36 = vld [vmem:[#allocation10 + $0x1378] sm:$0xff]  ;;  %v3898_v5 = vld [vmem:[#allocation10 + $0x1420] sm:$0xff] }
 0x2bf   : > { %3605 = vmatmul.mubr.f32.gmra.mrb[20].mxu1 %v1880_v51  ;;  %6086 = vmatprep.subr.bf16.mxu0 %v6085_v8  ;;  %v6099_v8 = vpack.c.bf16 %v3868_v32, %v3864_v28  ;;  %v6019_v28 = vpack.c.bf16 %v3898_v5, %v3894_v22  ;;  %v3906_v32 = vld [vmem:[#allocation10 + $0x1460] sm:$0xff] }
 0x2c0   : > { %3783 = vmatmul.mubr.f32.gmra.mrb[14].mxu0 %v1880_v51  ;;  %5992 = vmatpush1.bf16.msra.mxu1 %v5991_v44  ;;  %v6101_v44 = vpack.c.bf16 %v3877_v36, %v3873_v35  ;;  %v6103_v51 = vpack.c.bf16 %v3876_v45, %v3872_v43  ;;  %v3911_v35 = vld [vmem:[#allocation10 + $0x1488] sm:$0xff]  ;;  %v3914_v43 = vld [vmem:[#allocation10 + $0x14a0] sm:$0xff] }
 0x2c1   : > { %6088 = vmatpush1.bf16.msra.mxu0 %v6087_v47  ;;  %3610 = vmatprep.mubr.f32.mxu1 %v6869_v0  ;;  %v3883_v47 = vld [vmem:[#allocation10 + $0x13a8] sm:$0xff]  ;;  %v3934_v5 = vld [vmem:[#allocation10 + $0x1540] sm:$0xff] }
 0x2c2   : > { %3788 = vmatprep.mubr.f32.mxu0 %v6869_v0  ;;  %5994 = vmatprep.subr.bf16.mxu1 %v5993_v53  ;;  %v6009_v52 = vpack.c.bf16 %v3883_v47, %v3879_v46  ;;  %v3878_v53 = vld [vmem:[#allocation10 + $0x1380] sm:$0xff]  ;;  %v3915_v36 = vld [vmem:[#allocation10 + $0x14a8] sm:$0xff]  ;;  %v3916_v46 = vld [vmem:[#allocation10 + $0x14b0] sm:$0xff] }
 0x2c3   : > { %3611 = vmatmul.mubr.f32.gmra.mrb[22].mxu1 %v1907_v3  ;;  %6090 = vmatprep.subr.bf16.mxu0 %v6089_v57  ;;  %v3884_v57 = vld [vmem:[#allocation10 + $0x13b0] sm:$0xff]  ;;  %v6025_v41 = vpack.c.bf16 %v3915_v36, %v3911_v35  ;;  %v3919_v47 = vld [vmem:[#allocation10 + $0x14c8] sm:$0xff] }
 0x2c4   : > { %3789 = vmatmul.mubr.f32.gmra.mrb[16].mxu0 %v1907_v3  ;;  %5996 = vmatpush1.bf16.msra.mxu1 %v5995_v61  ;;  %v6011_v61 = vpack.c.bf16 %v3882_v54, %v3878_v53  ;;  %v6107_v62 = vpack.c.bf16 %v3884_v57, %v3880_v55  ;;  %v3892_v3 = vld [vmem:[#allocation10 + $0x13f0] sm:$0xff]  ;;  %v6029_v53 = vpack.c.bf16 %v3923_v48, %v3919_v47  ;;  %v3918_v54 = vld [vmem:[#allocation10 + $0x14c0] sm:$0xff]  ;;  %v3951_v36 = vld [vmem:[#allocation10 + $0x15c8] sm:$0xff] }
 0x2c5   : > { %6092 = vmatpush1.bf16.msra.mxu0 %v6091_v63  ;;  %3616 = vmatprep.mubr.f32.mxu1 %v6869_v0  ;;  %v3886_v63 = vld [vmem:[#allocation10 + $0x13c0] sm:$0xff]  ;;  %v3948_v35 = vld [vmem:[#allocation10 + $0x15b0] sm:$0xff]  ;;  %v3959_v48 = vld [vmem:[#allocation10 + $0x1608] sm:$0xff] }
 0x2c6   : > { %3794 = vmatprep.mubr.f32.mxu0 %v6869_v0  ;;  %5998 = vmatprep.subr.bf16.mxu1 %v5997_v14  ;;  %v3897_v14 = vld [vmem:[#allocation10 + $0x1418] sm:$0xff]  ;;  %v6015_v19 = vpack.c.bf16 %v3890_v1, %v3886_v63  ;;  %v3922_v55 = vld [vmem:[#allocation10 + $0x14e0] sm:$0xff]  ;;  %v6033_v63 = vpack.c.bf16 %v3931_v59, %v3927_v9  ;;  %v3956_v47 = vld [vmem:[#allocation10 + $0x15f0] sm:$0xff] }
 0x2c7   : > { %3617 = vmatmul.mubr.f32.gmra.mrb[24].mxu1 %v1934_v29  ;;  %6094 = vmatprep.subr.bf16.mxu0 %v6093_v21  ;;  %v6111_v21 = vpack.c.bf16 %v3892_v3, %v3888_v2  ;;  %v6113_v24 = vpack.c.bf16 %v3901_v17, %v3897_v14  ;;  %v3926_v1 = vld [vmem:[#allocation10 + $0x1500] sm:$0xff]  ;;  %v3939_v14 = vld [vmem:[#allocation10 + $0x1568] sm:$0xff]  ;;  %v3937_v17 = vld [vmem:[#allocation10 + $0x1558] sm:$0xff] }
 0x2c8   : > { %3795 = vmatmul.mubr.f32.gmra.mrb[18].mxu0 %v1934_v29  ;;  %6000 = vmatpush1.bf16.msra.mxu1 %v5999_v23  ;;  %v3896_v23 = vld [vmem:[#allocation10 + $0x1410] sm:$0xff]  ;;  %v3930_v2 = vld [vmem:[#allocation10 + $0x1520] sm:$0xff]  ;;  %v6037_v22 = vpack.c.bf16 %v3939_v14, %v3935_v11  ;;  %v3969_v11 = vld [vmem:[#allocation10 + $0x1658] sm:$0xff] }
 0x2c9   : > { %4086 = vmatprep.mubr.f32.mxu1 %v1959_v37  ;;  %6096 = vmatpush1.bf16.msra.mxu0 %v6095_v26  ;;  %v3907_v26 = vld [vmem:[#allocation10 + $0x1468] sm:$0xff]  ;;  %v6115_v29 = vpack.c.bf16 %v3900_v25, %v3896_v23  ;;  %v3938_v23 = vld [vmem:[#allocation10 + $0x1560] sm:$0xff]  ;;  %v3973_v14 = vld [vmem:[#allocation10 + $0x1678] sm:$0xff] }
 0x2ca   : > { %4264 = vmatprep.mubr.f32.mxu0 %v1959_v37  ;;  %6002 = vmatprep.subr.bf16.mxu1 %v6001_v31  ;;  %v6021_v30 = vpack.c.bf16 %v3907_v26, %v3903_v6  ;;  %v3902_v31 = vld [vmem:[#allocation10 + $0x1440] sm:$0xff]  ;;  %v3913_v37 = vld [vmem:[#allocation10 + $0x1498] sm:$0xff]  ;;  %v3940_v6 = vld [vmem:[#allocation10 + $0x1570] sm:$0xff] }
 0x2cb   : > { %6098 = vmatprep.subr.bf16.mxu0 %v6097_v34  ;;  %v3908_v34 = vld [vmem:[#allocation10 + $0x1470] sm:$0xff]  ;;  %v3943_v26 = vld [vmem:[#allocation10 + $0x1588] sm:$0xff] }
 0x2cc   : > { %6004 = vmatpush1.bf16.msra.mxu1 %v6003_v38  ;;  %v3917_v38 = vld [vmem:[#allocation10 + $0x14b8] sm:$0xff]  ;;  %v1973_v9 = vld [vmem:[#allocation3 + $0x30] sm:$0x7f] }
 0x2cd   : > { %6100 = vmatpush1.bf16.msra.mxu0 %v6099_v8  ;;  %6006 = vmatprep.subr.bf16.mxu1 %v6005_v40  ;;  %v6023_v8 = vpack.c.bf16 %v3906_v32, %v3902_v31  ;;  %v6119_v40 = vpack.c.bf16 %v3908_v34, %v3904_v33  ;;  %v6121_v45 = vpack.c.bf16 %v3917_v38, %v3913_v37  ;;  %v3942_v32 = vld [vmem:[#allocation10 + $0x1580] sm:$0xff]  ;;  %v3955_v37 = vld [vmem:[#allocation10 + $0x15e8] sm:$0xff]  ;;  %v3953_v38 = vld [vmem:[#allocation10 + $0x15d8] sm:$0xff] }
 0x2ce   : > { %6102 = vmatprep.subr.bf16.mxu0 %v6101_v44  ;;  %v3912_v44 = vld [vmem:[#allocation10 + $0x1490] sm:$0xff]  ;;  %v6041_v31 = vpack.c.bf16 %v3947_v27, %v3943_v26  ;;  %v3946_v33 = vld [vmem:[#allocation10 + $0x15a0] sm:$0xff] }
 0x2cf   : > { %v3970_v26 = vld [vmem:[#allocation10 + $0x1660] sm:$0xff]  ;;  %v3968_v27 = vld [vmem:[#allocation10 + $0x1650] sm:$0xff] }
 0x2d0   : > { %6008 = vmatpush1.bf16.msra.mxu1 %v6007_v50  ;;  %v3925_v50 = vld [vmem:[#allocation10 + $0x14f8] sm:$0xff] }
 0x2d1   : > { %6104 = vmatpush1.bf16.msra.mxu0 %v6103_v51  ;;  %6010 = vmatprep.subr.bf16.mxu1 %v6009_v52  ;;  %v6027_v51 = vpack.c.bf16 %v3914_v43, %v3910_v42  ;;  %v6123_v52 = vpack.c.bf16 %v3916_v46, %v3912_v44  ;;  %v6125_v57 = vpack.c.bf16 %v3925_v50, %v3921_v49  ;;  %v3950_v43 = vld [vmem:[#allocation10 + $0x15c0] sm:$0xff]  ;;  %v3963_v49 = vld [vmem:[#allocation10 + $0x1628] sm:$0xff]  ;;  %v1944_v50 = vld [vmem:[#allocation3 + $0x18] sm:$0x7] }
 0x2d2   : > { %6106 = vmatprep.subr.bf16.mxu0 %v6105_v56  ;;  %v3920_v56 = vld [vmem:[#allocation10 + $0x14d0] sm:$0xff]  ;;  %v6045_v42 = vpack.c.bf16 %v3955_v37, %v3951_v36  ;;  %v3954_v44 = vld [vmem:[#allocation10 + $0x15e0] sm:$0xff]  ;;  %v1955_v59 = vrot.slane %v1944_v50, 3 }
 0x2d3   : > { %v2029_v36 = vld [vmem:[#allocation3 + $0x80] sm:$0x7f] }
 0x2d4   : > { %6012 = vmatpush1.bf16.msra.mxu1 %v6011_v61  ;;  %v3933_v61 = vld [vmem:[#allocation10 + $0x1538] sm:$0xff]  ;;  %v2041_v50 = vrot.slane %v2029_v36, 7  ;;  %v4004_v36 = vld [vmem:[#allocation10 + $0x1770] sm:$0xff] }
 0x2d5   : > { %6108 = vmatpush1.bf16.msra.mxu0 %v6107_v62  ;;  %6014 = vmatprep.subr.bf16.mxu1 %v6013_v10  ;;  %v6031_v62 = vpack.c.bf16 %v3922_v55, %v3918_v54  ;;  %v6127_v10 = vpack.c.bf16 %v3924_v58, %v3920_v56  ;;  %v6129_v3 = vpack.c.bf16 %v3933_v61, %v3929_v60  ;;  %v1974_v54 = vld [vmem:[#allocation3 + $0x38] sm:$0x7f]  ;;  %v1941_v56 = vld [vmem:[#allocation3] sm:$0xf8] }
 0x2d6   : > { %6110 = vmatprep.subr.bf16.mxu0 %v6109_v18  ;;  %v3928_v18 = vld [vmem:[#allocation10 + $0x1510] sm:$0xff]  ;;  %v1971_v58 = vld [vmem:[#allocation3 + $0x20] sm:$0x80] }
 0x2d7   : > { %v3958_v61 = vld [vmem:[#allocation10 + $0x1600] sm:$0xff] }
 0x2d8   : > { %6016 = vmatpush1.bf16.msra.mxu1 %v6015_v19  ;;  %v3941_v19 = vld [vmem:[#allocation10 + $0x1578] sm:$0xff] }
 0x2d9   : > { %6112 = vmatpush1.bf16.msra.mxu0 %v6111_v21  ;;  %6018 = vmatprep.subr.bf16.mxu1 %v6017_v20  ;;  %v6035_v21 = vpack.c.bf16 %v3930_v2, %v3926_v1  ;;  %v6131_v20 = vpack.c.bf16 %v3932_v4, %v3928_v18  ;;  %v6133_v25 = vpack.c.bf16 %v3941_v19, %v3937_v17  ;;  %v3964_v1 = vld [vmem:[#allocation10 + $0x1630] sm:$0xff]  ;;  %v1970_v2 = vld [vmem:[#allocation3 + $0x18] sm:$0x80]  ;;  %v3967_v18 = vld [vmem:[#allocation10 + $0x1648] sm:$0xff]  ;;  %v1954_v4 = vrot.slane %v1941_v56, 3 }
 0x2da   : > { %6114 = vmatprep.subr.bf16.mxu0 %v6113_v24  ;;  %v3936_v24 = vld [vmem:[#allocation10 + $0x1550] sm:$0xff]  ;;  %v2002_v17 = vld [vmem:[#allocation3 + $0x68] sm:$0x7]  ;;  %v1986_v19 = vrot.slane %v1971_v58, 7  ;;  %v3989_v56 = vld [vmem:[#allocation10 + $0x16f8] sm:$0xff] }
 0x2dc   : > { %6020 = vmatpush1.bf16.msra.mxu1 %v6019_v28  ;;  %v3949_v28 = vld [vmem:[#allocation10 + $0x15b8] sm:$0xff] }
 0x2dd   : > { %6116 = vmatpush1.bf16.msra.mxu0 %v6115_v29  ;;  %6022 = vmatprep.subr.bf16.mxu1 %v6021_v30  ;;  %v6039_v29 = vpack.c.bf16 %v3938_v23, %v3934_v5  ;;  %v6135_v30 = vpack.c.bf16 %v3940_v6, %v3936_v24  ;;  %v6137_v34 = vpack.c.bf16 %v3949_v28, %v3945_v39  ;;  %v1984_v24 = vrot.slane %v1973_v9, 7  ;;  %v3966_v6 = vld [vmem:[#allocation10 + $0x1640] sm:$0xff] }
 0x2de   : > { %6118 = vmatprep.subr.bf16.mxu0 %v6117_v7  ;;  %v3944_v7 = vld [vmem:[#allocation10 + $0x1590] sm:$0xff]  ;;  %v1956_v5 = vsel %vm1953_vm7, %v1954_v4, %v1955_v59  ;;  %v6149_v28 = vpack.c.bf16 %v3973_v14, %v3969_v11  ;;  %v2025_v9 = vld [vmem:[#allocation3 + $0x60] sm:$0x80]  ;;  %v3991_v4 = vld [vmem:[#allocation10 + $0x1708] sm:$0xff] }
 0x2df   : > { %v3995_v11 = vld [vmem:[#allocation10 + $0x1728] sm:$0xff]  ;;  %v2037_v14 = vrot.slane %v2025_v9, 7 }
 0x2e0   : > { %6024 = vmatpush1.bf16.msra.mxu1 %v6023_v8  ;;  %v3957_v8 = vld [vmem:[#allocation10 + $0x15f8] sm:$0xff]  ;;  %v1943_v9 = vld [vmem:[#allocation3 + $0x10] sm:$0xf8] }
 0x2e1   : > { %6120 = vmatpush1.bf16.msra.mxu0 %v6119_v40  ;;  %6026 = vmatprep.subr.bf16.mxu1 %v6025_v41  ;;  %v6043_v40 = vpack.c.bf16 %v3946_v33, %v3942_v32  ;;  %v6139_v41 = vpack.c.bf16 %v3948_v35, %v3944_v7  ;;  %v6141_v46 = vpack.c.bf16 %v3957_v8, %v3953_v38  ;;  %v3975_v32 = vld [vmem:[#allocation10 + $0x1688] sm:$0xff]  ;;  %v1983_v7 = vrot.slane %v1970_v2, 7  ;;  %v3981_v35 = vld [vmem:[#allocation10 + $0x16b8] sm:$0xff] }
 0x2e2   : > { %6122 = vmatprep.subr.bf16.mxu0 %v6121_v45  ;;  %v3952_v45 = vld [vmem:[#allocation10 + $0x15d0] sm:$0xff]  ;;  %v3979_v33 = vld [vmem:[#allocation10 + $0x16a8] sm:$0xff]  ;;  %v6055_v38 = vpack.c.bf16 %v3970_v26, %v3966_v6 }
 0x2e3   : > { %v6143_v55 = vpack.c.bf16 %v3956_v47, %v3952_v45  ;;  %v2026_v8 = vld [vmem:[#allocation3 + $0x68] sm:$0x80]  ;;  %v3974_v45 = vld [vmem:[#allocation10 + $0x1680] sm:$0xff]  ;;  %v3976_v47 = vld [vmem:[#allocation10 + $0x1690] sm:$0xff] }
 0x2e4   : > { %6028 = vmatpush1.bf16.msra.mxu1 %v6027_v51  ;;  %v3961_v51 = vld [vmem:[#allocation10 + $0x1618] sm:$0xff]  ;;  %v3996_v26 = vld [vmem:[#allocation10 + $0x1730] sm:$0xff] }
 0x2e5   : > { %6124 = vmatpush1.bf16.msra.mxu0 %v6123_v52  ;;  %6030 = vmatprep.subr.bf16.mxu1 %v6029_v53  ;;  %v3965_v52 = vld [vmem:[#allocation10 + $0x1638] sm:$0xff]  ;;  %v6047_v53 = vpack.c.bf16 %v3954_v44, %v3950_v43  ;;  %v6057_v44 = vpack.c.bf16 %v3979_v33, %v3975_v32  ;;  %v3998_v33 = vld [vmem:[#allocation10 + $0x1740] sm:$0xff] }
 0x2e6   : > { %6126 = vmatprep.subr.bf16.mxu0 %v6125_v57  ;;  %v6049_v57 = vpack.c.bf16 %v3963_v49, %v3959_v48  ;;  %v6145_v60 = vpack.c.bf16 %v3965_v52, %v3961_v51  ;;  %v3980_v51 = vld [vmem:[#allocation10 + $0x16b0] sm:$0xff]  ;;  %v3983_v52 = vld [vmem:[#allocation10 + $0x16c8] sm:$0xff] }
 0x2e8   : > { %6032 = vmatpush1.bf16.msra.mxu1 %v6031_v62  ;;  %v3962_v62 = vld [vmem:[#allocation10 + $0x1620] sm:$0xff] }
 0x2e9   : > { %6128 = vmatpush1.bf16.msra.mxu0 %v6127_v10  ;;  %6034 = vmatprep.subr.bf16.mxu1 %v6033_v63  ;;  %v3960_v10 = vld [vmem:[#allocation10 + $0x1610] sm:$0xff]  ;;  %v1987_v63 = vrot.slane %v1974_v54, 7 }
 0x2ea   : > { %6130 = vmatprep.subr.bf16.mxu0 %v6129_v3  ;;  %v3971_v3 = vld [vmem:[#allocation10 + $0x1668] sm:$0xff]  ;;  %v6147_v23 = vpack.c.bf16 %v3964_v1, %v3960_v10  ;;  %v3982_v10 = vld [vmem:[#allocation10 + $0x16c0] sm:$0xff]  ;;  %v3984_v1 = vld [vmem:[#allocation10 + $0x16d0] sm:$0xff] }
 0x2eb   : > { %v1988_v39 = vsel %vm1982_vm8, %v1986_v19, %v1987_v63  ;;  %v3986_v63 = vld [vmem:[#allocation10 + $0x16e0] sm:$0xff]  ;;  %v3997_v19 = vld [vmem:[#allocation10 + $0x1738] sm:$0xff] }
 0x2ec   : > { %6036 = vmatpush1.bf16.msra.mxu1 %v6035_v21  ;;  %v6051_v21 = vpack.c.bf16 %v3962_v62, %v3958_v61 }
 0x2ed   : > { %6132 = vmatpush1.bf16.msra.mxu0 %v6131_v20  ;;  %6038 = vmatprep.subr.bf16.mxu1 %v6037_v22  ;;  %v1999_v20 = vld [vmem:[#allocation3 + $0x50] sm:$0xf8]  ;;  %v2001_v22 = vld [vmem:[#allocation3 + $0x60] sm:$0x7] }
 0x2ee   : > { %6134 = vmatprep.subr.bf16.mxu0 %v6133_v25  ;;  %v6053_v25 = vpack.c.bf16 %v3971_v3, %v3967_v18  ;;  %v2013_v37 = vrot.slane %v1999_v20, 3  ;;  %v2011_v43 = vrot.slane %v2001_v22, 3  ;;  %v3988_v3 = vld [vmem:[#allocation10 + $0x16f0] sm:$0xff] }
 0x2ef   : > { %v6159_v22 = vpack.c.bf16 %v3988_v3, %v3984_v1  ;;  %v4414_v1 = vld [vmem:[#allocation10 + $0x1838] sm:$0xff] }
 0x2f0   : > { %6040 = vmatpush1.bf16.msra.mxu1 %v6039_v29  ;;  %v2014_v29 = vrot.slane %v2002_v17, 3  ;;  %v3993_v17 = vld [vmem:[#allocation10 + $0x1718] sm:$0xff] }
 0x2f1   : > { %6136 = vmatpush1.bf16.msra.mxu0 %v6135_v30  ;;  %6042 = vmatprep.subr.bf16.mxu1 %v6041_v31  ;;  %v3972_v30 = vld [vmem:[#allocation10 + $0x1670] sm:$0xff]  ;;  %v1998_v31 = vld [vmem:[#allocation3 + $0x48] sm:$0xf8]  ;;  %v6161_v6 = vpack.c.bf16 %v3997_v19, %v3993_v17 }
 0x2f2   : > { %6138 = vmatprep.subr.bf16.mxu0 %v6137_v34  ;;  %v3977_v34 = vld [vmem:[#allocation10 + $0x1698] sm:$0xff]  ;;  %v2015_v48 = vsel %vm1953_vm7, %v2013_v37, %v2014_v29  ;;  %v2010_v54 = vrot.slane %v1998_v31, 3  ;;  %v4007_v37 = vld [vmem:[#allocation10 + $0x1788] sm:$0xff] }
 0x2f3   : > { %v6153_v49 = vpack.c.bf16 %v3981_v35, %v3977_v34  ;;  %v4005_v29 = vld [vmem:[#allocation10 + $0x1778] sm:$0xff]  ;;  %v4000_v34 = vld [vmem:[#allocation10 + $0x1750] sm:$0xff] }
 0x2f4   : > { %6044 = vmatpush1.bf16.msra.mxu1 %v6043_v40  ;;  %v2028_v40 = vld [vmem:[#allocation3 + $0x78] sm:$0x7f]  ;;  %v2012_v59 = vsel %vm1953_vm7, %v2010_v54, %v2011_v43 }
 0x2f5   : > { %6140 = vmatpush1.bf16.msra.mxu0 %v6139_v41  ;;  %6046 = vmatprep.subr.bf16.mxu1 %v6045_v42  ;;  %v1985_v41 = vsel %vm1982_vm8, %v1983_v7, %v1984_v24  ;;  %v6151_v42 = vpack.c.bf16 %v3972_v30, %v3968_v27  ;;  %v2038_v61 = vrot.slane %v2028_v40, 7  ;;  %v3994_v24 = vld [vmem:[#allocation10 + $0x1720] sm:$0xff]  ;;  %v3999_v27 = vld [vmem:[#allocation10 + $0x1748] sm:$0xff]  ;;  %v4013_v40 = vld [vmem:[#allocation10 + $0x17b8] sm:$0xff] }
 0x2f6   : > { %6142 = vmatprep.subr.bf16.mxu0 %v6141_v46  ;;  %v3978_v46 = vld [vmem:[#allocation10 + $0x16a0] sm:$0xff] }
 0x2f7   : > { %v6059_v58 = vpack.c.bf16 %v3978_v46, %v3974_v45  ;;  %v2039_v20 = vsel %vm1982_vm8, %v2037_v14, %v2038_v61  ;;  %v4002_v7 = vld [vmem:[#allocation10 + $0x1760] sm:$0xff]  ;;  %v4008_v46 = vld [vmem:[#allocation10 + $0x1790] sm:$0xff]  ;;  %v4408_v61 = vld [vmem:[#allocation10 + $0x1808] sm:$0xff]  ;;  %v1960_v14 = vrot.slane %v1943_v9, 3 }
 0x2f8   : > { %6048 = vmatpush1.bf16.msra.mxu1 %v6047_v53  ;;  %v3987_v53 = vld [vmem:[#allocation10 + $0x16e8] sm:$0xff]  ;;  %v4010_v45 = vld [vmem:[#allocation10 + $0x17a0] sm:$0xff] }
 0x2f9   : > { %6144 = vmatpush1.bf16.msra.mxu0 %v6143_v55  ;;  %6050 = vmatprep.subr.bf16.mxu1 %v6049_v57  ;;  %v3985_v55 = vld [vmem:[#allocation10 + $0x16d8] sm:$0xff]  ;;  %v2040_v57 = vrot.slane %v2026_v8, 7  ;;  %v6061_v62 = vpack.c.bf16 %v3987_v53, %v3983_v52 }
 0x2fa   : > { %6146 = vmatprep.subr.bf16.mxu0 %v6145_v60  ;;  %v6155_v60 = vpack.c.bf16 %v3980_v51, %v3976_v47  ;;  %v6157_v18 = vpack.c.bf16 %v3989_v56, %v3985_v55  ;;  %v4009_v8 = vld [vmem:[#allocation10 + $0x1798] sm:$0xff]  ;;  %v4014_v56 = vld [vmem:[#allocation10 + $0x17c0] sm:$0xff] }
 0x2fb   : > { %4087 = vmatmul.mubr.f32.vlgmr.msra.gmra.mrb[18].mxu1 %v1956_v5  ;;  %v2042_v2 = vsel %vm1982_vm8, %v2040_v57, %v2041_v50  ;;  %v6169_v47 = vpack.c.bf16 %v4013_v40, %v4009_v8  ;;  %v4019_v50 = vld [vmem:[#allocation10 + $0x17e8] sm:$0xff]  ;;  %v4017_v51 = vld [vmem:[#allocation10 + $0x17d8] sm:$0xff]  ;;  %v4018_v57 = vld [vmem:[#allocation10 + $0x17e0] sm:$0xff] }
 0x2fc   : > { %4265 = vmatmul.mubr.f32.vlgmr.msra.gmra.mrb[12].mxu0 %v1956_v5  ;;  %4092 = vmatprep.mubr.f32.mxu1 %v1988_v39  ;;  %v6065_v5 = vpack.c.bf16 %v3995_v11, %v3991_v4  ;;  %v4021_v52 = vld [vmem:[#allocation10 + $0x17f8] sm:$0xff]  ;;  %v4407_v4 = vld [vmem:[#allocation10 + $0x1800] sm:$0xff] }
 0x2fd   : > { %6052 = vmatpush1.bf16.msra.mxu1 %v6051_v21  ;;  %4270 = vmatprep.mubr.f32.mxu0 %v1988_v39  ;;  %v6063_v21 = vpack.c.bf16 %v3986_v63, %v3982_v10  ;;  %v4003_v39 = vld [vmem:[#allocation10 + $0x1768] sm:$0xff]  ;;  %v1946_v10 = vld [vmem:[#allocation3 + $0x28] sm:$0x7]  ;;  %v4410_v63 = vld [vmem:[#allocation10 + $0x1818] sm:$0xff] }
 0x2fe   : > { %6148 = vmatpush1.bf16.msra.mxu0 %v6147_v23  ;;  %6054 = vmatprep.subr.bf16.mxu1 %v6053_v25  ;;  %v3990_v23 = vld [vmem:[#allocation10 + $0x1700] sm:$0xff]  ;;  %v3992_v25 = vld [vmem:[#allocation10 + $0x1710] sm:$0xff]  ;;  %v6069_v32 = vpack.c.bf16 %v4003_v39, %v3999_v27  ;;  %v1961_v17 = vrot.slane %v1946_v10, 3  ;;  %v6273_v19 = vpack.c.bf16 %v4414_v1, %v4410_v63  ;;  %v1972_v27 = vld [vmem:[#allocation3 + $0x28] sm:$0x80] }
 0x2ff   : > { %4093 = vmatmul.mubr.f32.gmra.mrb[20].mxu1 %v1985_v41  ;;  %6150 = vmatprep.subr.bf16.mxu0 %v6149_v28  ;;  %v4001_v28 = vld [vmem:[#allocation10 + $0x1758] sm:$0xff]  ;;  %v6067_v30 = vpack.c.bf16 %v3994_v24, %v3990_v23  ;;  %v6163_v31 = vpack.c.bf16 %v3996_v26, %v3992_v25  ;;  %v4411_v11 = vld [vmem:[#allocation10 + $0x1820] sm:$0xff]  ;;  %v4420_v23 = vld [vmem:[#allocation10 + $0x1868] sm:$0xff] }
 0x300   : > { %4271 = vmatmul.mubr.f32.gmra.mrb[14].mxu0 %v1985_v41  ;;  %4098 = vmatprep.mubr.f32.mxu1 %v2015_v48  ;;  %v6165_v35 = vpack.c.bf16 %v4005_v29, %v4001_v28  ;;  %v6071_v41 = vpack.c.bf16 %v4002_v7, %v3998_v33  ;;  %v6179_v24 = vpack.c.bf16 %v4411_v11, %v4407_v4  ;;  %v4418_v25 = vld [vmem:[#allocation10 + $0x1858] sm:$0xff]  ;;  %v4415_v39 = vld [vmem:[#allocation10 + $0x1840] sm:$0xff]  ;;  %v4421_v33 = vld [vmem:[#allocation10 + $0x1870] sm:$0xff] }
 0x301   : > { %6056 = vmatpush1.bf16.msra.mxu1 %v6055_v38  ;;  %4276 = vmatprep.mubr.f32.mxu0 %v2015_v48  ;;  %v4011_v38 = vld [vmem:[#allocation10 + $0x17a8] sm:$0xff]  ;;  %v4012_v48 = vld [vmem:[#allocation10 + $0x17b0] sm:$0xff]  ;;  %v4419_v28 = vld [vmem:[#allocation10 + $0x1860] sm:$0xff]  ;;  %v1962_v29 = vsel %vm1953_vm7, %v1960_v14, %v1961_v17 }
 0x302   : > { %6152 = vmatpush1.bf16.msra.mxu0 %v6151_v42  ;;  %6058 = vmatprep.subr.bf16.mxu1 %v6057_v44  ;;  %v6167_v42 = vpack.c.bf16 %v4004_v36, %v4000_v34  ;;  %v6073_v43 = vpack.c.bf16 %v4011_v38, %v4007_v37  ;;  %v4006_v44 = vld [vmem:[#allocation10 + $0x1780] sm:$0xff]  ;;  %v6171_v54 = vpack.c.bf16 %v4012_v48, %v4008_v46  ;;  %v2003_v34 = vld [vmem:[#allocation3 + $0x70] sm:$0x7]  ;;  %v1989_v37 = vrot.slane %v1972_v27, 7  ;;  %v4426_v8 = vld [vmem:[#allocation10 + $0x1898] sm:$0xff] }
 0x303   : > { %4099 = vmatmul.mubr.f32.gmra.mrb[22].mxu1 %v2012_v59  ;;  %6154 = vmatprep.subr.bf16.mxu0 %v6153_v49  ;;  %v4015_v49 = vld [vmem:[#allocation10 + $0x17c8] sm:$0xff]  ;;  %v6075_v53 = vpack.c.bf16 %v4010_v45, %v4006_v44  ;;  %v6183_v38 = vpack.c.bf16 %v4419_v28, %v4415_v39  ;;  %v4430_v40 = vld [vmem:[#allocation10 + $0x18b8] sm:$0xff]  ;;  %v4427_v44 = vld [vmem:[#allocation10 + $0x18a0] sm:$0xff]  ;;  %v2017_v46 = vrot.slane %v2003_v34, 3 }
 0x304   : > { %4277 = vmatmul.mubr.f32.gmra.mrb[16].mxu0 %v2012_v59  ;;  %4104 = vmatprep.mubr.f32.mxu1 %v2042_v2  ;;  %v6077_v55 = vpack.c.bf16 %v4019_v50, %v4015_v49  ;;  %v6173_v59 = vpack.c.bf16 %v4021_v52, %v4017_v51  ;;  %v4428_v36 = vld [vmem:[#allocation10 + $0x18a8] sm:$0xff]  ;;  %v4425_v48 = vld [vmem:[#allocation10 + $0x1890] sm:$0xff]  ;;  %v6281_v51 = vpack.c.bf16 %v4430_v40, %v4426_v8 }
 0x305   : > { %6060 = vmatpush1.bf16.msra.mxu1 %v6059_v58  ;;  %4282 = vmatprep.mubr.f32.mxu0 %v2042_v2  ;;  %v4016_v58 = vld [vmem:[#allocation10 + $0x17d0] sm:$0xff]  ;;  %v6079_v2 = vpack.c.bf16 %v4018_v57, %v4014_v56  ;;  %v2030_v52 = vld [vmem:[#allocation3 + $0x88] sm:$0x7f]  ;;  %v4434_v57 = vld [vmem:[#allocation10 + $0x18d8] sm:$0xff] }
 0x306   : > { %6156 = vmatpush1.bf16.msra.mxu0 %v6155_v60  ;;  %6062 = vmatprep.subr.bf16.mxu1 %v6061_v62  ;;  %v4020_v60 = vld [vmem:[#allocation10 + $0x17f0] sm:$0xff]  ;;  %v4412_v62 = vld [vmem:[#allocation10 + $0x1828] sm:$0xff]  ;;  %v2044_v63 = vrot.slane %v2030_v52, 7 }
 0x307   : > { %4105 = vmatmul.mubr.f32.gmra.mrb[24].mxu1 %v2039_v20  ;;  %6158 = vmatprep.subr.bf16.mxu0 %v6157_v18  ;;  %v6175_v18 = vpack.c.bf16 %v4020_v60, %v4016_v58  ;;  %v6177_v3 = vpack.c.bf16 %v4412_v62, %v4408_v61  ;;  %v4429_v49 = vld [vmem:[#allocation10 + $0x18b0] sm:$0xff]  ;;  %v4438_v58 = vld [vmem:[#allocation10 + $0x18f8] sm:$0xff]  ;;  %v4435_v60 = vld [vmem:[#allocation10 + $0x18e0] sm:$0xff] }
 0x308   : > { %4283 = vmatmul.mubr.f32.gmra.mrb[18].mxu0 %v2039_v20  ;;  %4175 = vmatprep.mubr.f32.mxu1 %v6869_v0  ;;  %v4413_v20 = vld [vmem:[#allocation10 + $0x1830] sm:$0xff]  ;;  %v6283_v9 = vpack.c.bf16 %v4429_v49, %v4425_v48  ;;  %v2056_v61 = vld [vmem:[#allocation3 + $0x20] sm:$0xf]  ;;  %v2053_v4 = vld [vmem:[#allocation3 + $0x8] sm:$0xf0] }
 0x309   : > { %6064 = vmatpush1.bf16.msra.mxu1 %v6063_v21  ;;  %4353 = vmatprep.mubr.f32.mxu0 %v6869_v0  ;;  %v4409_v21 = vld [vmem:[#allocation10 + $0x1810] sm:$0xff]  ;;  %v4440_v11 = vld [vmem:[#allocation10 + $0x1908] sm:$0xff]  ;;  %v4459_v48 = vld [vmem:[#allocation10 + $0x19a0] sm:$0xff] }
 0x30a   : > { %6160 = vmatpush1.bf16.msra.mxu0 %v6159_v22  ;;  %6066 = vmatprep.subr.bf16.mxu1 %v6065_v5  ;;  %v1975_v22 = vld [vmem:[#allocation3 + $0x40] sm:$0x7f]  ;;  %v4416_v5 = vld [vmem:[#allocation10 + $0x1848] sm:$0xff]  ;;  %v6275_v26 = vpack.c.bf16 %v4413_v20, %v4409_v21  ;;  %v2027_v50 = vld [vmem:[#allocation3 + $0x70] sm:$0x80] }
 0x30b   : > { %6162 = vmatprep.subr.bf16.mxu0 %v6161_v6  ;;  %v4422_v6 = vld [vmem:[#allocation10 + $0x1878] sm:$0xff]  ;;  %v2043_v10 = vrot.slane %v2027_v50, 7  ;;  %v4444_v14 = vld [vmem:[#allocation10 + $0x1928] sm:$0xff]  ;;  %v4445_v27 = vld [vmem:[#allocation10 + $0x1930] sm:$0xff] }
 0x30c   : > { %v6277_v7 = vpack.c.bf16 %v4422_v6, %v4418_v25  ;;  %v4442_v21 = vld [vmem:[#allocation10 + $0x1918] sm:$0xff]  ;;  %v2067_v6 = vrot.slane %v2053_v4, 4  ;;  %v4448_v39 = vld [vmem:[#allocation10 + $0x1948] sm:$0xff]  ;;  %v4453_v8 = vld [vmem:[#allocation10 + $0x1970] sm:$0xff] }
 0x30d   : > { %6068 = vmatpush1.bf16.msra.mxu1 %v6067_v30  ;;  %v1990_v30 = vrot.slane %v1975_v22, 7  ;;  %v4446_v20 = vld [vmem:[#allocation10 + $0x1938] sm:$0xff]  ;;  %v2045_v25 = vsel %vm1982_vm8, %v2043_v10, %v2044_v63  ;;  %v4452_v28 = vld [vmem:[#allocation10 + $0x1968] sm:$0xff]  ;;  %v4457_v49 = vld [vmem:[#allocation10 + $0x1990] sm:$0xff] }
 0x30e   : > { %6164 = vmatpush1.bf16.msra.mxu0 %v6163_v31  ;;  %6070 = vmatprep.subr.bf16.mxu1 %v6069_v32  ;;  %v6181_v31 = vpack.c.bf16 %v4420_v23, %v4416_v5  ;;  %v4417_v32 = vld [vmem:[#allocation10 + $0x1850] sm:$0xff]  ;;  %v4439_v5 = vld [vmem:[#allocation10 + $0x1900] sm:$0xff]  ;;  %v6197_v34 = vpack.c.bf16 %v4452_v28, %v4448_v39  ;;  %v4456_v40 = vld [vmem:[#allocation10 + $0x1988] sm:$0xff] }
 0x30f   : > { %6166 = vmatprep.subr.bf16.mxu0 %v6165_v35  ;;  %v4424_v35 = vld [vmem:[#allocation10 + $0x1888] sm:$0xff]  ;;  %v1991_v45 = vsel %vm1982_vm8, %v1989_v37, %v1990_v30  ;;  %v4443_v23 = vld [vmem:[#allocation10 + $0x1920] sm:$0xff]  ;;  %v4450_v30 = vld [vmem:[#allocation10 + $0x1958] sm:$0xff] }
 0x310   : > { %v4449_v37 = vld [vmem:[#allocation10 + $0x1950] sm:$0xff]  ;;  %v4464_v52 = vld [vmem:[#allocation10 + $0x19c8] sm:$0xff] }
 0x311   : > { %6072 = vmatpush1.bf16.msra.mxu1 %v6071_v41  ;;  %v6279_v41 = vpack.c.bf16 %v4421_v33, %v4417_v32  ;;  %v6195_v33 = vpack.c.bf16 %v4443_v23, %v4439_v5  ;;  %v4472_v10 = vld [vmem:[#allocation10 + $0x1a08] sm:$0xff]  ;;  %v4482_v5 = vld [vmem:[#allocation10 + $0x1a58] sm:$0xff]  ;;  %v4481_v39 = vld [vmem:[#allocation10 + $0x1a50] sm:$0xff] }
 0x312   : > { %6168 = vmatpush1.bf16.msra.mxu0 %v6167_v42  ;;  %6074 = vmatprep.subr.bf16.mxu1 %v6073_v43  ;;  %v2000_v42 = vld [vmem:[#allocation3 + $0x58] sm:$0xf8]  ;;  %v4423_v43 = vld [vmem:[#allocation10 + $0x1880] sm:$0xff]  ;;  %v4476_v63 = vld [vmem:[#allocation10 + $0x1a28] sm:$0xff] }
 0x313   : > { %6170 = vmatprep.subr.bf16.mxu0 %v6169_v47  ;;  %v6185_v47 = vpack.c.bf16 %v4428_v36, %v4424_v35  ;;  %v6187_v56 = vpack.c.bf16 %v4427_v44, %v4423_v43  ;;  %v4447_v35 = vld [vmem:[#allocation10 + $0x1940] sm:$0xff]  ;;  %v4462_v43 = vld [vmem:[#allocation10 + $0x19b8] sm:$0xff]  ;;  %v6209_v4 = vpack.c.bf16 %v4476_v63, %v4472_v10  ;;  %v4509_v10 = vld [vmem:[#allocation10 + $0x1b30] sm:$0xff] }
 0x314   : > { %v4451_v36 = vld [vmem:[#allocation10 + $0x1960] sm:$0xff]  ;;  %v4486_v23 = vld [vmem:[#allocation10 + $0x1a78] sm:$0xff]  ;;  %v4512_v63 = vld [vmem:[#allocation10 + $0x1b48] sm:$0xff] }
 0x315   : > { %6076 = vmatpush1.bf16.msra.mxu1 %v6075_v53  ;;  %v4432_v53 = vld [vmem:[#allocation10 + $0x18c8] sm:$0xff]  ;;  %v6199_v44 = vpack.c.bf16 %v4451_v36, %v4447_v35  ;;  %v6309_v28 = vpack.c.bf16 %v4486_v23, %v4482_v5  ;;  %v4487_v36 = vld [vmem:[#allocation10 + $0x1a80] sm:$0xff]  ;;  %v4522_v23 = vld [vmem:[#allocation10 + $0x1b98] sm:$0xff] }
 0x316   : > { %6172 = vmatpush1.bf16.msra.mxu0 %v6171_v54  ;;  %6078 = vmatprep.subr.bf16.mxu1 %v6077_v55  ;;  %v4436_v54 = vld [vmem:[#allocation10 + $0x18e8] sm:$0xff]  ;;  %v2016_v55 = vrot.slane %v2000_v42, 3  ;;  %v4458_v42 = vld [vmem:[#allocation10 + $0x1998] sm:$0xff] }
 0x317   : > { %6174 = vmatprep.subr.bf16.mxu0 %v6173_v59  ;;  %v4431_v59 = vld [vmem:[#allocation10 + $0x18c0] sm:$0xff]  ;;  %v6189_v1 = vpack.c.bf16 %v4436_v54, %v4432_v53  ;;  %v6297_v50 = vpack.c.bf16 %v4462_v43, %v4458_v42  ;;  %v4468_v53 = vld [vmem:[#allocation10 + $0x19e8] sm:$0xff]  ;;  %v4466_v54 = vld [vmem:[#allocation10 + $0x19d8] sm:$0xff] }
 0x318   : > { %v2018_v62 = vsel %vm1953_vm7, %v2016_v55, %v2017_v46  ;;  %v6191_v17 = vpack.c.bf16 %v4435_v60, %v4431_v59  ;;  %v4470_v55 = vld [vmem:[#allocation10 + $0x19f8] sm:$0xff]  ;;  %v4467_v59 = vld [vmem:[#allocation10 + $0x19e0] sm:$0xff]  ;;  %v4465_v60 = vld [vmem:[#allocation10 + $0x19d0] sm:$0xff] }
 0x319   : > { %6080 = vmatpush1.bf16.msra.mxu1 %v6079_v2  ;;  %v4433_v2 = vld [vmem:[#allocation10 + $0x18d0] sm:$0xff]  ;;  %v4500_v42 = vld [vmem:[#allocation10 + $0x1ae8] sm:$0xff]  ;;  %v4498_v43 = vld [vmem:[#allocation10 + $0x1ad8] sm:$0xff] }
 0x31a   : > { %6176 = vmatpush1.bf16.msra.mxu0 %v6175_v18  ;;  %6178 = vmatprep.subr.bf16.mxu1 %v6177_v3  ;;  %v4437_v18 = vld [vmem:[#allocation10 + $0x18f0] sm:$0xff]  ;;  %v6285_v3 = vpack.c.bf16 %v4438_v58, %v4434_v57  ;;  %v6205_v58 = vpack.c.bf16 %v4468_v53, %v4464_v52  ;;  %v4504_v53 = vld [vmem:[#allocation10 + $0x1b08] sm:$0xff] }
 0x31b   : > { %6274 = vmatprep.subr.bf16.mxu0 %v6273_v19  ;;  %v2068_v19 = vrot.slane %v2056_v61, 4  ;;  %v6287_v22 = vpack.c.bf16 %v4437_v18, %v4433_v2  ;;  %v6301_v61 = vpack.c.bf16 %v4470_v55, %v4466_v54  ;;  %v4478_v2 = vld [vmem:[#allocation10 + $0x1a38] sm:$0xff]  ;;  %v4501_v52 = vld [vmem:[#allocation10 + $0x1af0] sm:$0xff]  ;;  %v4508_v54 = vld [vmem:[#allocation10 + $0x1b28] sm:$0xff] }
 0x31c   : > { %4176 = vmatmul.mubr.f32.vlgmr.msra.gmra.mrb[18].mxu1 %v1962_v29  ;;  %v4506_v55 = vld [vmem:[#allocation10 + $0x1b18] sm:$0xff]  ;;  %v4524_v5 = vld [vmem:[#allocation10 + $0x1ba8] sm:$0xff] }
 0x31d   : > { %4354 = vmatmul.mubr.f32.vlgmr.msra.gmra.mrb[12].mxu0 %v1962_v29  ;;  %6180 = vmatpush1.bf16.msra.mxu1 %v6179_v24  ;;  %v4441_v24 = vld [vmem:[#allocation10 + $0x1910] sm:$0xff]  ;;  %v6289_v29 = vpack.c.bf16 %v4446_v20, %v4442_v21  ;;  %v2069_v32 = vsel %vm1670_vm4, %v2067_v6, %v2068_v19  ;;  %v4480_v20 = vld [vmem:[#allocation10 + $0x1a48] sm:$0xff] }
 0x31e   : > { %6276 = vmatpush1.bf16.msra.mxu0 %v6275_v26  ;;  %4181 = vmatprep.mubr.f32.mxu1 %v6869_v0  ;;  %v6193_v26 = vpack.c.bf16 %v4444_v14, %v4440_v11  ;;  %v4471_v11 = vld [vmem:[#allocation10 + $0x1a00] sm:$0xff]  ;;  %v4477_v21 = vld [vmem:[#allocation10 + $0x1a30] sm:$0xff] }
 0x31f   : > { %4359 = vmatprep.mubr.f32.mxu0 %v6869_v0  ;;  %6182 = vmatprep.subr.bf16.mxu1 %v6181_v31  ;;  %v4454_v31 = vld [vmem:[#allocation10 + $0x1978] sm:$0xff]  ;;  %v4475_v14 = vld [vmem:[#allocation10 + $0x1a20] sm:$0xff] }
 0x320   : > { %4182 = vmatmul.mubr.f32.gmra.mrb[20].mxu1 %v1991_v45  ;;  %6278 = vmatprep.subr.bf16.mxu0 %v6277_v7  ;;  %v6291_v7 = vpack.c.bf16 %v4445_v27, %v4441_v24  ;;  %v6211_v24 = vpack.c.bf16 %v4475_v14, %v4471_v11  ;;  %v4483_v27 = vld [vmem:[#allocation10 + $0x1a60] sm:$0xff] }
 0x321   : > { %4360 = vmatmul.mubr.f32.gmra.mrb[14].mxu0 %v1991_v45  ;;  %6184 = vmatpush1.bf16.msra.mxu1 %v6183_v38  ;;  %v6293_v38 = vpack.c.bf16 %v4454_v31, %v4450_v30  ;;  %v6295_v45 = vpack.c.bf16 %v4453_v8, %v4449_v37  ;;  %v4488_v30 = vld [vmem:[#allocation10 + $0x1a88] sm:$0xff]  ;;  %v4491_v37 = vld [vmem:[#allocation10 + $0x1aa0] sm:$0xff] }
 0x322   : > { %6280 = vmatpush1.bf16.msra.mxu0 %v6279_v41  ;;  %4187 = vmatprep.mubr.f32.mxu1 %v6869_v0  ;;  %v4460_v41 = vld [vmem:[#allocation10 + $0x19a8] sm:$0xff]  ;;  %v4511_v14 = vld [vmem:[#allocation10 + $0x1b40] sm:$0xff] }
 0x323   : > { %4365 = vmatprep.mubr.f32.mxu0 %v6869_v0  ;;  %6186 = vmatprep.subr.bf16.mxu1 %v6185_v47  ;;  %v6201_v46 = vpack.c.bf16 %v4460_v41, %v4456_v40  ;;  %v4455_v47 = vld [vmem:[#allocation10 + $0x1980] sm:$0xff]  ;;  %v4492_v31 = vld [vmem:[#allocation10 + $0x1aa8] sm:$0xff]  ;;  %v4493_v40 = vld [vmem:[#allocation10 + $0x1ab0] sm:$0xff] }
 0x324   : > { %4188 = vmatmul.mubr.f32.gmra.mrb[22].mxu1 %v2018_v62  ;;  %6282 = vmatprep.subr.bf16.mxu0 %v6281_v51  ;;  %v4461_v51 = vld [vmem:[#allocation10 + $0x19b0] sm:$0xff]  ;;  %v6217_v35 = vpack.c.bf16 %v4492_v31, %v4488_v30  ;;  %v4496_v41 = vld [vmem:[#allocation10 + $0x1ac8] sm:$0xff] }
 0x325   : > { %4366 = vmatmul.mubr.f32.gmra.mrb[16].mxu0 %v2018_v62  ;;  %6188 = vmatpush1.bf16.msra.mxu1 %v6187_v56  ;;  %v6203_v56 = vpack.c.bf16 %v4459_v48, %v4455_v47  ;;  %v6299_v57 = vpack.c.bf16 %v4461_v51, %v4457_v49  ;;  %v4469_v62 = vld [vmem:[#allocation10 + $0x19f0] sm:$0xff]  ;;  %v6221_v47 = vpack.c.bf16 %v4500_v42, %v4496_v41  ;;  %v4495_v48 = vld [vmem:[#allocation10 + $0x1ac0] sm:$0xff]  ;;  %v4528_v31 = vld [vmem:[#allocation10 + $0x1bc8] sm:$0xff] }
 0x326   : > { %6284 = vmatpush1.bf16.msra.mxu0 %v6283_v9  ;;  %4193 = vmatprep.mubr.f32.mxu1 %v6869_v0  ;;  %v4463_v9 = vld [vmem:[#allocation10 + $0x19c0] sm:$0xff]  ;;  %v4525_v30 = vld [vmem:[#allocation10 + $0x1bb0] sm:$0xff]  ;;  %v4536_v42 = vld [vmem:[#allocation10 + $0x1c08] sm:$0xff] }
 0x327   : > { %4371 = vmatprep.mubr.f32.mxu0 %v6869_v0  ;;  %6190 = vmatprep.subr.bf16.mxu1 %v6189_v1  ;;  %v4474_v1 = vld [vmem:[#allocation10 + $0x1a18] sm:$0xff]  ;;  %v6207_v18 = vpack.c.bf16 %v4467_v59, %v4463_v9  ;;  %v4499_v49 = vld [vmem:[#allocation10 + $0x1ae0] sm:$0xff]  ;;  %v6225_v9 = vpack.c.bf16 %v4508_v54, %v4504_v53  ;;  %v4533_v41 = vld [vmem:[#allocation10 + $0x1bf0] sm:$0xff] }
 0x328   : > { %4194 = vmatmul.mubr.f32.gmra.mrb[24].mxu1 %v2045_v25  ;;  %6286 = vmatprep.subr.bf16.mxu0 %v6285_v3  ;;  %v6303_v3 = vpack.c.bf16 %v4469_v62, %v4465_v60  ;;  %v6305_v19 = vpack.c.bf16 %v4478_v2, %v4474_v1  ;;  %v4503_v59 = vld [vmem:[#allocation10 + $0x1b00] sm:$0xff]  ;;  %v4516_v1 = vld [vmem:[#allocation10 + $0x1b68] sm:$0xff]  ;;  %v4514_v2 = vld [vmem:[#allocation10 + $0x1b58] sm:$0xff] }
 0x329   : > { %4372 = vmatmul.mubr.f32.gmra.mrb[18].mxu0 %v2045_v25  ;;  %6192 = vmatpush1.bf16.msra.mxu1 %v6191_v17  ;;  %v4473_v17 = vld [vmem:[#allocation10 + $0x1a10] sm:$0xff]  ;;  %v4507_v60 = vld [vmem:[#allocation10 + $0x1b20] sm:$0xff]  ;;  %v6229_v11 = vpack.c.bf16 %v4516_v1, %v4512_v63  ;;  %v2089_v1 = vld [vmem:[#allocation3 + $0x60] sm:$0xf] }
 0x32a   : > { %4663 = vmatprep.mubr.f32.mxu1 %v2069_v32  ;;  %6288 = vmatpush1.bf16.msra.mxu0 %v6287_v22  ;;  %v4484_v22 = vld [vmem:[#allocation10 + $0x1a68] sm:$0xff]  ;;  %v6307_v25 = vpack.c.bf16 %v4477_v21, %v4473_v17  ;;  %v4515_v17 = vld [vmem:[#allocation10 + $0x1b60] sm:$0xff]  ;;  %v2087_v63 = vld [vmem:[#allocation3 + $0x50] sm:$0xf0] }
 0x32b   : > { %4841 = vmatprep.mubr.f32.mxu0 %v2069_v32  ;;  %6194 = vmatprep.subr.bf16.mxu1 %v6193_v26  ;;  %v6213_v6 = vpack.c.bf16 %v4484_v22, %v4480_v20  ;;  %v4479_v26 = vld [vmem:[#allocation10 + $0x1a40] sm:$0xff]  ;;  %v4490_v32 = vld [vmem:[#allocation10 + $0x1a98] sm:$0xff]  ;;  %v4517_v20 = vld [vmem:[#allocation10 + $0x1b70] sm:$0xff] }
 0x32c   : > { %6290 = vmatprep.subr.bf16.mxu0 %v6289_v29  ;;  %v4485_v29 = vld [vmem:[#allocation10 + $0x1a70] sm:$0xff]  ;;  %v4520_v22 = vld [vmem:[#allocation10 + $0x1b88] sm:$0xff]  ;;  %v4535_v53 = vld [vmem:[#allocation10 + $0x1c00] sm:$0xff] }
 0x32d   : > { %6196 = vmatpush1.bf16.msra.mxu1 %v6195_v33  ;;  %v4494_v33 = vld [vmem:[#allocation10 + $0x1ab8] sm:$0xff]  ;;  %v4539_v54 = vld [vmem:[#allocation10 + $0x1c20] sm:$0xff] }
 0x32e   : > { %6292 = vmatpush1.bf16.msra.mxu0 %v6291_v7  ;;  %6198 = vmatprep.subr.bf16.mxu1 %v6197_v34  ;;  %v6215_v7 = vpack.c.bf16 %v4483_v27, %v4479_v26  ;;  %v6311_v34 = vpack.c.bf16 %v4485_v29, %v4481_v39  ;;  %v6313_v8 = vpack.c.bf16 %v4494_v33, %v4490_v32  ;;  %v4519_v27 = vld [vmem:[#allocation10 + $0x1b80] sm:$0xff]  ;;  %v4532_v32 = vld [vmem:[#allocation10 + $0x1be8] sm:$0xff]  ;;  %v4530_v33 = vld [vmem:[#allocation10 + $0x1bd8] sm:$0xff] }
 0x32f   : > { %6294 = vmatprep.subr.bf16.mxu0 %v6293_v38  ;;  %v4489_v38 = vld [vmem:[#allocation10 + $0x1a90] sm:$0xff]  ;;  %v6233_v26 = vpack.c.bf16 %v4524_v5, %v4520_v22  ;;  %v4523_v39 = vld [vmem:[#allocation10 + $0x1ba0] sm:$0xff]  ;;  %v4556_v22 = vld [vmem:[#allocation10 + $0x1ca8] sm:$0xff] }
 0x330   : > { %v4554_v5 = vld [vmem:[#allocation10 + $0x1c98] sm:$0xff] }
 0x331   : > { %6200 = vmatpush1.bf16.msra.mxu1 %v6199_v44  ;;  %v4502_v44 = vld [vmem:[#allocation10 + $0x1af8] sm:$0xff] }
 0x332   : > { %6296 = vmatpush1.bf16.msra.mxu0 %v6295_v45  ;;  %6202 = vmatprep.subr.bf16.mxu1 %v6201_v46  ;;  %v6219_v45 = vpack.c.bf16 %v4491_v37, %v4487_v36  ;;  %v6315_v46 = vpack.c.bf16 %v4493_v40, %v4489_v38  ;;  %v6317_v51 = vpack.c.bf16 %v4502_v44, %v4498_v43  ;;  %v4527_v37 = vld [vmem:[#allocation10 + $0x1bc0] sm:$0xff]  ;;  %v4540_v43 = vld [vmem:[#allocation10 + $0x1c28] sm:$0xff]  ;;  %v2055_v44 = vld [vmem:[#allocation3 + $0x18] sm:$0xf] }
 0x333   : > { %6298 = vmatprep.subr.bf16.mxu0 %v6297_v50  ;;  %v4497_v50 = vld [vmem:[#allocation10 + $0x1ad0] sm:$0xff]  ;;  %v6237_v36 = vpack.c.bf16 %v4532_v32, %v4528_v31  ;;  %v4531_v38 = vld [vmem:[#allocation10 + $0x1be0] sm:$0xff] }
 0x334   : > { %v4553_v31 = vld [vmem:[#allocation10 + $0x1c90] sm:$0xff] }
 0x335   : > { %6204 = vmatpush1.bf16.msra.mxu1 %v6203_v56  ;;  %v4510_v56 = vld [vmem:[#allocation10 + $0x1b38] sm:$0xff] }
 0x336   : > { %6300 = vmatpush1.bf16.msra.mxu0 %v6299_v57  ;;  %6206 = vmatprep.subr.bf16.mxu1 %v6205_v58  ;;  %v6223_v57 = vpack.c.bf16 %v4499_v49, %v4495_v48  ;;  %v6319_v58 = vpack.c.bf16 %v4501_v52, %v4497_v50  ;;  %v6321_v62 = vpack.c.bf16 %v4510_v56, %v4506_v55  ;;  %v2052_v49 = vld [vmem:[#allocation3] sm:$0xf0]  ;;  %v4537_v55 = vld [vmem:[#allocation10 + $0x1c10] sm:$0xff] }
 0x337   : > { %6302 = vmatprep.subr.bf16.mxu0 %v6301_v61  ;;  %v4505_v61 = vld [vmem:[#allocation10 + $0x1b10] sm:$0xff]  ;;  %v6241_v50 = vpack.c.bf16 %v4540_v43, %v4536_v42 }
 0x338   : > { %v4541_v56 = vld [vmem:[#allocation10 + $0x1c30] sm:$0xff] }
 0x339   : > { %6208 = vmatpush1.bf16.msra.mxu1 %v6207_v18  ;;  %v4518_v18 = vld [vmem:[#allocation10 + $0x1b78] sm:$0xff] }
 0x33a   : > { %6304 = vmatpush1.bf16.msra.mxu0 %v6303_v3  ;;  %6210 = vmatprep.subr.bf16.mxu1 %v6209_v4  ;;  %v6227_v3 = vpack.c.bf16 %v4507_v60, %v4503_v59  ;;  %v6323_v4 = vpack.c.bf16 %v4509_v10, %v4505_v61  ;;  %v6325_v21 = vpack.c.bf16 %v4518_v18, %v4514_v2  ;;  %v4546_v59 = vld [vmem:[#allocation10 + $0x1c58] sm:$0xff]  ;;  %v2090_v61 = vld [vmem:[#allocation3 + $0x68] sm:$0xf] }
 0x33b   : > { %6306 = vmatprep.subr.bf16.mxu0 %v6305_v19  ;;  %v4513_v19 = vld [vmem:[#allocation10 + $0x1b50] sm:$0xff]  ;;  %v4550_v60 = vld [vmem:[#allocation10 + $0x1c78] sm:$0xff]  ;;  %v6243_v10 = vpack.c.bf16 %v4539_v54, %v4535_v53  ;;  %v6339_v18 = vpack.c.bf16 %v4541_v56, %v4537_v55 }
 0x33c   : > { %v2113_v53 = vld [vmem:[#allocation3 + $0x78] sm:$0xff] }
 0x33d   : > { %6212 = vmatpush1.bf16.msra.mxu1 %v6211_v24  ;;  %v4526_v24 = vld [vmem:[#allocation10 + $0x1bb8] sm:$0xff] }
 0x33e   : > { %6308 = vmatpush1.bf16.msra.mxu0 %v6307_v25  ;;  %6214 = vmatprep.subr.bf16.mxu1 %v6213_v6  ;;  %v6231_v25 = vpack.c.bf16 %v4515_v17, %v4511_v14  ;;  %v6327_v6 = vpack.c.bf16 %v4517_v20, %v4513_v19  ;;  %v6329_v29 = vpack.c.bf16 %v4526_v24, %v4522_v23  ;;  %v4545_v14 = vld [vmem:[#allocation10 + $0x1c50] sm:$0xff]  ;;  %v2102_v19 = vrot.slane %v2090_v61, 4  ;;  %v4552_v20 = vld [vmem:[#allocation10 + $0x1c88] sm:$0xff]  ;;  %v4558_v23 = vld [vmem:[#allocation10 + $0x1cb8] sm:$0xff] }
 0x33f   : > { %6310 = vmatprep.subr.bf16.mxu0 %v6309_v28  ;;  %v4521_v28 = vld [vmem:[#allocation10 + $0x1b90] sm:$0xff]  ;;  %v6341_v17 = vpack.c.bf16 %v4550_v60, %v4546_v59  ;;  %v4576_v61 = vld [vmem:[#allocation10 + $0x1d48] sm:$0xff] }
 0x340   : > { %v2080_v24 = vld [vmem:[#allocation3 + $0x30] sm:$0xff] }
 0x341   : > { %6216 = vmatpush1.bf16.msra.mxu1 %v6215_v7  ;;  %v4534_v7 = vld [vmem:[#allocation10 + $0x1bf8] sm:$0xff]  ;;  %v4573_v60 = vld [vmem:[#allocation10 + $0x1d30] sm:$0xff] }
 0x342   : > { %6312 = vmatpush1.bf16.msra.mxu0 %v6311_v34  ;;  %6218 = vmatprep.subr.bf16.mxu1 %v6217_v35  ;;  %v6235_v34 = vpack.c.bf16 %v4523_v39, %v4519_v27  ;;  %v6331_v35 = vpack.c.bf16 %v4525_v30, %v4521_v28  ;;  %v6333_v40 = vpack.c.bf16 %v4534_v7, %v4530_v33  ;;  %v2099_v39 = vrot.slane %v2089_v1, 4  ;;  %v4555_v30 = vld [vmem:[#allocation10 + $0x1ca0] sm:$0xff]  ;;  %v4557_v7 = vld [vmem:[#allocation10 + $0x1cb0] sm:$0xff] }
 0x343   : > { %6314 = vmatprep.subr.bf16.mxu0 %v6313_v8  ;;  %v4529_v8 = vld [vmem:[#allocation10 + $0x1bd0] sm:$0xff]  ;;  %v6249_v28 = vpack.c.bf16 %v4556_v22, %v4552_v20  ;;  %v6345_v33 = vpack.c.bf16 %v4558_v23, %v4554_v5  ;;  %v6347_v42 = vpack.c.bf16 %v4557_v7, %v4553_v31  ;;  %v4586_v20 = vld [vmem:[#allocation10 + $0x1d98] sm:$0xff] }
 0x344   : > { %v6335_v48 = vpack.c.bf16 %v4533_v41, %v4529_v8  ;;  %v2114_v8 = vld [vmem:[#allocation3 + $0x80] sm:$0xff] }
 0x345   : > { %6220 = vmatpush1.bf16.msra.mxu1 %v6219_v45  ;;  %v4538_v45 = vld [vmem:[#allocation10 + $0x1c18] sm:$0xff] }
 0x346   : > { %6316 = vmatpush1.bf16.msra.mxu0 %v6315_v46  ;;  %6222 = vmatprep.subr.bf16.mxu1 %v6221_v47  ;;  %v4542_v46 = vld [vmem:[#allocation10 + $0x1c38] sm:$0xff]  ;;  %v6239_v47 = vpack.c.bf16 %v4531_v38, %v4527_v37 }
 0x347   : > { %6318 = vmatprep.subr.bf16.mxu0 %v6317_v51  ;;  %v2065_v51 = vrot.slane %v2055_v44, 4  ;;  %v6337_v52 = vpack.c.bf16 %v4542_v46, %v4538_v45  ;;  %v4562_v37 = vld [vmem:[#allocation10 + $0x1cd8] sm:$0xff]  ;;  %v4559_v44 = vld [vmem:[#allocation10 + $0x1cc0] sm:$0xff]  ;;  %v4561_v46 = vld [vmem:[#allocation10 + $0x1cd0] sm:$0xff] }
 0x348   : > { %v4566_v38 = vld [vmem:[#allocation10 + $0x1cf8] sm:$0xff]  ;;  %v4563_v45 = vld [vmem:[#allocation10 + $0x1ce0] sm:$0xff] }
 0x349   : > { %6224 = vmatpush1.bf16.msra.mxu1 %v6223_v57  ;;  %v4544_v57 = vld [vmem:[#allocation10 + $0x1c48] sm:$0xff]  ;;  %v6255_v54 = vpack.c.bf16 %v4563_v45, %v4559_v44  ;;  %v4590_v22 = vld [vmem:[#allocation10 + $0x1db8] sm:$0xff] }
 0x34a   : > { %6320 = vmatpush1.bf16.msra.mxu0 %v6319_v58  ;;  %6226 = vmatprep.subr.bf16.mxu1 %v6225_v9  ;;  %v4548_v58 = vld [vmem:[#allocation10 + $0x1c68] sm:$0xff]  ;;  %v2064_v9 = vrot.slane %v2052_v49, 4  ;;  %v4598_v31 = vld [vmem:[#allocation10 + $0x1df8] sm:$0xff] }
 0x34b   : > { %6322 = vmatprep.subr.bf16.mxu0 %v6321_v62  ;;  %v2081_v62 = vld [vmem:[#allocation3 + $0x38] sm:$0xff]  ;;  %v4568_v49 = vld [vmem:[#allocation10 + $0x1d08] sm:$0xff] }
 0x34c   : > { %v2066_v2 = vsel %vm1670_vm4, %v2064_v9, %v2065_v51  ;;  %v4570_v51 = vld [vmem:[#allocation10 + $0x1d18] sm:$0xff]  ;;  %v4569_v9 = vld [vmem:[#allocation10 + $0x1d10] sm:$0xff] }
 0x34d   : > { %6228 = vmatpush1.bf16.msra.mxu1 %v6227_v3  ;;  %v6245_v3 = vpack.c.bf16 %v4548_v58, %v4544_v57  ;;  %v4567_v57 = vld [vmem:[#allocation10 + $0x1d00] sm:$0xff] }
 0x34e   : > { %6324 = vmatpush1.bf16.msra.mxu0 %v6323_v4  ;;  %6230 = vmatprep.subr.bf16.mxu1 %v6229_v11  ;;  %v4543_v4 = vld [vmem:[#allocation10 + $0x1c40] sm:$0xff] }
 0x34f   : > { %6326 = vmatprep.subr.bf16.mxu0 %v6325_v21  ;;  %v4547_v11 = vld [vmem:[#allocation10 + $0x1c60] sm:$0xff]  ;;  %v4549_v21 = vld [vmem:[#allocation10 + $0x1c70] sm:$0xff] }
 0x350   : > { %v6343_v27 = vpack.c.bf16 %v4549_v21, %v4545_v14  ;;  %v4571_v58 = vld [vmem:[#allocation10 + $0x1d20] sm:$0xff]  ;;  %v4588_v21 = vld [vmem:[#allocation10 + $0x1da8] sm:$0xff] }
 0x351   : > { %6232 = vmatpush1.bf16.msra.mxu1 %v6231_v25  ;;  %v2101_v25 = vrot.slane %v2087_v63, 4  ;;  %v4582_v63 = vld [vmem:[#allocation10 + $0x1d78] sm:$0xff]  ;;  %v6259_v1 = vpack.c.bf16 %v4571_v58, %v4567_v57 }
 0x352   : > { %6328 = vmatpush1.bf16.msra.mxu0 %v6327_v6  ;;  %6234 = vmatprep.subr.bf16.mxu1 %v6233_v26  ;;  %v6247_v6 = vpack.c.bf16 %v4547_v11, %v4543_v4  ;;  %v2086_v26 = vld [vmem:[#allocation3 + $0x48] sm:$0xf0]  ;;  %v4579_v4 = vld [vmem:[#allocation10 + $0x1d60] sm:$0xff]  ;;  %v4577_v11 = vld [vmem:[#allocation10 + $0x1d50] sm:$0xff] }
 0x353   : > { %6330 = vmatprep.subr.bf16.mxu0 %v6329_v29  ;;  %v4551_v29 = vld [vmem:[#allocation10 + $0x1c80] sm:$0xff]  ;;  %v2103_v32 = vsel %vm1670_vm4, %v2101_v25, %v2102_v19  ;;  %v4584_v19 = vld [vmem:[#allocation10 + $0x1d88] sm:$0xff] }
 0x354   : > { %v4583_v25 = vld [vmem:[#allocation10 + $0x1d80] sm:$0xff] }
 0x355   : > { %6236 = vmatpush1.bf16.msra.mxu1 %v6235_v34  ;;  %v4560_v34 = vld [vmem:[#allocation10 + $0x1cc8] sm:$0xff] }
 0x356   : > { %6332 = vmatpush1.bf16.msra.mxu0 %v6331_v35  ;;  %6238 = vmatprep.subr.bf16.mxu1 %v6237_v36  ;;  %v4564_v35 = vld [vmem:[#allocation10 + $0x1ce8] sm:$0xff]  ;;  %v2098_v36 = vrot.slane %v2086_v26, 4  ;;  %v4585_v26 = vld [vmem:[#allocation10 + $0x1d90] sm:$0xff] }
 0x357   : > { %6334 = vmatprep.subr.bf16.mxu0 %v6333_v40  ;;  %v6251_v40 = vpack.c.bf16 %v4555_v30, %v4551_v29  ;;  %v6253_v43 = vpack.c.bf16 %v4564_v35, %v4560_v34  ;;  %v4596_v29 = vld [vmem:[#allocation10 + $0x1de8] sm:$0xff]  ;;  %v4594_v30 = vld [vmem:[#allocation10 + $0x1dd8] sm:$0xff]  ;;  %v4591_v34 = vld [vmem:[#allocation10 + $0x1dc0] sm:$0xff] }
 0x358   : > { %v2100_v41 = vsel %vm1670_vm4, %v2098_v36, %v2099_v39  ;;  %v4589_v39 = vld [vmem:[#allocation10 + $0x1db0] sm:$0xff]  ;;  %v4595_v35 = vld [vmem:[#allocation10 + $0x1de0] sm:$0xff]  ;;  %v6365_v36 = vpack.c.bf16 %v4598_v31, %v4594_v30 }
 0x359   : > { %6240 = vmatpush1.bf16.msra.mxu1 %v6239_v47  ;;  %v6349_v47 = vpack.c.bf16 %v4566_v38, %v4562_v37  ;;  %v4593_v37 = vld [vmem:[#allocation10 + $0x1dd0] sm:$0xff] }
 0x35a   : > { %6336 = vmatpush1.bf16.msra.mxu0 %v6335_v48  ;;  %6242 = vmatprep.subr.bf16.mxu1 %v6241_v50  ;;  %v4565_v48 = vld [vmem:[#allocation10 + $0x1cf0] sm:$0xff]  ;;  %v4572_v50 = vld [vmem:[#allocation10 + $0x1d28] sm:$0xff] }
 0x35b   : > { %6338 = vmatprep.subr.bf16.mxu0 %v6337_v52  ;;  %v4574_v52 = vld [vmem:[#allocation10 + $0x1d38] sm:$0xff]  ;;  %v6351_v55 = vpack.c.bf16 %v4565_v48, %v4561_v46  ;;  %v6257_v56 = vpack.c.bf16 %v4572_v50, %v4568_v49  ;;  %v4597_v38 = vld [vmem:[#allocation10 + $0x1df0] sm:$0xff]  ;;  %v2091_v46 = vld [vmem:[#allocation3 + $0x70] sm:$0xf] }
 0x35c   : > { %4664 = vmatmul.mubr.f32.vlgmr.msra.gmra.mrb[18].mxu1 %v2066_v2  ;;  %v6353_v59 = vpack.c.bf16 %v4574_v52, %v4570_v51  ;;  %v2082_v48 = vld [vmem:[#allocation3 + $0x40] sm:$0xff]  ;;  %v2105_v49 = vrot.slane %v2091_v46, 4  ;;  %v2115_v52 = vld [vmem:[#allocation3 + $0x88] sm:$0xff] }
 0x35d   : > { %4842 = vmatmul.mubr.f32.vlgmr.msra.gmra.mrb[12].mxu0 %v2066_v2  ;;  %4669 = vmatprep.mubr.f32.mxu1 %v2081_v62  ;;  %v6355_v2 = vpack.c.bf16 %v4573_v60, %v4569_v9 }
 0x35e   : > { %6244 = vmatpush1.bf16.msra.mxu1 %v6243_v10  ;;  %4847 = vmatprep.mubr.f32.mxu0 %v2081_v62  ;;  %v4580_v62 = vld [vmem:[#allocation10 + $0x1d68] sm:$0xff]  ;;  %v4578_v10 = vld [vmem:[#allocation10 + $0x1d58] sm:$0xff] }
 0x35f   : > { %6340 = vmatpush1.bf16.msra.mxu0 %v6339_v18  ;;  %6246 = vmatprep.subr.bf16.mxu1 %v6245_v3  ;;  %v6261_v18 = vpack.c.bf16 %v4580_v62, %v4576_v61  ;;  %v4575_v3 = vld [vmem:[#allocation10 + $0x1d40] sm:$0xff]  ;;  %v6357_v14 = vpack.c.bf16 %v4582_v63, %v4578_v10 }
 0x360   : > { %4670 = vmatmul.mubr.f32.gmra.mrb[20].mxu1 %v2080_v24  ;;  %6342 = vmatprep.subr.bf16.mxu0 %v6341_v17  ;;  %v4581_v17 = vld [vmem:[#allocation10 + $0x1d70] sm:$0xff]  ;;  %v6263_v5 = vpack.c.bf16 %v4579_v4, %v4575_v3 }
 0x361   : > { %4848 = vmatmul.mubr.f32.gmra.mrb[14].mxu0 %v2080_v24  ;;  %4675 = vmatprep.mubr.f32.mxu1 %v2103_v32  ;;  %v6359_v23 = vpack.c.bf16 %v4581_v17, %v4577_v11  ;;  %v6265_v24 = vpack.c.bf16 %v4588_v21, %v4584_v19 }
 0x362   : > { %6248 = vmatpush1.bf16.msra.mxu1 %v6247_v6  ;;  %4853 = vmatprep.mubr.f32.mxu0 %v2103_v32  ;;  %v4587_v6 = vld [vmem:[#allocation10 + $0x1da0] sm:$0xff] }
 0x363   : > { %6344 = vmatpush1.bf16.msra.mxu0 %v6343_v27  ;;  %6250 = vmatprep.subr.bf16.mxu1 %v6249_v28  ;;  %v6361_v27 = vpack.c.bf16 %v4590_v22, %v4586_v20  ;;  %v4592_v28 = vld [vmem:[#allocation10 + $0x1dc8] sm:$0xff]  ;;  %v6267_v32 = vpack.c.bf16 %v4587_v6, %v4583_v25 }
 0x364   : > { %4676 = vmatmul.mubr.f32.gmra.mrb[22].mxu1 %v2100_v41  ;;  %6346 = vmatprep.subr.bf16.mxu0 %v6345_v33  ;;  %v6363_v33 = vpack.c.bf16 %v4589_v39, %v4585_v26  ;;  %v6269_v7 = vpack.c.bf16 %v4596_v29, %v4592_v28 }
 0x365   : > { %4854 = vmatmul.mubr.f32.gmra.mrb[16].mxu0 %v2100_v41  ;;  %4681 = vmatprep.mubr.f32.mxu1 %v2114_v8  ;;  %v6271_v41 = vpack.c.bf16 %v4595_v35, %v4591_v34 }
 0x366   : > { %6252 = vmatpush1.bf16.msra.mxu1 %v6251_v40  ;;  %4859 = vmatprep.mubr.f32.mxu0 %v2114_v8  ;;  %v2054_v8 = vld [vmem:[#allocation3 + $0x10] sm:$0xf0]  ;;  %v2057_v40 = vld [vmem:[#allocation3 + $0x28] sm:$0xf] }
 0x367   : > { %6348 = vmatpush1.bf16.msra.mxu0 %v6347_v42  ;;  %6254 = vmatprep.subr.bf16.mxu1 %v6253_v43  ;;  %v6367_v42 = vpack.c.bf16 %v4597_v38, %v4593_v37  ;;  %v2070_v43 = vrot.slane %v2054_v8, 4  ;;  %v2071_v44 = vrot.slane %v2057_v40, 4 }
 0x368   : > { %4682 = vmatmul.mubr.f32.gmra.mrb[24].mxu1 %v2113_v53  ;;  %6350 = vmatprep.subr.bf16.mxu0 %v6349_v47  ;;  %v2088_v47 = vld [vmem:[#allocation3 + $0x58] sm:$0xf0] }
 0x369   : > { %4860 = vmatmul.mubr.f32.gmra.mrb[18].mxu0 %v2113_v53  ;;  %4752 = vmatprep.mubr.f32.mxu1 %v6869_v0  ;;  %v2072_v45 = vsel %vm1670_vm4, %v2070_v43, %v2071_v44  ;;  %v2104_v50 = vrot.slane %v2088_v47, 4  ;;  %v4971_v53 = vld [vmem:[#allocation12] sm:$0xf] }
 0x36a   : > { %6256 = vmatpush1.bf16.msra.mxu1 %v6255_v54  ;;  %4930 = vmatprep.mubr.f32.mxu0 %v6869_v0  ;;  %v4987_v54 = vsub.s32 3, %v7331_v12  ;;  %v4980_v57 = vrot.slane %v4971_v53, %v1589_v16 }
 0x36b   : > { %6352 = vmatpush1.bf16.msra.mxu0 %v6351_v55  ;;  %6258 = vmatprep.subr.bf16.mxu1 %v6257_v56  ;;  %v2106_v51 = vsel %vm1670_vm4, %v2104_v50, %v2105_v49  ;;  %v4976_v55 = vrot.slane %v4971_v53, %v1585_v15  ;;  %v4984_v56 = vrot.slane %v4971_v53, %v1593_v13 }
 0x36c   : > { %6354 = vmatprep.subr.bf16.mxu0 %v6353_v59 }
 0x36e   : > { %6260 = vmatpush1.bf16.msra.mxu1 %v6259_v1 }
 0x36f   : > { %6356 = vmatpush1.bf16.msra.mxu0 %v6355_v2  ;;  %6262 = vmatprep.subr.bf16.mxu1 %v6261_v18 }
 0x370   : > { %6358 = vmatprep.subr.bf16.mxu0 %v6357_v14 }
 0x372   : > { %6264 = vmatpush1.bf16.msra.mxu1 %v6263_v5 }
 0x373   : > { %6360 = vmatpush1.bf16.msra.mxu0 %v6359_v23  ;;  %6266 = vmatprep.subr.bf16.mxu1 %v6265_v24 }
 0x374   : > { %6362 = vmatprep.subr.bf16.mxu0 %v6361_v27 }
 0x376   : > { %6268 = vmatpush1.bf16.msra.mxu1 %v6267_v32 }
 0x377   : > { %6364 = vmatpush1.bf16.msra.mxu0 %v6363_v33  ;;  %6270 = vmatprep.subr.bf16.mxu1 %v6269_v7 }
 0x378   : > { %6366 = vmatprep.subr.bf16.mxu0 %v6365_v36 }
 0x37a   : > { %6272 = vmatpush1.bf16.msra.mxu1 %v6271_v41 }
 0x37b   : > { %6368 = vmatpush1.bf16.msra.mxu0 %v6367_v42 }
 0x37d   : > { %4753 = vmatmul.mubr.f32.vlgmr.msra.gmra.mrb[18].mxu1 %v2072_v45 }
 0x37e   : > { %4931 = vmatmul.mubr.f32.vlgmr.msra.gmra.mrb[12].mxu0 %v2072_v45  ;;  %4758 = vmatprep.mubr.f32.mxu1 %v6869_v0 }
 0x37f   : > { %4936 = vmatprep.mubr.f32.mxu0 %v6869_v0 }
 0x381   : > { %4759 = vmatmul.mubr.f32.gmra.mrb[20].mxu1 %v2082_v48 }
 0x382   : > { %4937 = vmatmul.mubr.f32.gmra.mrb[14].mxu0 %v2082_v48  ;;  %4764 = vmatprep.mubr.f32.mxu1 %v6869_v0 }
 0x383   : > { %4942 = vmatprep.mubr.f32.mxu0 %v6869_v0 }
 0x385   : > { %4765 = vmatmul.mubr.f32.gmra.mrb[22].mxu1 %v2106_v51 }
 0x386   : > { %4943 = vmatmul.mubr.f32.gmra.mrb[16].mxu0 %v2106_v51  ;;  %4770 = vmatprep.mubr.f32.mxu1 %v6869_v0 }
 0x387   : > { %4948 = vmatprep.mubr.f32.mxu0 %v6869_v0  ;;  %v4988_v0 = vrot.slane %v4971_v53, %v4987_v54 }
 0x389   : > { %4771 = vmatmul.mubr.f32.gmra.mrb[24].mxu1 %v2115_v52 }
 0x38a   : > { %4949 = vmatmul.mubr.f32.gmra.mrb[18].mxu0 %v2115_v52 }
 0x450   : > { %v4754_v58 = vpop.f32.mrb[18].mxu1 }
 0x451   : > { %v4993_v9 = vadd.f32 %v4976_v55, %v4754_v58  ;;  %v4932_v59 = vpop.f32.mrb[12].mxu0  ;;  %v4756_v60 = vpop.f32.mrb[19].mxu1 }
 0x452   : > { %v4995_v15 = vadd.f32 %v4984_v56, %v4932_v59  ;;  %v4994_v61 = vadd.f32 %v4980_v57, %v4756_v60  ;;  %v4934_v13 = vpop.f32.mrb[13].mxu0 }
 0x453   : > { %v5009_v12 = vmax.f32 %v4993_v9, 0.0  ;;  %v4996_v16 = vadd.f32 %v4988_v0, %v4934_v13 }
 0x454   : > { %v5011_v62 = vmax.f32 %v4995_v15, 0.0  ;;  %v5010_v10 = vmax.f32 %v4994_v61, 0.0  ;;  %v4760_v63 = vpop.f32.mrb[20].mxu1 }
 0x455   : > { %5025 = vst [vmem:[%s7484_s25] sm:$0xff] %v5009_v12  ;;  %v5012_v1 = vmax.f32 %v4996_v16, 0.0  ;;  %v4997_v2 = vadd.f32 %v4976_v55, %v4760_v63  ;;  %v4938_v18 = vpop.f32.mrb[14].mxu0  ;;  %v4762_v3 = vpop.f32.mrb[21].mxu1 }
 0x456   : > { %5027 = vst [vmem:[%s7484_s25 + $0x10] sm:$0xff] %v5011_v62  ;;  %5026 = vst [vmem:[%s7484_s25 + $0x8] sm:$0xff] %v5010_v10  ;;  %v4999_v4 = vadd.f32 %v4984_v56, %v4938_v18  ;;  %v4998_v11 = vadd.f32 %v4980_v57, %v4762_v3  ;;  %v4940_v14 = vpop.f32.mrb[15].mxu0 }
 0x457   : > { %5028 = vst [vmem:[%s7484_s25 + $0x18] sm:$0xff] %v5012_v1  ;;  %v5013_v17 = vmax.f32 %v4997_v2, 0.0  ;;  %v5000_v19 = vadd.f32 %v4988_v0, %v4940_v14 }
 0x458   : > { %v5015_v21 = vmax.f32 %v4999_v4, 0.0  ;;  %v5014_v20 = vmax.f32 %v4998_v11, 0.0  ;;  %v4766_v22 = vpop.f32.mrb[22].mxu1 }
 0x459   : > { %5029 = vst [vmem:[%s7484_s25 + $0x20] sm:$0xff] %v5013_v17  ;;  %v5016_v5 = vmax.f32 %v5000_v19, 0.0  ;;  %v5001_v23 = vadd.f32 %v4976_v55, %v4766_v22  ;;  %v4944_v24 = vpop.f32.mrb[16].mxu0  ;;  %v4768_v25 = vpop.f32.mrb[23].mxu1 }
 0x45a   : > { %5031 = vst [vmem:[%s7484_s25 + $0x30] sm:$0xff] %v5015_v21  ;;  %5030 = vst [vmem:[%s7484_s25 + $0x28] sm:$0xff] %v5014_v20  ;;  %v5003_v6 = vadd.f32 %v4984_v56, %v4944_v24  ;;  %v5002_v26 = vadd.f32 %v4980_v57, %v4768_v25  ;;  %v4946_v27 = vpop.f32.mrb[17].mxu0 }
 0x45b   : > { %5032 = vst [vmem:[%s7484_s25 + $0x38] sm:$0xff] %v5016_v5  ;;  %v5017_v39 = vmax.f32 %v5001_v23, 0.0  ;;  %v5004_v28 = vadd.f32 %v4988_v0, %v4946_v27 }
 0x45c   : > { %v5019_v29 = vmax.f32 %v5003_v6, 0.0  ;;  %v5018_v30 = vmax.f32 %v5002_v26, 0.0  ;;  %v4772_v31 = vpop.f32.mrb[24].mxu1 }
 0x45d   : > { %5033 = vst [vmem:[%s7484_s25 + $0x40] sm:$0xff] %v5017_v39  ;;  %v5020_v32 = vmax.f32 %v5004_v28, 0.0  ;;  %v5005_v33 = vadd.f32 %v4976_v55, %v4772_v31  ;;  %v4950_v7 = vpop.f32.mrb[18].mxu0  ;;  %v4774_v34 = vpop.f32.mrb[25].mxu1 }
 0x45e   : > { %5035 = vst [vmem:[%s7484_s25 + $0x50] sm:$0xff] %v5019_v29  ;;  %5034 = vst [vmem:[%s7484_s25 + $0x48] sm:$0xff] %v5018_v30  ;;  %v5007_v35 = vadd.f32 %v4984_v56, %v4950_v7  ;;  %v5006_v36 = vadd.f32 %v4980_v57, %v4774_v34  ;;  %v4952_v37 = vpop.f32.mrb[19].mxu0 }
 0x45f   : > { %5036 = vst [vmem:[%s7484_s25 + $0x58] sm:$0xff] %v5020_v32  ;;  %v5021_v38 = vmax.f32 %v5005_v33, 0.0  ;;  %v5008_v8 = vadd.f32 %v4988_v0, %v4952_v37 }
 0x460   : > { %v5023_v40 = vmax.f32 %v5007_v35, 0.0  ;;  %v5022_v41 = vmax.f32 %v5006_v36, 0.0 }
 0x461   : > { %5037 = vst [vmem:[%s7484_s25 + $0x60] sm:$0xff] %v5021_v38  ;;  %v5024_v42 = vmax.f32 %v5008_v8, 0.0 }
 0x462   : > { %5039 = vst [vmem:[%s7484_s25 + $0x70] sm:$0xff] %v5023_v40  ;;  %5038 = vst [vmem:[%s7484_s25 + $0x68] sm:$0xff] %v5022_v41 }
 0x463   : > { %5040 = vst [vmem:[%s7484_s25 + $0x78] sm:$0xff] %v5024_v42 }
 0x464 PF: > { %p17_p6 = scmp.ge.s32.totalorder %s7039_s11, 4   ;;  %s7534_s18 = smov %s6848_s19 }
 0x465   : > { %s7535_s19 = smov %s6852_s20  ;;  %s7536_s20 = smov %s7048_s27 }
 0x466   : > { %s7537_s21 = smov %s7039_s11  ;;  %19 = sbr.rel (!%p17_p6) target bundleno = 5 (0x5), region = 115 }
 0x46d   :  { %5065 = vsyncpa [#allocation6], 1 }
 0x46e   :  { %5067 = vsyncpa [#allocation6 + $0x1], 1 }
 0x46f   :  { %5068 = vsyncpa [#allocation8], 1 }
 0x470   :  { %5069 = vsyncpa [#allocation11], 1 }

</bundles_post_ra>
